<compile_context>
chip_gen: v5e
topology: v5e:2x2
jax: 0.10.0
libtpu: 0.0.40
codegen_flags: <defaults>
</compile_context>

<pallas_src>
import jax
import jax.numpy as jnp
from jax.experimental import pallas as pl
from jax.experimental.pallas import tpu as pltpu

# Logical / padded (lane-aligned) feature dims.
D_IN = 784
D_IN_P = 896     # 7 * 128
H1 = 400
H1_P = 512       # 4 * 128
H2 = 100
H2_P = 128
LAT = 2
LAT_OUT_P = 128  # fused latent head: cols [0:2] = mu, [2:4] = logvar, rest 0


def vae_kernel(x_ref, eps_ref,
               w1_ref, b1_ref, w1a_ref, b1a_ref,
               wlat_ref, blat_ref,
               w3_ref, b3_ref, w3a_ref, b3a_ref,
               w4_ref, b4_ref,
               recon_ref, lat_ref):
    f32 = jnp.float32
    bf16 = jnp.bfloat16

    x = x_ref[...]                                               # (TB, 896) f32

    # ---------------- encoder ----------------
    h1 = jnp.maximum(
        jnp.dot(x.astype(bf16), w1_ref[...], preferred_element_type=f32)
        + b1_ref[...], 0.0)                                      # (TB, 512)
    h2 = jnp.maximum(
        jnp.dot(h1.astype(bf16), w1a_ref[...], preferred_element_type=f32)
        + b1a_ref[...], 0.0)                                     # (TB, 128)

    # fused fc21 || fc22 -> one lane-dense slab (cols 0:2 mu, 2:4 logvar)
    lat = (jnp.dot(h2.astype(bf16), wlat_ref[...], preferred_element_type=f32)
           + blat_ref[...])                                      # (TB, 128)
    lat_ref[...] = lat                                           # unmasked 128-wide store

    mu = lat[:, 0:LAT]                                           # (TB, 2)
    logvar = lat[:, LAT:2 * LAT]                                 # (TB, 2)

    # ---------------- reparameterize ----------------
    std = jnp.exp(0.5 * logvar)
    z = mu + eps_ref[...] * std                                  # (TB, 2)

    # ---------------- decoder ----------------
    # fc3 has K=2: do it on the VPU as an outer product, skip the MXU entirely.
    h3 = jnp.maximum(
        z[:, 0:1] * w3_ref[0:1, :] + z[:, 1:2] * w3_ref[1:2, :] + b3_ref[...],
        0.0)                                                     # (TB, 128)
    h4 = jnp.maximum(
        jnp.dot(h3.astype(bf16), w3a_ref[...], preferred_element_type=f32)
        + b3a_ref[...], 0.0)                                     # (TB, 512)
    logits = (jnp.dot(h4.astype(bf16), w4_ref[...], preferred_element_type=f32)
              + b4_ref[...])                                     # (TB, 896)
    recon_ref[...] = jax.nn.sigmoid(logits)


def _uniform(key, shape, bound):
    return jax.random.uniform(key, shape, jnp.float32, -bound, bound)


def init_params(key):
    """torch.nn.Linear-style init (uniform +/- 1/sqrt(fan_in)), weights stored as
    (in, out), zero-padded to lane-aligned shapes, matmul weights in bf16."""
    ks = jax.random.split(key, 7)

    def linear(k, fan_in, fan_out, pad_in, pad_out, wdtype=jnp.bfloat16):
        kw, kb = jax.random.split(k)
        bound = 1.0 / (fan_in ** 0.5)
        w = _uniform(kw, (fan_in, fan_out), bound)
        b = _uniform(kb, (1, fan_out), bound)
        wp = jnp.zeros((pad_in, pad_out), jnp.float32).at[:fan_in, :fan_out].set(w)
        bp = jnp.zeros((1, pad_out), jnp.float32).at[:, :fan_out].set(b)
        return wp.astype(wdtype), bp

    params = {}
    params["fc1"] = linear(ks[0], D_IN, H1, D_IN_P, H1_P)
    params["fc1a"] = linear(ks[1], H1, H2, H1_P, H2_P)

    # fused fc21 || fc22 head
    k21w, k21b = jax.random.split(ks[2])
    k22w, k22b = jax.random.split(ks[3])
    bound = 1.0 / (H2 ** 0.5)
    w21 = _uniform(k21w, (H2, LAT), bound)
    b21 = _uniform(k21b, (1, LAT), bound)
    w22 = _uniform(k22w, (H2, LAT), bound)
    b22 = _uniform(k22b, (1, LAT), bound)
    wlat = (jnp.zeros((H2_P, LAT_OUT_P), jnp.float32)
            .at[:H2, 0:LAT].set(w21)
            .at[:H2, LAT:2 * LAT].set(w22)).astype(jnp.bfloat16)
    blat = (jnp.zeros((1, LAT_OUT_P), jnp.float32)
            .at[:, 0:LAT].set(b21)
            .at[:, LAT:2 * LAT].set(b22))
    params["lat"] = (wlat, blat)

    # fc3 (K=2) is computed on the VPU -> keep this tiny weight in f32.
    params["fc3"] = linear(ks[4], LAT, H2, LAT, H2_P, wdtype=jnp.float32)
    params["fc3a"] = linear(ks[5], H2, H1, H2_P, H1_P)
    params["fc4"] = linear(ks[6], H1, D_IN, H1_P, D_IN_P)
    return params


def vae_forward(x, eps, params):
    """x: anything reshapeable to (-1, 784); eps: (B, 2) reparameterization noise."""
    x2 = x.reshape(-1, D_IN).astype(jnp.float32)
    B = x2.shape[0]
    assert eps.shape == (B, LAT), f"eps must be ({B}, {LAT}), got {eps.shape}"

    # Batch tile: 256 rows for large batches; small batches run in one tile.
    TB = 256 if B >= 256 else max(8, -(-B // 8) * 8)
    Bp = -(-B // TB) * TB

    xp = jnp.zeros((Bp, D_IN_P), jnp.float32).at[:B, :D_IN].set(x2)
    epsp = jnp.zeros((Bp, LAT), jnp.float32).at[:B].set(eps.astype(jnp.float32))

    (w1, b1) = params["fc1"]
    (w1a, b1a) = params["fc1a"]
    (wlat, blat) = params["lat"]
    (w3, b3) = params["fc3"]
    (w3a, b3a) = params["fc3a"]
    (w4, b4) = params["fc4"]
    weights = [w1, b1, w1a, b1a, wlat, blat, w3, b3, w3a, b3a, w4, b4]

    def row_spec(shape):
        return pl.BlockSpec(shape, lambda i: (i, 0))

    def fixed_spec(arr):
        # Constant block index -> loaded once, stays resident across the grid.
        return pl.BlockSpec(arr.shape, lambda i: (0, 0))

    in_specs = [row_spec((TB, D_IN_P)), row_spec((TB, LAT))] + \
               [fixed_spec(w) for w in weights]
    out_specs = (row_spec((TB, D_IN_P)), row_spec((TB, LAT_OUT_P)))
    out_shape = (jax.ShapeDtypeStruct((Bp, D_IN_P), jnp.float32),
                 jax.ShapeDtypeStruct((Bp, LAT_OUT_P), jnp.float32))

    flops = 2 * Bp * (D_IN_P * H1_P + H1_P * H2_P + H2_P * LAT_OUT_P
                      + H2_P * H1_P + H1_P * D_IN_P)
    bytes_accessed = int(
        xp.size * 4 + epsp.size * 4
        + sum(int(w.size) * w.dtype.itemsize for w in weights)
        + Bp * (D_IN_P + LAT_OUT_P) * 4)
    cost = pl.CostEstimate(flops=int(flops),
                           transcendentals=int(Bp * (2 * LAT + D_IN)),
                           bytes_accessed=bytes_accessed)

    recon_p, lat_p = pl.pallas_call(
        vae_kernel,
        out_shape=out_shape,
        grid=(Bp // TB,),
        in_specs=in_specs,
        out_specs=out_specs,
        compiler_params=pltpu.CompilerParams(
            dimension_semantics=("parallel",),
            vmem_limit_bytes=32 * 1024 * 1024),
        cost_estimate=cost,
    )(xp, epsp, *weights)

    recon = recon_p[:B, :D_IN]
    mu = lat_p[:B, 0:LAT]
    logvar = lat_p[:B, LAT:2 * LAT]
    return recon, mu, logvar


def vae_reference(x, eps, params):
    """Pure-JAX reference using the same padded bf16 weights / f32 accumulation."""
    f32, bf16 = jnp.float32, jnp.bfloat16
    x2 = x.reshape(-1, D_IN).astype(f32)
    B = x2.shape[0]
    xp = jnp.zeros((B, D_IN_P), f32).at[:, :D_IN].set(x2)

    (w1, b1) = params["fc1"]
    (w1a, b1a) = params["fc1a"]
    (wlat, blat) = params["lat"]
    (w3, b3) = params["fc3"]
    (w3a, b3a) = params["fc3a"]
    (w4, b4) = params["fc4"]

    h1 = jnp.maximum(jnp.dot(xp.astype(bf16), w1, preferred_element_type=f32) + b1, 0.0)
    h2 = jnp.maximum(jnp.dot(h1.astype(bf16), w1a, preferred_element_type=f32) + b1a, 0.0)
    lat = jnp.dot(h2.astype(bf16), wlat, preferred_element_type=f32) + blat
    mu = lat[:, 0:LAT]
    logvar = lat[:, LAT:2 * LAT]
    z = mu + eps.astype(f32) * jnp.exp(0.5 * logvar)
    h3 = jnp.maximum(z @ w3 + b3, 0.0)
    h4 = jnp.maximum(jnp.dot(h3.astype(bf16), w3a, preferred_element_type=f32) + b3a, 0.0)
    logits = jnp.dot(h4.astype(bf16), w4, preferred_element_type=f32) + b4
    recon = jax.nn.sigmoid(logits)
    return recon[:, :D_IN], mu, logvar


if __name__ == "__main__":
    key = jax.random.PRNGKey(0)
    key, kx, keps, kp = jax.random.split(key, 4)
    params = init_params(kp)

    # Small MNIST-like test (single grid step).
    B = 8
    x = jax.random.uniform(kx, (B, 1, 28, 28), jnp.float32)
    eps = jax.random.normal(keps, (B, LAT), jnp.float32)

    recon, mu, logvar = vae_forward(x, eps, params)
    jax.block_until_ready((recon, mu, logvar))

    r_ref, m_ref, lv_ref = vae_reference(x, eps, params)
    assert recon.shape == (B, D_IN) and mu.shape == (B, LAT) and logvar.shape == (B, LAT)
    assert jnp.allclose(recon, r_ref, atol=1e-3, rtol=1e-3)
    assert jnp.allclose(mu, m_ref, atol=1e-3, rtol=1e-3)
    assert jnp.allclose(logvar, lv_ref, atol=1e-3, rtol=1e-3)

    # Larger, non-multiple batch -> exercises the batch grid + padding path.
    key, kx2, keps2 = jax.random.split(key, 3)
    B2 = 600
    x2 = jax.random.uniform(kx2, (B2, 1, 28, 28), jnp.float32)
    eps2 = jax.random.normal(keps2, (B2, LAT), jnp.float32)
    recon2, mu2, logvar2 = vae_forward(x2, eps2, params)
    jax.block_until_ready((recon2, mu2, logvar2))
    r2, m2, lv2 = vae_reference(x2, eps2, params)
    assert recon2.shape == (B2, D_IN)
    assert jnp.allclose(recon2, r2, atol=1e-3, rtol=1e-3)
    assert jnp.allclose(mu2, m2, atol=1e-3, rtol=1e-3)
    assert jnp.allclose(logvar2, lv2, atol=1e-3, rtol=1e-3)

    print("KERNEL_OK")
</pallas_src>

<mosaic_0001>
module attributes {stable_mosaic.version = 11 : i64} {
  func.func @vae_kernel(%arg0: i32, %arg1: memref<8x896xf32, #tpu.memory_space<vmem>>, %arg2: memref<8x2xf32, #tpu.memory_space<vmem>>, %arg3: memref<896x512xbf16, #tpu.memory_space<vmem>>, %arg4: memref<1x512xf32, #tpu.memory_space<vmem>>, %arg5: memref<512x128xbf16, #tpu.memory_space<vmem>>, %arg6: memref<1x128xf32, #tpu.memory_space<vmem>>, %arg7: memref<128x128xbf16, #tpu.memory_space<vmem>>, %arg8: memref<1x128xf32, #tpu.memory_space<vmem>>, %arg9: memref<2x128xf32, #tpu.memory_space<vmem>>, %arg10: memref<1x128xf32, #tpu.memory_space<vmem>>, %arg11: memref<128x512xbf16, #tpu.memory_space<vmem>>, %arg12: memref<1x512xf32, #tpu.memory_space<vmem>>, %arg13: memref<512x896xbf16, #tpu.memory_space<vmem>>, %arg14: memref<1x896xf32, #tpu.memory_space<vmem>>, %arg15: memref<8x896xf32, #tpu.memory_space<vmem>>, %arg16: memref<8x128xf32, #tpu.memory_space<vmem>>) attributes {dimension_semantics = [#tpu.dimension_semantics<parallel>], iteration_bounds = array<i64: 1>, scalar_prefetch = 0 : i64, scratch_operands = 0 : i64, tpu.core_type = #tpu.core_type<tc>, window_params = [{transform_indices = @transform_0, window_bounds = array<i64: 8, 896>}, {transform_indices = @transform_1, window_bounds = array<i64: 8, 2>}, {pipeline_mode = #tpu.pipeline_mode<synchronous>, transform_indices = @transform_2, window_bounds = array<i64: 896, 512>}, {pipeline_mode = #tpu.pipeline_mode<synchronous>, transform_indices = @transform_3, window_bounds = array<i64: 1, 512>}, {pipeline_mode = #tpu.pipeline_mode<synchronous>, transform_indices = @transform_4, window_bounds = array<i64: 512, 128>}, {pipeline_mode = #tpu.pipeline_mode<synchronous>, transform_indices = @transform_5, window_bounds = array<i64: 1, 128>}, {pipeline_mode = #tpu.pipeline_mode<synchronous>, transform_indices = @transform_6, window_bounds = array<i64: 128, 128>}, {pipeline_mode = #tpu.pipeline_mode<synchronous>, transform_indices = @transform_7, window_bounds = array<i64: 1, 128>}, {pipeline_mode = #tpu.pipeline_mode<synchronous>, transform_indices = @transform_8, window_bounds = array<i64: 2, 128>}, {pipeline_mode = #tpu.pipeline_mode<synchronous>, transform_indices = @transform_9, window_bounds = array<i64: 1, 128>}, {pipeline_mode = #tpu.pipeline_mode<synchronous>, transform_indices = @transform_10, window_bounds = array<i64: 128, 512>}, {pipeline_mode = #tpu.pipeline_mode<synchronous>, transform_indices = @transform_11, window_bounds = array<i64: 1, 512>}, {pipeline_mode = #tpu.pipeline_mode<synchronous>, transform_indices = @transform_12, window_bounds = array<i64: 512, 896>}, {pipeline_mode = #tpu.pipeline_mode<synchronous>, transform_indices = @transform_13, window_bounds = array<i64: 1, 896>}, {transform_indices = @transform_14, window_bounds = array<i64: 8, 896>}, {transform_indices = @transform_15, window_bounds = array<i64: 8, 128>}]} {
    %c0 = arith.constant 0 : index
    %c0_0 = arith.constant 0 : index
    %0 = vector.load %arg1[%c0, %c0_0] : memref<8x896xf32, #tpu.memory_space<vmem>>, vector<8x896xf32>
    %1 = arith.truncf %0 : vector<8x896xf32> to vector<8x896xbf16>
    %c0_1 = arith.constant 0 : index
    %c0_2 = arith.constant 0 : index
    %2 = vector.load %arg3[%c0_1, %c0_2] : memref<896x512xbf16, #tpu.memory_space<vmem>>, vector<896x512xbf16>
    %cst = arith.constant dense<0.000000e+00> : vector<8x512xf32>
    %3 = tpu.matmul %1, %2, %cst {dimension_numbers = #tpu.dot_dimension_numbers<[1], [0], [0], [1], [0, 0, 1, 1], [], []>} : vector<8x896xbf16>, vector<896x512xbf16>, vector<8x512xf32> -> vector<8x512xf32>
    %c0_3 = arith.constant 0 : index
    %c0_4 = arith.constant 0 : index
    %4 = vector.load %arg4[%c0_3, %c0_4] : memref<1x512xf32, #tpu.memory_space<vmem>>, vector<1x512xf32>
    %5 = vector.broadcast %4 : vector<1x512xf32> to vector<8x512xf32>
    %6 = arith.addf %3, %5 : vector<8x512xf32>
    %cst_5 = arith.constant 0.000000e+00 : f32
    %7 = vector.broadcast %cst_5 : f32 to vector<8x512xf32>
    %8 = arith.maximumf %6, %7 : vector<8x512xf32>
    %9 = arith.truncf %8 : vector<8x512xf32> to vector<8x512xbf16>
    %c0_6 = arith.constant 0 : index
    %c0_7 = arith.constant 0 : index
    %10 = vector.load %arg5[%c0_6, %c0_7] : memref<512x128xbf16, #tpu.memory_space<vmem>>, vector<512x128xbf16>
    %cst_8 = arith.constant dense<0.000000e+00> : vector<8x128xf32>
    %11 = tpu.matmul %9, %10, %cst_8 {dimension_numbers = #tpu.dot_dimension_numbers<[1], [0], [0], [1], [0, 0, 1, 1], [], []>} : vector<8x512xbf16>, vector<512x128xbf16>, vector<8x128xf32> -> vector<8x128xf32>
    %c0_9 = arith.constant 0 : index
    %c0_10 = arith.constant 0 : index
    %12 = vector.load %arg6[%c0_9, %c0_10] : memref<1x128xf32, #tpu.memory_space<vmem>>, vector<1x128xf32>
    %13 = vector.broadcast %12 : vector<1x128xf32> to vector<8x128xf32>
    %14 = arith.addf %11, %13 : vector<8x128xf32>
    %cst_11 = arith.constant 0.000000e+00 : f32
    %15 = vector.broadcast %cst_11 : f32 to vector<8x128xf32>
    %16 = arith.maximumf %14, %15 : vector<8x128xf32>
    %17 = arith.truncf %16 : vector<8x128xf32> to vector<8x128xbf16>
    %c0_12 = arith.constant 0 : index
    %c0_13 = arith.constant 0 : index
    %18 = vector.load %arg7[%c0_12, %c0_13] : memref<128x128xbf16, #tpu.memory_space<vmem>>, vector<128x128xbf16>
    %cst_14 = arith.constant dense<0.000000e+00> : vector<8x128xf32>
    %19 = tpu.matmul %17, %18, %cst_14 {dimension_numbers = #tpu.dot_dimension_numbers<[1], [0], [0], [1], [0, 0, 1, 1], [], []>} : vector<8x128xbf16>, vector<128x128xbf16>, vector<8x128xf32> -> vector<8x128xf32>
    %c0_15 = arith.constant 0 : index
    %c0_16 = arith.constant 0 : index
    %20 = vector.load %arg8[%c0_15, %c0_16] : memref<1x128xf32, #tpu.memory_space<vmem>>, vector<1x128xf32>
    %21 = vector.broadcast %20 : vector<1x128xf32> to vector<8x128xf32>
    %22 = arith.addf %19, %21 : vector<8x128xf32>
    %c0_17 = arith.constant 0 : index
    %c0_18 = arith.constant 0 : index
    %23 = vector.load %arg16[%c0_17, %c0_18] : memref<8x128xf32, #tpu.memory_space<vmem>>, vector<8x128xf32>
    tpu.vector_store %arg16[%c0_17, %c0_18], %22 {strides = array<i32>} : memref<8x128xf32, #tpu.memory_space<vmem>>, vector<8x128xf32>,
    %24 = vector.extract_strided_slice %22 {offsets = [0, 0], sizes = [8, 2], strides = [1, 1]} : vector<8x128xf32> to vector<8x2xf32>
    %25 = vector.extract_strided_slice %22 {offsets = [0, 2], sizes = [8, 2], strides = [1, 1]} : vector<8x128xf32> to vector<8x2xf32>
    %cst_19 = arith.constant 5.000000e-01 : f32
    %26 = vector.broadcast %cst_19 : f32 to vector<8x2xf32>
    %27 = arith.mulf %26, %25 : vector<8x2xf32>
    %28 = math.exp %27 : vector<8x2xf32>
    %c0_20 = arith.constant 0 : index
    %c0_21 = arith.constant 0 : index
    %29 = vector.load %arg2[%c0_20, %c0_21] : memref<8x2xf32, #tpu.memory_space<vmem>>, vector<8x2xf32>
    %30 = arith.mulf %29, %28 : vector<8x2xf32>
    %31 = arith.addf %24, %30 : vector<8x2xf32>
    %32 = vector.extract_strided_slice %31 {offsets = [0, 0], sizes = [8, 1], strides = [1, 1]} : vector<8x2xf32> to vector<8x1xf32>
    %c0_22 = arith.constant 0 : index
    %c0_23 = arith.constant 0 : index
    %33 = vector.load %arg9[%c0_22, %c0_23] : memref<2x128xf32, #tpu.memory_space<vmem>>, vector<1x128xf32>
    %34 = vector.broadcast %32 : vector<8x1xf32> to vector<8x128xf32>
    %35 = vector.broadcast %33 : vector<1x128xf32> to vector<8x128xf32>
    %36 = arith.mulf %34, %35 : vector<8x128xf32>
    %37 = vector.extract_strided_slice %31 {offsets = [0, 1], sizes = [8, 1], strides = [1, 1]} : vector<8x2xf32> to vector<8x1xf32>
    %c1 = arith.constant 1 : index
    %c0_24 = arith.constant 0 : index
    %38 = vector.load %arg9[%c1, %c0_24] : memref<2x128xf32, #tpu.memory_space<vmem>>, vector<1x128xf32>
    %39 = vector.broadcast %37 : vector<8x1xf32> to vector<8x128xf32>
    %40 = vector.broadcast %38 : vector<1x128xf32> to vector<8x128xf32>
    %41 = arith.mulf %39, %40 : vector<8x128xf32>
    %42 = arith.addf %36, %41 : vector<8x128xf32>
    %c0_25 = arith.constant 0 : index
    %c0_26 = arith.constant 0 : index
    %43 = vector.load %arg10[%c0_25, %c0_26] : memref<1x128xf32, #tpu.memory_space<vmem>>, vector<1x128xf32>
    %44 = vector.broadcast %43 : vector<1x128xf32> to vector<8x128xf32>
    %45 = arith.addf %42, %44 : vector<8x128xf32>
    %cst_27 = arith.constant 0.000000e+00 : f32
    %46 = vector.broadcast %cst_27 : f32 to vector<8x128xf32>
    %47 = arith.maximumf %45, %46 : vector<8x128xf32>
    %48 = arith.truncf %47 : vector<8x128xf32> to vector<8x128xbf16>
    %c0_28 = arith.constant 0 : index
    %c0_29 = arith.constant 0 : index
    %49 = vector.load %arg11[%c0_28, %c0_29] : memref<128x512xbf16, #tpu.memory_space<vmem>>, vector<128x512xbf16>
    %cst_30 = arith.constant dense<0.000000e+00> : vector<8x512xf32>
    %50 = tpu.matmul %48, %49, %cst_30 {dimension_numbers = #tpu.dot_dimension_numbers<[1], [0], [0], [1], [0, 0, 1, 1], [], []>} : vector<8x128xbf16>, vector<128x512xbf16>, vector<8x512xf32> -> vector<8x512xf32>
    %c0_31 = arith.constant 0 : index
    %c0_32 = arith.constant 0 : index
    %51 = vector.load %arg12[%c0_31, %c0_32] : memref<1x512xf32, #tpu.memory_space<vmem>>, vector<1x512xf32>
    %52 = vector.broadcast %51 : vector<1x512xf32> to vector<8x512xf32>
    %53 = arith.addf %50, %52 : vector<8x512xf32>
    %cst_33 = arith.constant 0.000000e+00 : f32
    %54 = vector.broadcast %cst_33 : f32 to vector<8x512xf32>
    %55 = arith.maximumf %53, %54 : vector<8x512xf32>
    %56 = arith.truncf %55 : vector<8x512xf32> to vector<8x512xbf16>
    %c0_34 = arith.constant 0 : index
    %c0_35 = arith.constant 0 : index
    %57 = vector.load %arg13[%c0_34, %c0_35] : memref<512x896xbf16, #tpu.memory_space<vmem>>, vector<512x896xbf16>
    %cst_36 = arith.constant dense<0.000000e+00> : vector<8x896xf32>
    %58 = tpu.matmul %56, %57, %cst_36 {dimension_numbers = #tpu.dot_dimension_numbers<[1], [0], [0], [1], [0, 0, 1, 1], [], []>} : vector<8x512xbf16>, vector<512x896xbf16>, vector<8x896xf32> -> vector<8x896xf32>
    %c0_37 = arith.constant 0 : index
    %c0_38 = arith.constant 0 : index
    %59 = vector.load %arg14[%c0_37, %c0_38] : memref<1x896xf32, #tpu.memory_space<vmem>>, vector<1x896xf32>
    %60 = vector.broadcast %59 : vector<1x896xf32> to vector<8x896xf32>
    %61 = arith.addf %58, %60 : vector<8x896xf32>
    %62 = arith.negf %61 : vector<8x896xf32>
    %63 = math.exp %62 : vector<8x896xf32>
    %cst_39 = arith.constant 1.000000e+00 : f32
    %64 = vector.broadcast %cst_39 : f32 to vector<8x896xf32>
    %65 = arith.addf %64, %63 : vector<8x896xf32>
    %66 = arith.divf %64, %65 : vector<8x896xf32>
    %c0_40 = arith.constant 0 : index
    %c0_41 = arith.constant 0 : index
    %67 = vector.load %arg15[%c0_40, %c0_41] : memref<8x896xf32, #tpu.memory_space<vmem>>, vector<8x896xf32>
    tpu.vector_store %arg15[%c0_40, %c0_41], %66 {strides = array<i32>} : memref<8x896xf32, #tpu.memory_space<vmem>>, vector<8x896xf32>,
    return
  }
  func.func @transform_0(%arg0: i32) -> (i32, i32) {
    %c0_i32 = arith.constant 0 : i32
    %c0_i32_0 = arith.constant 0 : i32
    return %arg0, %c0_i32 : i32, i32
  }
  func.func @transform_1(%arg0: i32) -> (i32, i32) {
    %c0_i32 = arith.constant 0 : i32
    %c0_i32_0 = arith.constant 0 : i32
    return %arg0, %c0_i32 : i32, i32
  }
  func.func @transform_2(%arg0: i32) -> (i32, i32) {
    %c0_i32 = arith.constant 0 : i32
    %c0_i32_0 = arith.constant 0 : i32
    %c0_i32_1 = arith.constant 0 : i32
    return %c0_i32, %c0_i32_0 : i32, i32
  }
  func.func @transform_3(%arg0: i32) -> (i32, i32) {
    %c0_i32 = arith.constant 0 : i32
    %c0_i32_0 = arith.constant 0 : i32
    %c0_i32_1 = arith.constant 0 : i32
    return %c0_i32, %c0_i32_0 : i32, i32
  }
  func.func @transform_4(%arg0: i32) -> (i32, i32) {
    %c0_i32 = arith.constant 0 : i32
    %c0_i32_0 = arith.constant 0 : i32
    %c0_i32_1 = arith.constant 0 : i32
    return %c0_i32, %c0_i32_0 : i32, i32
  }
  func.func @transform_5(%arg0: i32) -> (i32, i32) {
    %c0_i32 = arith.constant 0 : i32
    %c0_i32_0 = arith.constant 0 : i32
    %c0_i32_1 = arith.constant 0 : i32
    return %c0_i32, %c0_i32_0 : i32, i32
  }
  func.func @transform_6(%arg0: i32) -> (i32, i32) {
    %c0_i32 = arith.constant 0 : i32
    %c0_i32_0 = arith.constant 0 : i32
    %c0_i32_1 = arith.constant 0 : i32
    return %c0_i32, %c0_i32_0 : i32, i32
  }
  func.func @transform_7(%arg0: i32) -> (i32, i32) {
    %c0_i32 = arith.constant 0 : i32
    %c0_i32_0 = arith.constant 0 : i32
    %c0_i32_1 = arith.constant 0 : i32
    return %c0_i32, %c0_i32_0 : i32, i32
  }
  func.func @transform_8(%arg0: i32) -> (i32, i32) {
    %c0_i32 = arith.constant 0 : i32
    %c0_i32_0 = arith.constant 0 : i32
    %c0_i32_1 = arith.constant 0 : i32
    return %c0_i32, %c0_i32_0 : i32, i32
  }
  func.func @transform_9(%arg0: i32) -> (i32, i32) {
    %c0_i32 = arith.constant 0 : i32
    %c0_i32_0 = arith.constant 0 : i32
    %c0_i32_1 = arith.constant 0 : i32
    return %c0_i32, %c0_i32_0 : i32, i32
  }
  func.func @transform_10(%arg0: i32) -> (i32, i32) {
    %c0_i32 = arith.constant 0 : i32
    %c0_i32_0 = arith.constant 0 : i32
    %c0_i32_1 = arith.constant 0 : i32
    return %c0_i32, %c0_i32_0 : i32, i32
  }
  func.func @transform_11(%arg0: i32) -> (i32, i32) {
    %c0_i32 = arith.constant 0 : i32
    %c0_i32_0 = arith.constant 0 : i32
    %c0_i32_1 = arith.constant 0 : i32
    return %c0_i32, %c0_i32_0 : i32, i32
  }
  func.func @transform_12(%arg0: i32) -> (i32, i32) {
    %c0_i32 = arith.constant 0 : i32
    %c0_i32_0 = arith.constant 0 : i32
    %c0_i32_1 = arith.constant 0 : i32
    return %c0_i32, %c0_i32_0 : i32, i32
  }
  func.func @transform_13(%arg0: i32) -> (i32, i32) {
    %c0_i32 = arith.constant 0 : i32
    %c0_i32_0 = arith.constant 0 : i32
    %c0_i32_1 = arith.constant 0 : i32
    return %c0_i32, %c0_i32_0 : i32, i32
  }
  func.func @transform_14(%arg0: i32) -> (i32, i32) {
    %c0_i32 = arith.constant 0 : i32
    %c0_i32_0 = arith.constant 0 : i32
    return %arg0, %c0_i32 : i32, i32
  }
  func.func @transform_15(%arg0: i32) -> (i32, i32) {
    %c0_i32 = arith.constant 0 : i32
    %c0_i32_0 = arith.constant 0 : i32
    return %arg0, %c0_i32 : i32, i32
  }
}

</mosaic_0001>

<bundles_post_ra>
// kernel: tpu_custom_call.1
= control target key start
LH: loop header
LB: loop body
LE: loop exit
PB: predicated region body
PF: predicated region fallthrough
CT: control target
= control target key end

     0   :  { %21 = vsyncpa [#allocation3], 0  ;;  %s7767_s0 = inlined_call_operand.hbm [shape: f32[8,896], index: 0, kind: input, shape index: {}]   ;;  %s7768_s1 = inlined_call_operand.vmem [shape: f32[8,2], index: 1, kind: input, shape index: {}]   ;;  %s7769_s2 = inlined_call_operand.hbm [shape: bf16[896,512], index: 2, kind: input, shape index: {}]   ;;  %s7770_s3 = inlined_call_operand.vmem [shape: f32[1,512], index: 3, kind: input, shape index: {}]   ;;  %s7771_s4 = inlined_call_operand.hbm [shape: bf16[512,128], index: 4, kind: input, shape index: {}]   ;;  %s7772_s5 = inlined_call_operand.hbm [shape: f32[1,128], index: 5, kind: input, shape index: {}]   ;;  %s7773_s6 = inlined_call_operand.hbm [shape: bf16[128,128], index: 6, kind: input, shape index: {}]   ;;  %s7774_s7 = inlined_call_operand.hbm [shape: f32[1,128], index: 7, kind: input, shape index: {}]   ;;  %s7775_s8 = inlined_call_operand.vmem [shape: f32[2,128], index: 8, kind: input, shape index: {}]   ;;  %s7776_s9 = inlined_call_operand.vmem [shape: f32[1,128], index: 9, kind: input, shape index: {}]   ;;  %s7777_s10 = inlined_call_operand.hbm [shape: bf16[128,512], index: 10, kind: input, shape index: {}]   ;;  %s7778_s11 = inlined_call_operand.vmem [shape: f32[1,512], index: 11, kind: input, shape index: {}]   ;;  %s7779_s12 = inlined_call_operand.hbm [shape: bf16[512,896], index: 12, kind: input, shape index: {}]   ;;  %s7780_s13 = inlined_call_operand.vmem [shape: f32[1,896], index: 13, kind: input, shape index: {}]   ;;  %s7781_s14 = inlined_call_operand.hbm [shape: f32[8,896], index: 14, kind: output, shape index: {0}]   ;;  %s7782_s15 = inlined_call_operand.hbm [shape: f32[8,128], index: 15, kind: output, shape index: {1}]  }
   0x1   :  { %22 = vsyncpa [#allocation6], 0 }
   0x2   :  { %23 = vsyncpa [#allocation9], 0 }
   0x3   :  { %24 = vsyncpa [#allocation12], 0 }
   0x4   :  { %25 = vsyncpa [#allocation15], 0 }
   0x5   :  { %26 = vsyncpa [#allocation4], 0  ;;  %s45_s20 = sshll.u32 %s7769_s2, 4  ;;  %s46_s20 = int_to_ptr.hbm [resolvable:$true] %s45_s20 }
   0x6   :  { %27 = vsyncpa [#allocation18], 0  ;;  %s7484_s21 = smov [#allocation5]   ;;  %s74_s25 = sshll.u32 %s7772_s5, 4  ;;  %s75_s25 = int_to_ptr.hbm [resolvable:$true] %s74_s25 }
   0x7   :  { %s47_s22 = sshll.u32 %s7484_s21, 4  ;;  %s7485_s26 = smov 256   ;;  %s48_s22 = int_to_ptr.vmem [resolvable:$true] %s47_s22 }
   0x8   :  { %s7486_s27 = smov 16   ;;  %s7487_s28 = smov [#allocation8]  }
   0x9   :  { %53 = dma.hbm_to_vmem [thread:$0]  %s46_s20, 28672, %s48_s22, [#allocation6], %s7485_s26, %s7485_s26, %s7486_s27  }
   0xa   :  { %s76_s29 = sshll.u32 %s7487_s28, 4  ;;  %s98_s16 = sshll.u32 %s7774_s7, 4  ;;  %s77_s29 = int_to_ptr.vmem [resolvable:$true] %s76_s29  ;;  %s99_s16 = int_to_ptr.hbm [resolvable:$true] %s98_s16 }
   0xb   :  { %79 = dma.hbm_to_vmem [thread:$0]  %s75_s25, 16, %s77_s29, [#allocation9]  }
   0xc   :  { %s33_s5 = sshll.u32 %s7767_s0, 4  ;;  %s7488_s19 = smov [#allocation11]   ;;  %s34_s5 = int_to_ptr.hbm [resolvable:$true] %s33_s5 }
   0xd   :  { %s100_s21 = sshll.u32 %s7488_s19, 4  ;;  %s7489_s20 = smov [#allocation2]   ;;  %s101_s21 = int_to_ptr.vmem [resolvable:$true] %s100_s21 }
   0xe   :  { %103 = dma.hbm_to_vmem [thread:$0]  %s99_s16, 16, %s101_s21, [#allocation12]  }
   0xf   :  { %s35_s22 = sshll.u32 %s7489_s20, 4  ;;  %s60_s28 = sshll.u32 %s7771_s4, 4  ;;  %s36_s22 = int_to_ptr.vmem [resolvable:$true] %s35_s22  ;;  %s61_s28 = int_to_ptr.hbm [resolvable:$true] %s60_s28 }
  0x10   :  { %38 = dma.hbm_to_vmem [thread:$0]  %s34_s5, 896, %s36_s22, [#allocation3]  }
  0x11   :  { %s7490_s7 = smov [#allocation7]   ;;  %s84_s0 = sshll.u32 %s7773_s6, 4  ;;  %s85_s0 = int_to_ptr.hbm [resolvable:$true] %s84_s0 }
  0x12   :  { %s62_s25 = sshll.u32 %s7490_s7, 4  ;;  %s7491_s2 = smov 64   ;;  %s63_s25 = int_to_ptr.vmem [resolvable:$true] %s62_s25 }
  0x13   :  { %s7492_s17 = smov 4   ;;  %s7493_s16 = smov [#allocation10]  }
  0x14   :  { %68 = dma.hbm_to_vmem [thread:$0]  %s61_s28, 4096, %s63_s25, [#allocation6], %s7491_s2, %s7491_s2, %s7492_s17  }
  0x15   :  { %s86_s18 = sshll.u32 %s7493_s16, 4  ;;  %s112_s4 = sshll.u32 %s7777_s10, 4  ;;  %s87_s18 = int_to_ptr.vmem [resolvable:$true] %s86_s18  ;;  %s113_s4 = int_to_ptr.hbm [resolvable:$true] %s112_s4 }
  0x16   :  { %92 = dma.hbm_to_vmem [thread:$0]  %s85_s0, 1024, %s87_s18, [#allocation9], %s7491_s2, %s7491_s2, %s7492_s17  }
  0x17   :  { %s127_s22 = sshll.u32 %s7779_s12, 4  ;;  %s7494_s23 = smov [#allocation13]   ;;  %s128_s22 = int_to_ptr.hbm [resolvable:$true] %s127_s22 }
  0x18   :  { %s114_s24 = sshll.u32 %s7494_s23, 4  ;;  %s7495_s6 = smov [#allocation14]   ;;  %s115_s24 = int_to_ptr.vmem [resolvable:$true] %s114_s24 }
  0x19   :  { %120 = dma.hbm_to_vmem [thread:$0]  %s113_s4, 4096, %s115_s24, [#allocation12], %s7485_s26, %s7485_s26, %s7486_s27  }
  0x1a   :  { %s129_s28 = sshll.u32 %s7495_s6, 4  ;;  %s7496_s7 = smov 448   ;;  %s130_s28 = int_to_ptr.vmem [resolvable:$true] %s129_s28 }
  0x1b   :  { %s7497_s10 = smov 28  }
  0x1c   :  { %135 = dma.hbm_to_vmem [thread:$0]  %s128_s22, 28672, %s130_s28, [#allocation15], %s7496_s7, %s7496_s7, %s7497_s10  }
  0x1d   :  { %7470 = dma.done.wait [#allocation3], 896  }
  0x1e   :  { %7471 = vsyncadd [#allocation3], 4294966400 }
  0x1f   :  { %7472 = dma.done.wait [#allocation6], 32768  }
  0x20   :  { %7473 = vsyncadd [#allocation6], 4294934528 }
  0x21   :  { %7474 = dma.done.wait [#allocation9], 1040  }
  0x22   :  { %7475 = vsyncadd [#allocation9], 4294966256 }
  0x23   :  { %7476 = dma.done.wait [#allocation12], 4112  }
  0x24   :  { %7477 = vsyncadd [#allocation12], 4294963184 }
  0x25   :  { %7478 = dma.done.wait [#allocation15], 28672  }
  0x26   :  { %7479 = vsyncadd [#allocation15], 4294938624  ;;  %v4680_v0 = vld [vmem:[#allocation5 + $0xe0] sm:$0xf]  ;;  %v6683_v1 = vld [vmem:[#allocation5 + $0xec] sm:$0xf0] }
  0x27   :  { %v4808_v2 = vld [vmem:[#allocation5 + $0x1e0] sm:$0xf]  ;;  %v4681_v3 = vor.u32 %v6683_v1, %v4680_v0  ;;  %v6715_v4 = vld [vmem:[#allocation5 + $0x1ec] sm:$0xf0]  ;;  %s4547_s4 = sshll.u32 %s7782_s15, 4  ;;  %s7502_s15 = smov [#allocation16]   ;;  %s4548_s4 = int_to_ptr.hbm [resolvable:$true] %s4547_s4 }
  0x28   :  { %v4936_v5 = vld [vmem:[#allocation5 + $0x2e0] sm:$0xf]  ;;  %v6747_v6 = vld [vmem:[#allocation5 + $0x2ec] sm:$0xf0]  ;;  %v4809_v7 = vor.u32 %v6715_v4, %v4808_v2  ;;  %s4534_s5 = sshll.u32 %s7502_s15, 4  ;;  %s4536_s23 = sshll.u32 %s7781_s14, 4  ;;  %s4535_s5 = int_to_ptr.vmem [resolvable:$true] %s4534_s5  ;;  %s4537_s23 = int_to_ptr.hbm [resolvable:$true] %s4536_s23 }
  0x29   :  { %v4937_v8 = vor.u32 %v6747_v6, %v4936_v5  ;;  %v5064_v9 = vld [vmem:[#allocation5 + $0x3e0] sm:$0xf]  ;;  %v6779_v10 = vld [vmem:[#allocation5 + $0x3ec] sm:$0xf0]  ;;  %1538 = vmatpush.bf16.msra.mxu0 %v4681_v3 }
  0x2a   :  { %v4664_v11 = vld [vmem:[#allocation5 + $0xc0] sm:$0xf]  ;;  %v5065_v12 = vor.u32 %v6779_v10, %v5064_v9  ;;  %v6679_v13 = vld [vmem:[#allocation5 + $0xcc] sm:$0xf0]  ;;  %1551 = vmatpush.bf16.msra.mxu1 %v4809_v7 }
  0x2b   :  { %v4792_v14 = vld [vmem:[#allocation5 + $0x1c0] sm:$0xf]  ;;  %v6711_v15 = vld [vmem:[#allocation5 + $0x1cc] sm:$0xf0]  ;;  %1564 = vmatpush.bf16.msra.mxu2 %v4937_v8  ;;  %v4665_v16 = vor.u32 %v6679_v13, %v4664_v11 }
  0x2c   :  { %v4793_v17 = vor.u32 %v6711_v15, %v4792_v14  ;;  %v4920_v18 = vld [vmem:[#allocation5 + $0x2c0] sm:$0xf]  ;;  %v6743_v19 = vld [vmem:[#allocation5 + $0x2cc] sm:$0xf0]  ;;  %1577 = vmatpush.bf16.msra.mxu3 %v5065_v12 }
  0x2d   :  { %v5048_v20 = vld [vmem:[#allocation5 + $0x3c0] sm:$0xf]  ;;  %v4921_v21 = vor.u32 %v6743_v19, %v4920_v18  ;;  %v6775_v22 = vld [vmem:[#allocation5 + $0x3cc] sm:$0xf0]  ;;  %1539 = vmatpush.bf16.msra.mxu0 %v4665_v16 }
  0x2e   :  { %v4648_v23 = vld [vmem:[#allocation5 + $0xa0] sm:$0xf]  ;;  %v6675_v24 = vld [vmem:[#allocation5 + $0xac] sm:$0xf0]  ;;  %v5049_v25 = vor.u32 %v6775_v22, %v5048_v20  ;;  %1552 = vmatpush.bf16.msra.mxu1 %v4793_v17 }
  0x2f   :  { %v4776_v26 = vld [vmem:[#allocation5 + $0x1a0] sm:$0xf]  ;;  %v6707_v27 = vld [vmem:[#allocation5 + $0x1ac] sm:$0xf0]  ;;  %v4649_v29 = vor.u32 %v6675_v24, %v4648_v23  ;;  %1565 = vmatpush.bf16.msra.mxu2 %v4921_v21 }
  0x30   :  { %v4904_v28 = vld [vmem:[#allocation5 + $0x2a0] sm:$0xf]  ;;  %v6739_v30 = vld [vmem:[#allocation5 + $0x2ac] sm:$0xf0]  ;;  %v4777_v33 = vor.u32 %v6707_v27, %v4776_v26  ;;  %1578 = vmatpush.bf16.msra.mxu3 %v5049_v25 }
  0x31   :  { %v5032_v31 = vld [vmem:[#allocation5 + $0x3a0] sm:$0xf]  ;;  %v6771_v32 = vld [vmem:[#allocation5 + $0x3ac] sm:$0xf0]  ;;  %v4905_v34 = vor.u32 %v6739_v30, %v4904_v28  ;;  %1540 = vmatpush.bf16.msra.mxu0 %v4649_v29 }
  0x32   :  { %v4632_v35 = vld [vmem:[#allocation5 + $0x80] sm:$0xf]  ;;  %v6671_v36 = vld [vmem:[#allocation5 + $0x8c] sm:$0xf0]  ;;  %v5033_v38 = vor.u32 %v6771_v32, %v5032_v31  ;;  %1553 = vmatpush.bf16.msra.mxu1 %v4777_v33 }
  0x33   :  { %v4760_v37 = vld [vmem:[#allocation5 + $0x180] sm:$0xf]  ;;  %v6703_v39 = vld [vmem:[#allocation5 + $0x18c] sm:$0xf0]  ;;  %v4633_v44 = vor.u32 %v6671_v36, %v4632_v35  ;;  %1566 = vmatpush.bf16.msra.mxu2 %v4905_v34 }
  0x34   :  { %v4888_v40 = vld [vmem:[#allocation5 + $0x280] sm:$0xf]  ;;  %v6735_v41 = vld [vmem:[#allocation5 + $0x28c] sm:$0xf0]  ;;  %v4761_v45 = vor.u32 %v6703_v39, %v4760_v37  ;;  %1579 = vmatpush.bf16.msra.mxu3 %v5033_v38  ;;  %v6681_v37 = vld [vmem:[#allocation5 + $0xe4] sm:$0xf] }
  0x35   :  { %v5016_v42 = vld [vmem:[#allocation5 + $0x380] sm:$0xf]  ;;  %v6767_v43 = vld [vmem:[#allocation5 + $0x38c] sm:$0xf0]  ;;  %v4889_v46 = vor.u32 %v6735_v41, %v4888_v40  ;;  %1541 = vmatpush.bf16.msra.mxu0 %v4633_v44  ;;  %v4682_v38 = vld [vmem:[#allocation5 + $0xf0] sm:$0xf0] }
  0x36   :  { %v4616_v47 = vld [vmem:[#allocation5 + $0x60] sm:$0xf]  ;;  %v6667_v48 = vld [vmem:[#allocation5 + $0x6c] sm:$0xf0]  ;;  %v5017_v50 = vor.u32 %v6767_v43, %v5016_v42  ;;  %1554 = vmatpush.bf16.msra.mxu1 %v4761_v45 }
  0x37   :  { %v4744_v49 = vld [vmem:[#allocation5 + $0x160] sm:$0xf]  ;;  %v6699_v51 = vld [vmem:[#allocation5 + $0x16c] sm:$0xf0]  ;;  %v4617_v56 = vor.u32 %v6667_v48, %v4616_v47  ;;  %1567 = vmatpush.bf16.msra.mxu2 %v4889_v46  ;;  %v4685_v46 = vor.u32 %v6681_v37, %v4682_v38 }
  0x38   :  { %v4872_v52 = vld [vmem:[#allocation5 + $0x260] sm:$0xf]  ;;  %v6731_v53 = vld [vmem:[#allocation5 + $0x26c] sm:$0xf0]  ;;  %v4745_v57 = vor.u32 %v6699_v51, %v4744_v49  ;;  %1580 = vmatpush.bf16.msra.mxu3 %v5017_v50  ;;  %v6677_v50 = vld [vmem:[#allocation5 + $0xc4] sm:$0xf] }
  0x39   :  { %v5000_v54 = vld [vmem:[#allocation5 + $0x360] sm:$0xf]  ;;  %v6763_v55 = vld [vmem:[#allocation5 + $0x36c] sm:$0xf0]  ;;  %v4873_v58 = vor.u32 %v6731_v53, %v4872_v52  ;;  %1542 = vmatpush.bf16.msra.mxu0 %v4617_v56  ;;  %v4666_v51 = vld [vmem:[#allocation5 + $0xd0] sm:$0xf0] }
  0x3a   :  { %v4600_v59 = vld [vmem:[#allocation5 + $0x40] sm:$0xf]  ;;  %v6663_v60 = vld [vmem:[#allocation5 + $0x4c] sm:$0xf0]  ;;  %v5001_v62 = vor.u32 %v6763_v55, %v5000_v54  ;;  %1555 = vmatpush.bf16.msra.mxu1 %v4745_v57 }
  0x3b   :  { %v4728_v61 = vld [vmem:[#allocation5 + $0x140] sm:$0xf]  ;;  %v6695_v63 = vld [vmem:[#allocation5 + $0x14c] sm:$0xf0]  ;;  %v4601_v4 = vor.u32 %v6663_v60, %v4600_v59  ;;  %1568 = vmatpush.bf16.msra.mxu2 %v4873_v58  ;;  %v4669_v59 = vor.u32 %v6677_v50, %v4666_v51 }
  0x3c   :  { %v4856_v0 = vld [vmem:[#allocation5 + $0x240] sm:$0xf]  ;;  %v6727_v1 = vld [vmem:[#allocation5 + $0x24c] sm:$0xf0]  ;;  %v4729_v5 = vor.u32 %v6695_v63, %v4728_v61  ;;  %1581 = vmatpush.bf16.msra.mxu3 %v5001_v62  ;;  %v6673_v62 = vld [vmem:[#allocation5 + $0xa4] sm:$0xf] }
  0x3d   :  { %v4984_v2 = vld [vmem:[#allocation5 + $0x340] sm:$0xf]  ;;  %v6759_v3 = vld [vmem:[#allocation5 + $0x34c] sm:$0xf0]  ;;  %v4857_v6 = vor.u32 %v6727_v1, %v4856_v0  ;;  %1543 = vmatpush.bf16.msra.mxu0 %v4601_v4  ;;  %v4650_v63 = vld [vmem:[#allocation5 + $0xb0] sm:$0xf0] }
  0x3e   :  { %v4584_v7 = vld [vmem:[#allocation5 + $0x20] sm:$0xf]  ;;  %v6659_v8 = vld [vmem:[#allocation5 + $0x2c] sm:$0xf0]  ;;  %v4985_v10 = vor.u32 %v6759_v3, %v4984_v2  ;;  %1556 = vmatpush.bf16.msra.mxu1 %v4729_v5  ;;  %v172_v3 = vld [vmem:[#allocation2 + $0x10] sm:$0xff] }
  0x3f   :  { %v4712_v9 = vld [vmem:[#allocation5 + $0x120] sm:$0xf]  ;;  %v6691_v11 = vld [vmem:[#allocation5 + $0x12c] sm:$0xf0]  ;;  %v4585_v16 = vor.u32 %v6659_v8, %v4584_v7  ;;  %1569 = vmatpush.bf16.msra.mxu2 %v4857_v6  ;;  %v170_v4 = vld [vmem:[#allocation2] sm:$0xff]  ;;  %v7613_v8 = vpack.c.bf16 %v172_v3, %v172_v3 }
  0x40   :  { %v4840_v12 = vld [vmem:[#allocation5 + $0x220] sm:$0xf]  ;;  %v6723_v13 = vld [vmem:[#allocation5 + $0x22c] sm:$0xf0]  ;;  %v4713_v19 = vor.u32 %v6691_v11, %v4712_v9  ;;  %1582 = vmatpush.bf16.msra.mxu3 %v4985_v10  ;;  %v7615_v9 = vpack.c.bf16 %v170_v4, %v170_v4  ;;  %v4653_v11 = vor.u32 %v6673_v62, %v4650_v63  ;;  %v4570_v3 = vld [vmem:[#allocation5 + $0x10] sm:$0xf0] }
  0x41   :  { %v4968_v14 = vld [vmem:[#allocation5 + $0x320] sm:$0xf]  ;;  %v6755_v15 = vld [vmem:[#allocation5 + $0x32c] sm:$0xf0]  ;;  %v4841_v20 = vor.u32 %v6723_v13, %v4840_v12  ;;  %1544 = vmatpush.bf16.msra.mxu0 %v4585_v16  ;;  %v6669_v16 = vld [vmem:[#allocation5 + $0x84] sm:$0xf] }
  0x42   :  { %v4568_v17 = vld [vmem:[#allocation5] sm:$0xf]  ;;  %v6655_v18 = vld [vmem:[#allocation5 + $0xc] sm:$0xf0]  ;;  %v4969_v24 = vor.u32 %v6755_v15, %v4968_v14  ;;  %1557 = vmatpush.bf16.msra.mxu1 %v4713_v19  ;;  %v6713_v4 = vld [vmem:[#allocation5 + $0x1e4] sm:$0xf] }
  0x43   :  { %v4696_v21 = vld [vmem:[#allocation5 + $0x100] sm:$0xf]  ;;  %v6687_v22 = vld [vmem:[#allocation5 + $0x10c] sm:$0xf0]  ;;  %v4569_v31 = vor.u32 %v6655_v18, %v4568_v17  ;;  %1570 = vmatpush.bf16.msra.mxu2 %v4841_v20  ;;  %v4634_v17 = vld [vmem:[#allocation5 + $0x90] sm:$0xf0] }
  0x44   :  { %v4824_v23 = vld [vmem:[#allocation5 + $0x200] sm:$0xf]  ;;  %v6719_v25 = vld [vmem:[#allocation5 + $0x20c] sm:$0xf0]  ;;  %v4697_v35 = vor.u32 %v6687_v22, %v4696_v21  ;;  %1583 = vmatpush.bf16.msra.mxu3 %v4969_v24 }
  0x45   :  { %v4952_v26 = vld [vmem:[#allocation5 + $0x300] sm:$0xf]  ;;  %v6751_v27 = vld [vmem:[#allocation5 + $0x30c] sm:$0xf0]  ;;  %v4825_v36 = vor.u32 %v6719_v25, %v4824_v23  ;;  %1545 = vmatpush.bf16.msra.mxu0 %v4569_v31  ;;  %v4618_v31 = vld [vmem:[#allocation5 + $0x70] sm:$0xf0] }
  0x46   :  { %v5192_v28 = vld [vmem:[#allocation5 + $0x4e0] sm:$0xf]  ;;  %v6811_v29 = vld [vmem:[#allocation5 + $0x4ec] sm:$0xf0]  ;;  %v4953_v39 = vor.u32 %v6751_v27, %v4952_v26  ;;  %1558 = vmatpush.bf16.msra.mxu1 %v4697_v35  ;;  %v4637_v26 = vor.u32 %v6669_v16, %v4634_v17  ;;  %v6809_v16 = vld [vmem:[#allocation5 + $0x4e4] sm:$0xf] }
  0x47   :  { %v5320_v30 = vld [vmem:[#allocation5 + $0x5e0] sm:$0xf]  ;;  %v6843_v32 = vld [vmem:[#allocation5 + $0x5ec] sm:$0xf0]  ;;  %v5193_v40 = vor.u32 %v6811_v29, %v5192_v28  ;;  %1571 = vmatpush.bf16.msra.mxu2 %v4825_v36  ;;  %v5194_v17 = vld [vmem:[#allocation5 + $0x4f0] sm:$0xf0] }
  0x48   :  { %v5448_v33 = vld [vmem:[#allocation5 + $0x6e0] sm:$0xf]  ;;  %v6875_v34 = vld [vmem:[#allocation5 + $0x6ec] sm:$0xf0]  ;;  %v5321_v41 = vor.u32 %v6843_v32, %v5320_v30  ;;  %1584 = vmatpush.bf16.msra.mxu3 %v4953_v39  ;;  %1546 = vmatmul.bf16.vlgmr.msra.gmra.mxu0 %v7615_v9  ;;  %v6665_v30 = vld [vmem:[#allocation5 + $0x64] sm:$0xf] }
  0x49   :  { %v5449_v42 = vor.u32 %v6875_v34, %v5448_v33  ;;  %v5176_v43 = vld [vmem:[#allocation5 + $0x4c0] sm:$0xf]  ;;  %v6807_v44 = vld [vmem:[#allocation5 + $0x4cc] sm:$0xf0]  ;;  %1590 = vmatpush.bf16.msrb.mxu0 %v5193_v40  ;;  %v4621_v38 = vor.u32 %v6665_v30, %v4618_v31  ;;  %v4922_v30 = vld [vmem:[#allocation5 + $0x2d0] sm:$0xf0] }
  0x4a   :  { %v5304_v45 = vld [vmem:[#allocation5 + $0x5c0] sm:$0xf]  ;;  %v6839_v47 = vld [vmem:[#allocation5 + $0x5cc] sm:$0xf0]  ;;  %v5177_v52 = vor.u32 %v6807_v44, %v5176_v43  ;;  %1603 = vmatpush.bf16.msrb.mxu1 %v5321_v41  ;;  %1572 = vmatmul.bf16.vlgmr.msra.gmra.mxu2 %v7613_v8  ;;  %v4602_v43 = vld [vmem:[#allocation5 + $0x50] sm:$0xf0] }
  0x4b   :  { %v5432_v48 = vld [vmem:[#allocation5 + $0x6c0] sm:$0xf]  ;;  %v6871_v49 = vld [vmem:[#allocation5 + $0x6cc] sm:$0xf0]  ;;  %1616 = vmatpush.bf16.msrb.mxu2 %v5449_v42  ;;  %v5305_v54 = vor.u32 %v6839_v47, %v5304_v45  ;;  %v6661_v42 = vld [vmem:[#allocation5 + $0x44] sm:$0xf] }
  0x4c   :  { %v5160_v53 = vld [vmem:[#allocation5 + $0x4a0] sm:$0xf]  ;;  %v5433_v55 = vor.u32 %v6871_v49, %v5432_v48  ;;  %v6803_v56 = vld [vmem:[#allocation5 + $0x4ac] sm:$0xf0]  ;;  %1629 = vmatpush.bf16.msrb.mxu3 %v4685_v46  ;;  %v4605_v50 = vor.u32 %v6661_v42, %v4602_v43  ;;  %v6773_v31 = vld [vmem:[#allocation5 + $0x3c4] sm:$0xf] }
  0x4d   :  { %v5288_v57 = vld [vmem:[#allocation5 + $0x5a0] sm:$0xf]  ;;  %v6835_v58 = vld [vmem:[#allocation5 + $0x5ac] sm:$0xf0]  ;;  %1591 = vmatpush.bf16.msrb.mxu0 %v5177_v52  ;;  %v5161_v0 = vor.u32 %v6803_v56, %v5160_v53  ;;  %v4778_v42 = vld [vmem:[#allocation5 + $0x1b0] sm:$0xf0] }
  0x4e   :  { %v5416_v60 = vld [vmem:[#allocation5 + $0x6a0] sm:$0xf]  ;;  %v6867_v61 = vld [vmem:[#allocation5 + $0x6ac] sm:$0xf0]  ;;  %v5289_v1 = vor.u32 %v6835_v58, %v5288_v57  ;;  %1604 = vmatpush.bf16.msrb.mxu1 %v5305_v54  ;;  %v6657_v54 = vld [vmem:[#allocation5 + $0x24] sm:$0xf] }
  0x4f   :  { %v5144_v2 = vld [vmem:[#allocation5 + $0x480] sm:$0xf]  ;;  %1617 = vmatpush.bf16.msrb.mxu2 %v5433_v55  ;;  %v5417_v5 = vor.u32 %v6867_v61, %v5416_v60  ;;  %v6799_v6 = vld [vmem:[#allocation5 + $0x48c] sm:$0xf0]  ;;  %v4586_v55 = vld [vmem:[#allocation5 + $0x30] sm:$0xf0] }
  0x50   :  { %v5272_v7 = vld [vmem:[#allocation5 + $0x580] sm:$0xf]  ;;  %1630 = vmatpush.bf16.msrb.mxu3 %v4669_v59  ;;  %v6831_v12 = vld [vmem:[#allocation5 + $0x58c] sm:$0xf0]  ;;  %v5145_v18 = vor.u32 %v6799_v6, %v5144_v2  ;;  %v6653_v2 = vld [vmem:[#allocation5 + $0x4] sm:$0xf] }
  0x51   :  { %v173_v10 = vld [vmem:[#allocation2 + $0x18] sm:$0xff]  ;;  %v6863_v14 = vld [vmem:[#allocation5 + $0x68c] sm:$0xf0]  ;;  %1592 = vmatpush.bf16.msrb.mxu0 %v5161_v0  ;;  %v5273_v20 = vor.u32 %v6831_v12, %v5272_v7  ;;  %v4589_v0 = vor.u32 %v6657_v54, %v4586_v55  ;;  %v5066_v12 = vld [vmem:[#allocation5 + $0x3f0] sm:$0xf0] }
  0x52   :  { %v5400_v13 = vld [vmem:[#allocation5 + $0x680] sm:$0xf]  ;;  %v7617_v15 = vpack.c.bf16 %v173_v10, %v173_v10  ;;  %v171_v19 = vld [vmem:[#allocation2 + $0x8] sm:$0xff]  ;;  %1605 = vmatpush.bf16.msrb.mxu1 %v5289_v1  ;;  %v6745_v6 = vld [vmem:[#allocation5 + $0x2e4] sm:$0xf] }
  0x53   :  { %1618 = vmatpush.bf16.msrb.mxu2 %v5417_v5  ;;  %v5401_v21 = vor.u32 %v6863_v14, %v5400_v13  ;;  %v5128_v22 = vld [vmem:[#allocation5 + $0x460] sm:$0xf]  ;;  %v6795_v23 = vld [vmem:[#allocation5 + $0x46c] sm:$0xf0]  ;;  %v7622_v25 = vpack.c.bf16 %v171_v19, %v171_v19  ;;  %v4810_v5 = vld [vmem:[#allocation5 + $0x1f0] sm:$0xf0]  ;;  %v4573_v19 = vor.u32 %v6653_v2, %v4570_v3 }
  0x54   :  { %1585 = vmatmul.bf16.vlgmr.msra.gmra.mxu3 %v7617_v15  ;;  %v5256_v24 = vld [vmem:[#allocation5 + $0x560] sm:$0xf]  ;;  %v6827_v27 = vld [vmem:[#allocation5 + $0x56c] sm:$0xf0]  ;;  %v5129_v32 = vor.u32 %v6795_v23, %v5128_v22  ;;  %v4938_v10 = vld [vmem:[#allocation5 + $0x2f0] sm:$0xf0] }
  0x55   :  { %1631 = vmatpush.bf16.msrb.mxu3 %v4653_v11  ;;  %v5384_v28 = vld [vmem:[#allocation5 + $0x660] sm:$0xf]  ;;  %v6859_v29 = vld [vmem:[#allocation5 + $0x66c] sm:$0xf0]  ;;  %1559 = vmatmul.bf16.vlgmr.msra.gmra.mxu1 %v7622_v25  ;;  %v5257_v33 = vor.u32 %v6827_v27, %v5256_v24  ;;  %v6777_v11 = vld [vmem:[#allocation5 + $0x3e4] sm:$0xf]  ;;  %v4941_v23 = vor.u32 %v6745_v6, %v4938_v10 }
  0x56   :  { %1593 = vmatpush.bf16.msrb.mxu0 %v5145_v18  ;;  %1606 = vmatpush.bf16.msrb.mxu1 %v5273_v20  ;;  %v5385_v34 = vor.u32 %v6859_v29, %v5384_v28  ;;  %v5112_v35 = vld [vmem:[#allocation5 + $0x440] sm:$0xf]  ;;  %v6791_v36 = vld [vmem:[#allocation5 + $0x44c] sm:$0xf0]  ;;  %v176_v18 = vld [vmem:[#allocation2 + $0x30] sm:$0xff]  ;;  %v4813_v20 = vor.u32 %v6713_v4, %v4810_v5  ;;  %v5069_v24 = vor.u32 %v6777_v11, %v5066_v12 }
  0x57   :  { %1619 = vmatpush.bf16.msrb.mxu2 %v5401_v21  ;;  %v5240_v37 = vld [vmem:[#allocation5 + $0x540] sm:$0xf]  ;;  %v6823_v39 = vld [vmem:[#allocation5 + $0x54c] sm:$0xf0]  ;;  %v5113_v44 = vor.u32 %v6791_v36, %v5112_v35  ;;  %v174_v21 = vld [vmem:[#allocation2 + $0x20] sm:$0xff]  ;;  %v5197_v29 = vor.u32 %v6809_v16, %v5194_v17 }
  0x58   :  { %v5368_v40 = vld [vmem:[#allocation5 + $0x640] sm:$0xf]  ;;  %v6855_v41 = vld [vmem:[#allocation5 + $0x64c] sm:$0xf0]  ;;  %v5241_v45 = vor.u32 %v6823_v39, %v5240_v37  ;;  %v4794_v27 = vld [vmem:[#allocation5 + $0x1d0] sm:$0xf0]  ;;  %v7627_v36 = vpack.c.bf16 %v174_v21, %v174_v21 }
  0x59   :  { %1632 = vmatpush.bf16.msrb.mxu3 %v4637_v26  ;;  %v5369_v46 = vor.u32 %v6855_v41, %v5368_v40  ;;  %v5096_v47 = vld [vmem:[#allocation5 + $0x420] sm:$0xf]  ;;  %v6787_v48 = vld [vmem:[#allocation5 + $0x42c] sm:$0xf0]  ;;  %v6709_v26 = vld [vmem:[#allocation5 + $0x1c4] sm:$0xf] }
  0x5a   :  { %1594 = vmatpush.bf16.msrb.mxu0 %v5129_v32  ;;  %1607 = vmatpush.bf16.msrb.mxu1 %v5257_v33  ;;  %v5224_v49 = vld [vmem:[#allocation5 + $0x520] sm:$0xf]  ;;  %v6819_v51 = vld [vmem:[#allocation5 + $0x52c] sm:$0xf0]  ;;  %v5097_v56 = vor.u32 %v6787_v48, %v5096_v47  ;;  %v6741_v28 = vld [vmem:[#allocation5 + $0x2c4] sm:$0xf]  ;;  %v7625_v33 = vpack.c.bf16 %v176_v18, %v176_v18 }
  0x5b   :  { %1620 = vmatpush.bf16.msrb.mxu2 %v5385_v34  ;;  %v5352_v52 = vld [vmem:[#allocation5 + $0x620] sm:$0xf]  ;;  %v6851_v53 = vld [vmem:[#allocation5 + $0x62c] sm:$0xf0]  ;;  %v5225_v59 = vor.u32 %v6819_v51, %v5224_v49  ;;  %v5050_v32 = vld [vmem:[#allocation5 + $0x3d0] sm:$0xf0]  ;;  %v4925_v39 = vor.u32 %v6741_v28, %v4922_v30 }
  0x5c   :  { %v5080_v57 = vld [vmem:[#allocation5 + $0x400] sm:$0xf]  ;;  %v6783_v58 = vld [vmem:[#allocation5 + $0x40c] sm:$0xf0]  ;;  %v5353_v60 = vor.u32 %v6851_v53, %v5352_v52  ;;  %v6805_v34 = vld [vmem:[#allocation5 + $0x4c4] sm:$0xf]  ;;  %v5053_v40 = vor.u32 %v6773_v31, %v5050_v32 }
  0x5d   :  { %1633 = vmatpush.bf16.msrb.mxu3 %v4621_v38  ;;  %v5208_v61 = vld [vmem:[#allocation5 + $0x500] sm:$0xf]  ;;  %v6815_v62 = vld [vmem:[#allocation5 + $0x50c] sm:$0xf0]  ;;  %v5081_v7 = vor.u32 %v6783_v58, %v5080_v57  ;;  %v5178_v35 = vld [vmem:[#allocation5 + $0x4d0] sm:$0xf0]  ;;  %v4797_v38 = vor.u32 %v6709_v26, %v4794_v27 }
  0x5e   :  { %1595 = vmatpush.bf16.msrb.mxu0 %v5113_v44  ;;  %1608 = vmatpush.bf16.msrb.mxu1 %v5241_v45  ;;  %v5336_v63 = vld [vmem:[#allocation5 + $0x600] sm:$0xf]  ;;  %v6847_v1 = vld [vmem:[#allocation5 + $0x60c] sm:$0xf0]  ;;  %v5209_v13 = vor.u32 %v6815_v62, %v5208_v61  ;;  %v6705_v41 = vld [vmem:[#allocation5 + $0x1a4] sm:$0xf]  ;;  %v5181_v44 = vor.u32 %v6805_v34, %v5178_v35 }
  0x5f   :  { %1621 = vmatpush.bf16.msrb.mxu2 %v5369_v46  ;;  %v5337_v14 = vor.u32 %v6847_v1, %v5336_v63  ;;  %v175_v22 = vld [vmem:[#allocation2 + $0x28] sm:$0xff]  ;;  %v6737_v43 = vld [vmem:[#allocation5 + $0x2a4] sm:$0xf] }
  0x60   :  { %v7629_v37 = vpack.c.bf16 %v175_v22, %v175_v22  ;;  %v4906_v45 = vld [vmem:[#allocation5 + $0x2b0] sm:$0xf0]  ;;  %v6769_v46 = vld [vmem:[#allocation5 + $0x3a4] sm:$0xf] }
  0x61   :  { %1634 = vmatpush.bf16.msrb.mxu3 %v4605_v50  ;;  %v5034_v47 = vld [vmem:[#allocation5 + $0x3b0] sm:$0xf0]  ;;  %v6801_v48 = vld [vmem:[#allocation5 + $0x4a4] sm:$0xf]  ;;  %v4781_v50 = vor.u32 %v6705_v41, %v4778_v42  ;;  %v4909_v51 = vor.u32 %v6737_v43, %v4906_v45 }
  0x62   :  { %1596 = vmatpush.bf16.msrb.mxu0 %v5097_v56  ;;  %1609 = vmatpush.bf16.msrb.mxu1 %v5225_v59  ;;  %v5162_v49 = vld [vmem:[#allocation5 + $0x4b0] sm:$0xf0]  ;;  %v5037_v52 = vor.u32 %v6769_v46, %v5034_v47  ;;  %v6701_v53 = vld [vmem:[#allocation5 + $0x184] sm:$0xf] }
  0x63   :  { %1622 = vmatpush.bf16.msrb.mxu2 %v5353_v60  ;;  %v4762_v54 = vld [vmem:[#allocation5 + $0x190] sm:$0xf0]  ;;  %v6733_v55 = vld [vmem:[#allocation5 + $0x284] sm:$0xf]  ;;  %v5165_v56 = vor.u32 %v6801_v48, %v5162_v49 }
  0x64   :  { %v4890_v57 = vld [vmem:[#allocation5 + $0x290] sm:$0xf0]  ;;  %v6765_v58 = vld [vmem:[#allocation5 + $0x384] sm:$0xf]  ;;  %v4765_v62 = vor.u32 %v6701_v53, %v4762_v54 }
  0x65   :  { %1635 = vmatpush.bf16.msrb.mxu3 %v4589_v0  ;;  %v5018_v59 = vld [vmem:[#allocation5 + $0x390] sm:$0xf0]  ;;  %v6797_v60 = vld [vmem:[#allocation5 + $0x484] sm:$0xf]  ;;  %v4893_v63 = vor.u32 %v6733_v55, %v4890_v57 }
  0x66   :  { %1597 = vmatpush.bf16.msrb.mxu0 %v5081_v7  ;;  %1610 = vmatpush.bf16.msrb.mxu1 %v5209_v13  ;;  %v5146_v61 = vld [vmem:[#allocation5 + $0x490] sm:$0xf0]  ;;  %v5021_v0 = vor.u32 %v6765_v58, %v5018_v59  ;;  %v6697_v1 = vld [vmem:[#allocation5 + $0x164] sm:$0xf]  ;;  %v4688_v58 = vld [vmem:[#allocation5 + $0xe8] sm:$0xf] }
  0x67   :  { %1623 = vmatpush.bf16.msrb.mxu2 %v5337_v14  ;;  %v4746_v2 = vld [vmem:[#allocation5 + $0x170] sm:$0xf0]  ;;  %v6729_v3 = vld [vmem:[#allocation5 + $0x264] sm:$0xf]  ;;  %v5149_v4 = vor.u32 %v6797_v60, %v5146_v61  ;;  %v6684_v59 = vld [vmem:[#allocation5 + $0xf4] sm:$0xf0] }
  0x68   :  { %v4874_v5 = vld [vmem:[#allocation5 + $0x270] sm:$0xf0]  ;;  %v6761_v6 = vld [vmem:[#allocation5 + $0x364] sm:$0xf]  ;;  %v4749_v12 = vor.u32 %v6697_v1, %v4746_v2 }
  0x69   :  { %1636 = vmatpush.bf16.msrb.mxu3 %v4573_v19  ;;  %1598 = vmatmul.bf16.vlgmr.msrb.gmra.mxu0 %v7627_v36  ;;  %v5002_v7 = vld [vmem:[#allocation5 + $0x370] sm:$0xf0]  ;;  %v6793_v10 = vld [vmem:[#allocation5 + $0x464] sm:$0xf]  ;;  %v4877_v13 = vor.u32 %v6729_v3, %v4874_v5  ;;  %v4689_v3 = vor.u32 %v6684_v59, %v4688_v58 }
  0x6a   :  { %1642 = vmatpush.bf16.msra.mxu0 %v4813_v20  ;;  %1655 = vmatpush.bf16.msra.mxu1 %v4941_v23  ;;  %v5130_v11 = vld [vmem:[#allocation5 + $0x470] sm:$0xf0]  ;;  %v5005_v14 = vor.u32 %v6761_v6, %v5002_v7  ;;  %v6693_v16 = vld [vmem:[#allocation5 + $0x144] sm:$0xf] }
  0x6b   :  { %1668 = vmatpush.bf16.msra.mxu2 %v5069_v24  ;;  %1611 = vmatmul.bf16.vlgmr.msrb.gmra.mxu1 %v7629_v37  ;;  %v4730_v17 = vld [vmem:[#allocation5 + $0x150] sm:$0xf0]  ;;  %v6725_v18 = vld [vmem:[#allocation5 + $0x244] sm:$0xf]  ;;  %v5133_v19 = vor.u32 %v6793_v10, %v5130_v11  ;;  %v4672_v11 = vld [vmem:[#allocation5 + $0xc8] sm:$0xf] }
  0x6c   :  { %1624 = vmatmul.bf16.vlgmr.msrb.gmra.mxu2 %v7625_v33  ;;  %1637 = vmatmul.bf16.vlgmr.msrb.gmra.mxu3 %v7615_v9  ;;  %v4858_v20 = vld [vmem:[#allocation5 + $0x250] sm:$0xf0]  ;;  %v6757_v21 = vld [vmem:[#allocation5 + $0x344] sm:$0xf]  ;;  %v4733_v26 = vor.u32 %v6693_v16, %v4730_v17 }
  0x6d   :  { %1681 = vmatpush.bf16.msra.mxu3 %v5197_v29  ;;  %v4986_v22 = vld [vmem:[#allocation5 + $0x350] sm:$0xf0]  ;;  %v6789_v23 = vld [vmem:[#allocation5 + $0x444] sm:$0xf]  ;;  %v4861_v29 = vor.u32 %v6725_v18, %v4858_v20 }
  0x6e   :  { %1643 = vmatpush.bf16.msra.mxu0 %v4797_v38  ;;  %1656 = vmatpush.bf16.msra.mxu1 %v4925_v39  ;;  %v5114_v24 = vld [vmem:[#allocation5 + $0x450] sm:$0xf0]  ;;  %v6689_v27 = vld [vmem:[#allocation5 + $0x124] sm:$0xf]  ;;  %v4989_v30 = vor.u32 %v6757_v21, %v4986_v22 }
  0x6f   :  { %1669 = vmatpush.bf16.msra.mxu2 %v5053_v40  ;;  %v4714_v28 = vld [vmem:[#allocation5 + $0x130] sm:$0xf0]  ;;  %v6721_v31 = vld [vmem:[#allocation5 + $0x224] sm:$0xf]  ;;  %v5117_v35 = vor.u32 %v6789_v23, %v5114_v24  ;;  %v4656_v24 = vld [vmem:[#allocation5 + $0xa8] sm:$0xf] }
  0x70   :  { %v4842_v32 = vld [vmem:[#allocation5 + $0x230] sm:$0xf0]  ;;  %v6753_v34 = vld [vmem:[#allocation5 + $0x324] sm:$0xf]  ;;  %v4717_v43 = vor.u32 %v6689_v27, %v4714_v28  ;;  %v4784_v27 = vld [vmem:[#allocation5 + $0x1a8] sm:$0xf] }
  0x71   :  { %1682 = vmatpush.bf16.msra.mxu3 %v5181_v44  ;;  %v4970_v38 = vld [vmem:[#allocation5 + $0x330] sm:$0xf0]  ;;  %v6785_v39 = vld [vmem:[#allocation5 + $0x424] sm:$0xf]  ;;  %v4845_v46 = vor.u32 %v6721_v31, %v4842_v32  ;;  %v6708_v28 = vld [vmem:[#allocation5 + $0x1b4] sm:$0xf0] }
  0x72   :  { %1644 = vmatpush.bf16.msra.mxu0 %v4781_v50  ;;  %1657 = vmatpush.bf16.msra.mxu1 %v4909_v51  ;;  %v5098_v40 = vld [vmem:[#allocation5 + $0x430] sm:$0xf0]  ;;  %v6685_v41 = vld [vmem:[#allocation5 + $0x104] sm:$0xf]  ;;  %v4973_v47 = vor.u32 %v6753_v34, %v4970_v38  ;;  %v4785_v38 = vor.u32 %v6708_v28, %v4784_v27  ;;  %v4576_v27 = vld [vmem:[#allocation5 + $0x8] sm:$0xf] }
  0x73   :  { %1670 = vmatpush.bf16.msra.mxu2 %v5037_v52  ;;  %v4698_v42 = vld [vmem:[#allocation5 + $0x110] sm:$0xf0]  ;;  %v6717_v44 = vld [vmem:[#allocation5 + $0x204] sm:$0xf]  ;;  %v5101_v51 = vor.u32 %v6785_v39, %v5098_v40  ;;  %v4640_v40 = vld [vmem:[#allocation5 + $0x88] sm:$0xf] }
  0x74   :  { %v4826_v45 = vld [vmem:[#allocation5 + $0x210] sm:$0xf0]  ;;  %v6749_v48 = vld [vmem:[#allocation5 + $0x304] sm:$0xf] }
  0x75   :  { %1683 = vmatpush.bf16.msra.mxu3 %v5165_v56  ;;  %v4954_v49 = vld [vmem:[#allocation5 + $0x310] sm:$0xf0]  ;;  %v6781_v50 = vld [vmem:[#allocation5 + $0x404] sm:$0xf]  ;;  %v4701_v56 = vor.u32 %v6685_v41, %v4698_v42  ;;  %v4829_v60 = vor.u32 %v6717_v44, %v4826_v45  ;;  %v6672_v41 = vld [vmem:[#allocation5 + $0x94] sm:$0xf0] }
  0x76   :  { %1645 = vmatpush.bf16.msra.mxu0 %v4765_v62  ;;  %1658 = vmatpush.bf16.msra.mxu1 %v4893_v63  ;;  %v5082_v52 = vld [vmem:[#allocation5 + $0x410] sm:$0xf0]  ;;  %v6841_v53 = vld [vmem:[#allocation5 + $0x5e4] sm:$0xf]  ;;  %v4957_v61 = vor.u32 %v6749_v48, %v4954_v49  ;;  %v4816_v62 = vld [vmem:[#allocation5 + $0x1e8] sm:$0xf] }
  0x77   :  { %1671 = vmatpush.bf16.msra.mxu2 %v5021_v0  ;;  %v5322_v54 = vld [vmem:[#allocation5 + $0x5f0] sm:$0xf0]  ;;  %v6873_v55 = vld [vmem:[#allocation5 + $0x6e4] sm:$0xf]  ;;  %v6716_v63 = vld [vmem:[#allocation5 + $0x1f4] sm:$0xf0]  ;;  %v5085_v0 = vor.u32 %v6781_v50, %v5082_v52 }
  0x78   :  { %v5450_v57 = vld [vmem:[#allocation5 + $0x6f0] sm:$0xf0]  ;;  %v5325_v1 = vor.u32 %v6841_v53, %v5322_v54  ;;  %v6869_v6 = vld [vmem:[#allocation5 + $0x6c4] sm:$0xf]  ;;  %v4817_v7 = vor.u32 %v6716_v63, %v4816_v62  ;;  %v4768_v42 = vld [vmem:[#allocation5 + $0x188] sm:$0xf] }
  0x79   :  { %1684 = vmatpush.bf16.msra.mxu3 %v5149_v4  ;;  %v5453_v2 = vor.u32 %v6873_v55, %v5450_v57  ;;  %v6837_v4 = vld [vmem:[#allocation5 + $0x5c4] sm:$0xf]  ;;  %v5306_v5 = vld [vmem:[#allocation5 + $0x5d0] sm:$0xf0]  ;;  %v4624_v52 = vld [vmem:[#allocation5 + $0x68] sm:$0xf] }
  0x7a   :  { %1646 = vmatpush.bf16.msra.mxu0 %v4749_v12  ;;  %1659 = vmatpush.bf16.msra.mxu1 %v4877_v13  ;;  %v5434_v10 = vld [vmem:[#allocation5 + $0x6d0] sm:$0xf0]  ;;  %v6680_v12 = vld [vmem:[#allocation5 + $0xd4] sm:$0xf0]  ;;  %v4800_v13 = vld [vmem:[#allocation5 + $0x1c8] sm:$0xf]  ;;  %v5309_v16 = vor.u32 %v6837_v4, %v5306_v5 }
  0x7b   :  { %1672 = vmatpush.bf16.msra.mxu2 %v5005_v14  ;;  %v6712_v14 = vld [vmem:[#allocation5 + $0x1d4] sm:$0xf0]  ;;  %v5437_v17 = vor.u32 %v6869_v6, %v5434_v10  ;;  %v4673_v18 = vor.u32 %v6680_v12, %v4672_v11  ;;  %v5290_v20 = vld [vmem:[#allocation5 + $0x5b0] sm:$0xf0]  ;;  %v6865_v21 = vld [vmem:[#allocation5 + $0x6a4] sm:$0xf] }
  0x7c   :  { %v4801_v22 = vor.u32 %v6712_v14, %v4800_v13  ;;  %v5418_v23 = vld [vmem:[#allocation5 + $0x6b0] sm:$0xf0]  ;;  %v6829_v32 = vld [vmem:[#allocation5 + $0x584] sm:$0xf]  ;;  %v6668_v53 = vld [vmem:[#allocation5 + $0x74] sm:$0xf0] }
  0x7d   :  { %1685 = vmatpush.bf16.msra.mxu3 %v5133_v19  ;;  %v6833_v19 = vld [vmem:[#allocation5 + $0x5a4] sm:$0xf]  ;;  %v5274_v34 = vld [vmem:[#allocation5 + $0x590] sm:$0xf0]  ;;  %v4752_v54 = vld [vmem:[#allocation5 + $0x168] sm:$0xf]  ;;  %v4625_v58 = vor.u32 %v6668_v53, %v4624_v52 }
  0x7e   :  { %1647 = vmatpush.bf16.msra.mxu0 %v4733_v26  ;;  %1660 = vmatpush.bf16.msra.mxu1 %v4861_v29  ;;  %v6676_v26 = vld [vmem:[#allocation5 + $0xb4] sm:$0xf0]  ;;  %v5293_v29 = vor.u32 %v6833_v19, %v5290_v20  ;;  %v5402_v39 = vld [vmem:[#allocation5 + $0x690] sm:$0xf0]  ;;  %v5277_v44 = vor.u32 %v6829_v32, %v5274_v34  ;;  %v6857_v49 = vld [vmem:[#allocation5 + $0x664] sm:$0xf] }
  0x7f   :  { %1673 = vmatpush.bf16.msra.mxu2 %v4989_v30  ;;  %v5421_v30 = vor.u32 %v6865_v21, %v5418_v23  ;;  %v4657_v31 = vor.u32 %v6676_v26, %v4656_v24  ;;  %v5258_v48 = vld [vmem:[#allocation5 + $0x570] sm:$0xf0]  ;;  %v6700_v55 = vld [vmem:[#allocation5 + $0x174] sm:$0xf0]  ;;  %v6821_v59 = vld [vmem:[#allocation5 + $0x544] sm:$0xf] }
  0x80   :  { %v4753_v62 = vor.u32 %v6700_v55, %v4752_v54  ;;  %v5370_v63 = vld [vmem:[#allocation5 + $0x650] sm:$0xf0]  ;;  %v6849_v11 = vld [vmem:[#allocation5 + $0x624] sm:$0xf]  ;;  %v4592_v14 = vld [vmem:[#allocation5 + $0x28] sm:$0xf] }
  0x81   :  { %1686 = vmatpush.bf16.msra.mxu3 %v5117_v35  ;;  %v6861_v35 = vld [vmem:[#allocation5 + $0x684] sm:$0xf]  ;;  %v5226_v10 = vld [vmem:[#allocation5 + $0x530] sm:$0xf0]  ;;  %v4944_v32 = vld [vmem:[#allocation5 + $0x2e8] sm:$0xf] }
  0x82   :  { %1648 = vmatpush.bf16.msra.mxu0 %v4717_v43  ;;  %1661 = vmatpush.bf16.msra.mxu1 %v4845_v46  ;;  %v6704_v43 = vld [vmem:[#allocation5 + $0x194] sm:$0xf0]  ;;  %v5405_v45 = vor.u32 %v6861_v35, %v5402_v39  ;;  %v4641_v46 = vor.u32 %v6672_v41, %v4640_v40  ;;  %v5354_v13 = vld [vmem:[#allocation5 + $0x630] sm:$0xf0]  ;;  %v6813_v20 = vld [vmem:[#allocation5 + $0x504] sm:$0xf] }
  0x83   :  { %1674 = vmatpush.bf16.msra.mxu2 %v4973_v47  ;;  %v6825_v47 = vld [vmem:[#allocation5 + $0x564] sm:$0xf]  ;;  %v4769_v50 = vor.u32 %v6704_v43, %v4768_v42  ;;  %v5210_v21 = vld [vmem:[#allocation5 + $0x510] sm:$0xf0]  ;;  %v6748_v34 = vld [vmem:[#allocation5 + $0x2f4] sm:$0xf0] }
  0x84   :  { %v6845_v24 = vld [vmem:[#allocation5 + $0x604] sm:$0xf]  ;;  %v5338_v26 = vld [vmem:[#allocation5 + $0x610] sm:$0xf0]  ;;  %v5072_v35 = vld [vmem:[#allocation5 + $0x3e8] sm:$0xf] }
  0x85   :  { %1687 = vmatpush.bf16.msra.mxu3 %v5101_v51  ;;  %v5386_v51 = vld [vmem:[#allocation5 + $0x670] sm:$0xf0]  ;;  %v6780_v39 = vld [vmem:[#allocation5 + $0x3f4] sm:$0xf0]  ;;  %v5200_v40 = vld [vmem:[#allocation5 + $0x4e8] sm:$0xf]  ;;  %v5341_v42 = vor.u32 %v6845_v24, %v5338_v26 }
  0x86   :  { %1649 = vmatpush.bf16.msra.mxu0 %v4701_v56  ;;  %1662 = vmatpush.bf16.msra.mxu1 %v4829_v60  ;;  %v5261_v56 = vor.u32 %v6825_v47, %v5258_v48  ;;  %v5389_v57 = vor.u32 %v6857_v49, %v5386_v51  ;;  %v5242_v60 = vld [vmem:[#allocation5 + $0x550] sm:$0xf0]  ;;  %v6812_v41 = vld [vmem:[#allocation5 + $0x4f4] sm:$0xf0]  ;;  %v4945_v47 = vor.u32 %v6748_v34, %v4944_v32  ;;  %v5056_v52 = vld [vmem:[#allocation5 + $0x3c8] sm:$0xf] }
  0x87   :  { %1675 = vmatpush.bf16.msra.mxu2 %v4957_v61  ;;  %v6853_v61 = vld [vmem:[#allocation5 + $0x644] sm:$0xf]  ;;  %v5245_v4 = vor.u32 %v6821_v59, %v5242_v60  ;;  %v5073_v48 = vor.u32 %v6780_v39, %v5072_v35  ;;  %v5201_v49 = vor.u32 %v6812_v41, %v5200_v40  ;;  %v6744_v51 = vld [vmem:[#allocation5 + $0x2d4] sm:$0xf0]  ;;  %v5184_v55 = vld [vmem:[#allocation5 + $0x4c8] sm:$0xf] }
  0x88   :  { %v5373_v5 = vor.u32 %v6853_v61, %v5370_v63  ;;  %v6776_v54 = vld [vmem:[#allocation5 + $0x3d4] sm:$0xf0]  ;;  %v4880_v26 = vld [vmem:[#allocation5 + $0x268] sm:$0xf] }
  0x89   :  { %1688 = vmatpush.bf16.msra.mxu3 %v5085_v0  ;;  %1650 = vmatmul.bf16.vlgmr.msra.gmra.mxu0 %v7622_v25  ;;  %v4608_v0 = vld [vmem:[#allocation5 + $0x48] sm:$0xf]  ;;  %v5057_v60 = vor.u32 %v6776_v54, %v5056_v52  ;;  %v6740_v63 = vld [vmem:[#allocation5 + $0x2b4] sm:$0xf0] }
  0x8a   :  { %1694 = vmatpush.bf16.msrb.mxu0 %v5325_v1  ;;  %1707 = vmatpush.bf16.msrb.mxu1 %v5453_v2  ;;  %v6664_v1 = vld [vmem:[#allocation5 + $0x54] sm:$0xf0]  ;;  %v4736_v2 = vld [vmem:[#allocation5 + $0x148] sm:$0xf] }
  0x8b   :  { %1720 = vmatpush.bf16.msrb.mxu2 %v4689_v3  ;;  %1663 = vmatmul.bf16.vlgmr.msra.gmra.mxu1 %v7613_v8  ;;  %v6696_v3 = vld [vmem:[#allocation5 + $0x154] sm:$0xf0]  ;;  %v4609_v6 = vor.u32 %v6664_v1, %v4608_v0  ;;  %v5040_v0 = vld [vmem:[#allocation5 + $0x3a8] sm:$0xf] }
  0x8c   :  { %1676 = vmatmul.bf16.vlgmr.msra.gmra.mxu2 %v7617_v15  ;;  %1689 = vmatmul.bf16.vlgmr.msra.gmra.mxu3 %v7627_v36  ;;  %v4737_v12 = vor.u32 %v6696_v3, %v4736_v2  ;;  %v6772_v2 = vld [vmem:[#allocation5 + $0x3b4] sm:$0xf0]  ;;  %v5168_v3 = vld [vmem:[#allocation5 + $0x4a8] sm:$0xf] }
  0x8d   :  { %1733 = vmatpush.bf16.msrb.mxu3 %v4817_v7  ;;  %v6817_v7 = vld [vmem:[#allocation5 + $0x524] sm:$0xf]  ;;  %v6796_v32 = vld [vmem:[#allocation5 + $0x474] sm:$0xf0]  ;;  %v5264_v34 = vld [vmem:[#allocation5 + $0x568] sm:$0xf] }
  0x8e   :  { %1695 = vmatpush.bf16.msrb.mxu0 %v5309_v16  ;;  %1708 = vmatpush.bf16.msrb.mxu1 %v5437_v17  ;;  %v6660_v16 = vld [vmem:[#allocation5 + $0x34] sm:$0xf0]  ;;  %v4720_v17 = vld [vmem:[#allocation5 + $0x128] sm:$0xf]  ;;  %v5229_v19 = vor.u32 %v6817_v7, %v5226_v10  ;;  %v5041_v10 = vor.u32 %v6772_v2, %v5040_v0 }
  0x8f   :  { %1721 = vmatpush.bf16.msrb.mxu2 %v4673_v18  ;;  %v6692_v18 = vld [vmem:[#allocation5 + $0x134] sm:$0xf0]  ;;  %v4593_v23 = vor.u32 %v6660_v16, %v4592_v14  ;;  %v5024_v14 = vld [vmem:[#allocation5 + $0x388] sm:$0xf] }
  0x90   :  { %v4721_v28 = vor.u32 %v6692_v18, %v4720_v17  ;;  %v6768_v17 = vld [vmem:[#allocation5 + $0x394] sm:$0xf0]  ;;  %v5152_v18 = vld [vmem:[#allocation5 + $0x488] sm:$0xf] }
  0x91   :  { %1734 = vmatpush.bf16.msrb.mxu3 %v4801_v22  ;;  %v5357_v22 = vor.u32 %v6849_v11, %v5354_v13  ;;  %v6736_v13 = vld [vmem:[#allocation5 + $0x294] sm:$0xf0]  ;;  %v4864_v41 = vld [vmem:[#allocation5 + $0x248] sm:$0xf] }
  0x92   :  { %1696 = vmatpush.bf16.msrb.mxu0 %v5293_v29  ;;  %1709 = vmatpush.bf16.msrb.mxu1 %v5421_v30  ;;  %v6656_v29 = vld [vmem:[#allocation5 + $0x14] sm:$0xf0]  ;;  %v4704_v30 = vld [vmem:[#allocation5 + $0x108] sm:$0xf] }
  0x93   :  { %1722 = vmatpush.bf16.msrb.mxu2 %v4657_v31  ;;  %v6688_v31 = vld [vmem:[#allocation5 + $0x114] sm:$0xf0]  ;;  %v4577_v43 = vor.u32 %v6656_v29, %v4576_v27 }
  0x94   :  { %v6732_v27 = vld [vmem:[#allocation5 + $0x274] sm:$0xf0] }
  0x95   :  { %1735 = vmatpush.bf16.msrb.mxu3 %v4785_v38  ;;  %v5213_v38 = vor.u32 %v6813_v20, %v5210_v21  ;;  %v5280_v20 = vld [vmem:[#allocation5 + $0x588] sm:$0xf]  ;;  %v6832_v21 = vld [vmem:[#allocation5 + $0x594] sm:$0xf0] }
  0x96   :  { %1697 = vmatpush.bf16.msrb.mxu0 %v5277_v44  ;;  %1710 = vmatpush.bf16.msrb.mxu1 %v5405_v45  ;;  %v5328_v44 = vld [vmem:[#allocation5 + $0x5e8] sm:$0xf]  ;;  %v6844_v45 = vld [vmem:[#allocation5 + $0x5f4] sm:$0xf0]  ;;  %v5281_v29 = vor.u32 %v6832_v21, %v5280_v20 }
  0x97   :  { %1723 = vmatpush.bf16.msrb.mxu2 %v4641_v46  ;;  %v4705_v46 = vor.u32 %v6688_v31, %v4704_v30  ;;  %v5329_v53 = vor.u32 %v6844_v45, %v5328_v44  ;;  %v6764_v30 = vld [vmem:[#allocation5 + $0x374] sm:$0xf0]  ;;  %v5136_v31 = vld [vmem:[#allocation5 + $0x468] sm:$0xf] }
  0x98   :  { %v6828_v35 = vld [vmem:[#allocation5 + $0x574] sm:$0xf0]  ;;  %v5137_v40 = vor.u32 %v6796_v32, %v5136_v31  ;;  %v6678_v31 = vld [vmem:[#allocation5 + $0xcc] sm:$0xf] }
  0x99   :  { %1736 = vmatpush.bf16.msrb.mxu3 %v4769_v50  ;;  %v4928_v50 = vld [vmem:[#allocation5 + $0x2c8] sm:$0xf]  ;;  %v5265_v44 = vor.u32 %v6828_v35, %v5264_v34  ;;  %v6760_v45 = vld [vmem:[#allocation5 + $0x354] sm:$0xf0]  ;;  %v4674_v34 = vld [vmem:[#allocation5 + $0xd8] sm:$0xf0] }
  0x9a   :  { %1698 = vmatpush.bf16.msrb.mxu0 %v5261_v56  ;;  %1711 = vmatpush.bf16.msrb.mxu1 %v5389_v57  ;;  %v6808_v56 = vld [vmem:[#allocation5 + $0x4d4] sm:$0xf0]  ;;  %v5312_v57 = vld [vmem:[#allocation5 + $0x5c8] sm:$0xf]  ;;  %v4929_v59 = vor.u32 %v6744_v51, %v4928_v50  ;;  %v6710_v35 = vld [vmem:[#allocation5 + $0x1cc] sm:$0xf] }
  0x9b   :  { %1724 = vmatpush.bf16.msrb.mxu2 %v4625_v58  ;;  %v6840_v58 = vld [vmem:[#allocation5 + $0x5d4] sm:$0xf0]  ;;  %v5185_v61 = vor.u32 %v6808_v56, %v5184_v55  ;;  %v4976_v55 = vld [vmem:[#allocation5 + $0x328] sm:$0xf] }
  0x9c   :  { %v5313_v1 = vor.u32 %v6840_v58, %v5312_v57  ;;  %v6724_v54 = vld [vmem:[#allocation5 + $0x234] sm:$0xf0]  ;;  %v5104_v58 = vld [vmem:[#allocation5 + $0x428] sm:$0xf] }
  0x9d   :  { %1737 = vmatpush.bf16.msrb.mxu3 %v4753_v62  ;;  %v4912_v62 = vld [vmem:[#allocation5 + $0x2a8] sm:$0xf]  ;;  %v6756_v57 = vld [vmem:[#allocation5 + $0x334] sm:$0xf0] }
  0x9e   :  { %1699 = vmatpush.bf16.msrb.mxu0 %v5245_v4  ;;  %1712 = vmatpush.bf16.msrb.mxu1 %v5373_v5  ;;  %v6804_v4 = vld [vmem:[#allocation5 + $0x4b4] sm:$0xf0]  ;;  %v5296_v5 = vld [vmem:[#allocation5 + $0x5a8] sm:$0xf]  ;;  %v4913_v7 = vor.u32 %v6740_v63, %v4912_v62 }
  0x9f   :  { %1725 = vmatpush.bf16.msrb.mxu2 %v4609_v6  ;;  %v6836_v6 = vld [vmem:[#allocation5 + $0x5b4] sm:$0xf0]  ;;  %v5169_v11 = vor.u32 %v6804_v4, %v5168_v3  ;;  %v4832_v63 = vld [vmem:[#allocation5 + $0x208] sm:$0xf] }
  0xa0   :  { %v5297_v16 = vor.u32 %v6836_v6, %v5296_v5  ;;  %v6720_v0 = vld [vmem:[#allocation5 + $0x214] sm:$0xf0]  ;;  %v4960_v3 = vld [vmem:[#allocation5 + $0x308] sm:$0xf] }
  0xa1   :  { %1738 = vmatpush.bf16.msrb.mxu3 %v4737_v12  ;;  %v4896_v12 = vld [vmem:[#allocation5 + $0x288] sm:$0xf]  ;;  %v6752_v4 = vld [vmem:[#allocation5 + $0x314] sm:$0xf0] }
  0xa2   :  { %1700 = vmatpush.bf16.msrb.mxu0 %v5229_v19  ;;  %1713 = vmatpush.bf16.msrb.mxu1 %v5357_v22  ;;  %v6800_v19 = vld [vmem:[#allocation5 + $0x494] sm:$0xf0]  ;;  %v4897_v22 = vor.u32 %v6736_v13, %v4896_v12  ;;  %v5088_v5 = vld [vmem:[#allocation5 + $0x408] sm:$0xf]  ;;  %v4961_v20 = vor.u32 %v6752_v4, %v4960_v3 }
  0xa3   :  { %1726 = vmatpush.bf16.msrb.mxu2 %v4593_v23  ;;  %v5025_v23 = vor.u32 %v6768_v17, %v5024_v14  ;;  %v5153_v24 = vor.u32 %v6800_v19, %v5152_v18  ;;  %v5456_v12 = vld [vmem:[#allocation5 + $0x6e8] sm:$0xf]  ;;  %v6876_v13 = vld [vmem:[#allocation5 + $0x6f4] sm:$0xf0]  ;;  %v6682_v14 = vld [vmem:[#allocation5 + $0xec] sm:$0xf] }
  0xa4   :  { %v4690_v17 = vld [vmem:[#allocation5 + $0xf8] sm:$0xf0]  ;;  %v6714_v18 = vld [vmem:[#allocation5 + $0x1ec] sm:$0xf]  ;;  %v5392_v4 = vld [vmem:[#allocation5 + $0x668] sm:$0xf] }
  0xa5   :  { %1739 = vmatpush.bf16.msrb.mxu3 %v4721_v28  ;;  %v5008_v28 = vld [vmem:[#allocation5 + $0x368] sm:$0xf]  ;;  %v4818_v19 = vld [vmem:[#allocation5 + $0x1f8] sm:$0xf0] }
  0xa6   :  { %1701 = vmatpush.bf16.msrb.mxu0 %v5213_v38  ;;  %1714 = vmatpush.bf16.msrb.mxu1 %v5341_v42  ;;  %v4881_v38 = vor.u32 %v6732_v27, %v4880_v26  ;;  %v5009_v39 = vor.u32 %v6764_v30, %v5008_v28  ;;  %v6728_v42 = vld [vmem:[#allocation5 + $0x254] sm:$0xf0]  ;;  %v5457_v26 = vor.u32 %v6876_v13, %v5456_v12  ;;  %v4754_v12 = vld [vmem:[#allocation5 + $0x178] sm:$0xf0]  ;;  %v6730_v13 = vld [vmem:[#allocation5 + $0x26c] sm:$0xf] }
  0xa7   :  { %1727 = vmatpush.bf16.msrb.mxu2 %v4577_v43  ;;  %v4992_v43 = vld [vmem:[#allocation5 + $0x348] sm:$0xf]  ;;  %v4865_v50 = vor.u32 %v6728_v42, %v4864_v41  ;;  %v4693_v27 = vor.u32 %v6682_v14, %v4690_v17  ;;  %v4821_v28 = vor.u32 %v6714_v18, %v4818_v19  ;;  %v6872_v30 = vld [vmem:[#allocation5 + $0x6d4] sm:$0xf0]  ;;  %v4677_v42 = vor.u32 %v6678_v31, %v4674_v34  ;;  %v4882_v14 = vld [vmem:[#allocation5 + $0x278] sm:$0xf0] }
  0xa8   :  { %v4993_v51 = vor.u32 %v6760_v45, %v4992_v43  ;;  %v6868_v45 = vld [vmem:[#allocation5 + $0x6b4] sm:$0xf0] }
  0xa9   :  { %1740 = vmatpush.bf16.msrb.mxu3 %v4705_v46  ;;  %1702 = vmatmul.bf16.vlgmr.msrb.gmra.mxu0 %v7629_v37  ;;  %v5120_v46 = vld [vmem:[#allocation5 + $0x448] sm:$0xf] }
  0xaa   :  { %1746 = vmatpush.bf16.msra.mxu0 %v4945_v47  ;;  %1759 = vmatpush.bf16.msra.mxu1 %v5073_v48  ;;  %v6792_v47 = vld [vmem:[#allocation5 + $0x454] sm:$0xf0]  ;;  %v5248_v48 = vld [vmem:[#allocation5 + $0x548] sm:$0xf] }
  0xab   :  { %1772 = vmatpush.bf16.msra.mxu2 %v5201_v49  ;;  %1715 = vmatmul.bf16.vlgmr.msrb.gmra.mxu1 %v7625_v33  ;;  %v6824_v49 = vld [vmem:[#allocation5 + $0x554] sm:$0xf0]  ;;  %v5121_v52 = vor.u32 %v6792_v47, %v5120_v46  ;;  %v6674_v46 = vld [vmem:[#allocation5 + $0xac] sm:$0xf] }
  0xac   :  { %1728 = vmatmul.bf16.vlgmr.msrb.gmra.mxu2 %v7615_v9  ;;  %1741 = vmatmul.bf16.vlgmr.msrb.gmra.mxu3 %v7622_v25  ;;  %v5249_v56 = vor.u32 %v6824_v49, %v5248_v48  ;;  %v4658_v48 = vld [vmem:[#allocation5 + $0xb8] sm:$0xf0]  ;;  %v6706_v49 = vld [vmem:[#allocation5 + $0x1ac] sm:$0xf] }
  0xad   :  { %1785 = vmatpush.bf16.msra.mxu3 %v5329_v53  ;;  %v4848_v53 = vld [vmem:[#allocation5 + $0x228] sm:$0xf] }
  0xae   :  { %1747 = vmatpush.bf16.msra.mxu0 %v4929_v59  ;;  %1760 = vmatpush.bf16.msra.mxu1 %v5057_v60  ;;  %v6788_v59 = vld [vmem:[#allocation5 + $0x434] sm:$0xf0]  ;;  %v5232_v60 = vld [vmem:[#allocation5 + $0x528] sm:$0xf]  ;;  %v4849_v62 = vor.u32 %v6724_v54, %v4848_v53  ;;  %v4661_v54 = vor.u32 %v6674_v46, %v4658_v48  ;;  %v4850_v46 = vld [vmem:[#allocation5 + $0x238] sm:$0xf0] }
  0xaf   :  { %1773 = vmatpush.bf16.msra.mxu2 %v5185_v61  ;;  %v6820_v61 = vld [vmem:[#allocation5 + $0x534] sm:$0xf0]  ;;  %v5105_v2 = vor.u32 %v6788_v59, %v5104_v58  ;;  %v6670_v58 = vld [vmem:[#allocation5 + $0x8c] sm:$0xf] }
  0xb0   :  { %v5233_v6 = vor.u32 %v6820_v61, %v5232_v60  ;;  %v4642_v60 = vld [vmem:[#allocation5 + $0x98] sm:$0xf0]  ;;  %v6702_v61 = vld [vmem:[#allocation5 + $0x18c] sm:$0xf] }
  0xb1   :  { %1786 = vmatpush.bf16.msra.mxu3 %v5313_v1  ;;  %v4977_v1 = vor.u32 %v6756_v57, %v4976_v55  ;;  %v6864_v57 = vld [vmem:[#allocation5 + $0x694] sm:$0xf0] }
  0xb2   :  { %1748 = vmatpush.bf16.msra.mxu0 %v4913_v7  ;;  %1761 = vmatpush.bf16.msra.mxu1 %v5041_v10  ;;  %v6784_v7 = vld [vmem:[#allocation5 + $0x414] sm:$0xf0]  ;;  %v5216_v10 = vld [vmem:[#allocation5 + $0x508] sm:$0xf] }
  0xb3   :  { %1774 = vmatpush.bf16.msra.mxu2 %v5169_v11  ;;  %v6816_v11 = vld [vmem:[#allocation5 + $0x514] sm:$0xf0]  ;;  %v5089_v21 = vor.u32 %v6784_v7, %v5088_v5 }
  0xb4   :  { %v6860_v5 = vld [vmem:[#allocation5 + $0x674] sm:$0xf0] }
  0xb5   :  { %1787 = vmatpush.bf16.msra.mxu3 %v5297_v16  ;;  %v4833_v16 = vor.u32 %v6720_v0, %v4832_v63  ;;  %v6734_v63 = vld [vmem:[#allocation5 + $0x28c] sm:$0xf]  ;;  %v4898_v0 = vld [vmem:[#allocation5 + $0x298] sm:$0xf0] }
  0xb6   :  { %1749 = vmatpush.bf16.msra.mxu0 %v4897_v22  ;;  %1762 = vmatpush.bf16.msra.mxu1 %v5025_v23  ;;  %v6746_v22 = vld [vmem:[#allocation5 + $0x2ec] sm:$0xf]  ;;  %v4946_v23 = vld [vmem:[#allocation5 + $0x2f8] sm:$0xf0]  ;;  %v4901_v7 = vor.u32 %v6734_v63, %v4898_v0 }
  0xb7   :  { %1775 = vmatpush.bf16.msra.mxu2 %v5153_v24  ;;  %v5217_v24 = vor.u32 %v6816_v11, %v5216_v10  ;;  %v4949_v32 = vor.u32 %v6746_v22, %v4946_v23  ;;  %v4626_v10 = vld [vmem:[#allocation5 + $0x78] sm:$0xf0]  ;;  %v6698_v11 = vld [vmem:[#allocation5 + $0x16c] sm:$0xf]  ;;  %v4885_v23 = vor.u32 %v6730_v13, %v4882_v14 }
  0xb8   :  { %v4757_v19 = vor.u32 %v6698_v11, %v4754_v12  ;;  %v6662_v22 = vld [vmem:[#allocation5 + $0x4c] sm:$0xf] }
  0xb9   :  { %1788 = vmatpush.bf16.msra.mxu3 %v5281_v29  ;;  %v5440_v29 = vld [vmem:[#allocation5 + $0x6c8] sm:$0xf]  ;;  %v6810_v63 = vld [vmem:[#allocation5 + $0x4ec] sm:$0xf] }
  0xba   :  { %1750 = vmatpush.bf16.msra.mxu0 %v4881_v38  ;;  %1763 = vmatpush.bf16.msra.mxu1 %v5009_v39  ;;  %v4802_v38 = vld [vmem:[#allocation5 + $0x1d8] sm:$0xf0]  ;;  %v6742_v39 = vld [vmem:[#allocation5 + $0x2cc] sm:$0xf]  ;;  %v5441_v41 = vor.u32 %v6872_v30, %v5440_v29 }
  0xbb   :  { %1776 = vmatpush.bf16.msra.mxu2 %v5137_v40  ;;  %v4930_v40 = vld [vmem:[#allocation5 + $0x2d8] sm:$0xf0]  ;;  %v4805_v43 = vor.u32 %v6710_v35, %v4802_v38  ;;  %v5360_v35 = vld [vmem:[#allocation5 + $0x628] sm:$0xf]  ;;  %v6852_v38 = vld [vmem:[#allocation5 + $0x634] sm:$0xf0] }
  0xbc   :  { %v4933_v47 = vor.u32 %v6742_v39, %v4930_v40  ;;  %v4866_v29 = vld [vmem:[#allocation5 + $0x258] sm:$0xf0]  ;;  %v6658_v39 = vld [vmem:[#allocation5 + $0x2c] sm:$0xf]  ;;  %v5361_v48 = vor.u32 %v6852_v38, %v5360_v35 }
  0xbd   :  { %1789 = vmatpush.bf16.msra.mxu3 %v5265_v44  ;;  %v5424_v44 = vld [vmem:[#allocation5 + $0x6a8] sm:$0xf]  ;;  %v5042_v35 = vld [vmem:[#allocation5 + $0x3b8] sm:$0xf0]  ;;  %v6802_v38 = vld [vmem:[#allocation5 + $0x4ac] sm:$0xf] }
  0xbe   :  { %1751 = vmatpush.bf16.msra.mxu0 %v4865_v50  ;;  %1764 = vmatpush.bf16.msra.mxu1 %v4993_v51  ;;  %v4786_v50 = vld [vmem:[#allocation5 + $0x1b8] sm:$0xf0]  ;;  %v6738_v51 = vld [vmem:[#allocation5 + $0x2ac] sm:$0xf]  ;;  %v5425_v53 = vor.u32 %v6868_v45, %v5424_v44 }
  0xbf   :  { %1777 = vmatpush.bf16.msra.mxu2 %v5121_v52  ;;  %v4914_v52 = vld [vmem:[#allocation5 + $0x2b8] sm:$0xf0]  ;;  %v4789_v55 = vor.u32 %v6706_v49, %v4786_v50  ;;  %v6722_v45 = vld [vmem:[#allocation5 + $0x22c] sm:$0xf]  ;;  %v5344_v49 = vld [vmem:[#allocation5 + $0x608] sm:$0xf] }
  0xc0   :  { %v4917_v59 = vor.u32 %v6738_v51, %v4914_v52  ;;  %v6848_v50 = vld [vmem:[#allocation5 + $0x614] sm:$0xf0] }
  0xc1   :  { %1790 = vmatpush.bf16.msra.mxu3 %v5249_v56  ;;  %v5408_v56 = vld [vmem:[#allocation5 + $0x688] sm:$0xf]  ;;  %v5345_v0 = vor.u32 %v6848_v50, %v5344_v49  ;;  %v6766_v50 = vld [vmem:[#allocation5 + $0x38c] sm:$0xf] }
  0xc2   :  { %1752 = vmatpush.bf16.msra.mxu0 %v4849_v62  ;;  %1765 = vmatpush.bf16.msra.mxu1 %v4977_v1  ;;  %v4770_v62 = vld [vmem:[#allocation5 + $0x198] sm:$0xf0]  ;;  %v5409_v1 = vor.u32 %v6864_v57, %v5408_v56  ;;  %v6686_v56 = vld [vmem:[#allocation5 + $0x10c] sm:$0xf]  ;;  %v4853_v57 = vor.u32 %v6722_v45, %v4850_v46 }
  0xc3   :  { %1778 = vmatpush.bf16.msra.mxu2 %v5105_v2  ;;  %v4645_v2 = vor.u32 %v6670_v58, %v4642_v60  ;;  %v4773_v3 = vor.u32 %v6702_v61, %v4770_v62  ;;  %v4706_v58 = vld [vmem:[#allocation5 + $0x118] sm:$0xf0]  ;;  %v6778_v61 = vld [vmem:[#allocation5 + $0x3ec] sm:$0xf] }
  0xc4   :  { %v4834_v60 = vld [vmem:[#allocation5 + $0x218] sm:$0xf0] }
  0xc5   :  { %1791 = vmatpush.bf16.msra.mxu3 %v5233_v6  ;;  %v6666_v6 = vld [vmem:[#allocation5 + $0x6c] sm:$0xf]  ;;  %v7647_v17 = vpop.f32.mrf.mxu0  ;;  %v5074_v62 = vld [vmem:[#allocation5 + $0x3f8] sm:$0xf0] }
  0xc6   :  { %1753 = vmatpush.bf16.msra.mxu0 %v4833_v16  ;;  %1766 = vmatpush.bf16.msra.mxu1 %v4961_v20  ;;  %v5393_v16 = vor.u32 %v6860_v5, %v5392_v4  ;;  %v4629_v18 = vor.u32 %v6666_v6, %v4626_v10  ;;  %v5376_v20 = vld [vmem:[#allocation5 + $0x648] sm:$0xf]  ;;  %v4709_v6 = vor.u32 %v6686_v56, %v4706_v58  ;;  %v5458_v10 = vld [vmem:[#allocation5 + $0x6f8] sm:$0xf0]  ;;  %v6862_v56 = vld [vmem:[#allocation5 + $0x68c] sm:$0xf] }
  0xc7   :  { %1779 = vmatpush.bf16.msra.mxu2 %v5089_v21  ;;  %v6856_v21 = vld [vmem:[#allocation5 + $0x654] sm:$0xf0]  ;;  %v5077_v12 = vor.u32 %v6778_v61, %v5074_v62  ;;  %v5426_v45 = vld [vmem:[#allocation5 + $0x6b8] sm:$0xf0]  ;;  %v6762_v61 = vld [vmem:[#allocation5 + $0x36c] sm:$0xf] }
  0xc8   :  { %v5377_v30 = vor.u32 %v6856_v21, %v5376_v20  ;;  %v6806_v20 = vld [vmem:[#allocation5 + $0x4cc] sm:$0xf]  ;;  %v5010_v62 = vld [vmem:[#allocation5 + $0x378] sm:$0xf0] }
  0xc9   :  { %1792 = vmatpush.bf16.msra.mxu3 %v5217_v24  ;;  %1754 = vmatmul.bf16.vlgmr.msra.gmra.mxu0 %v7613_v8  ;;  %v4610_v24 = vld [vmem:[#allocation5 + $0x58] sm:$0xf0] }
  0xca   :  { %1798 = vmatpush.bf16.msrb.mxu0 %v5457_v26  ;;  %1811 = vmatpush.bf16.msrb.mxu1 %v4693_v27  ;;  %v6694_v26 = vld [vmem:[#allocation5 + $0x14c] sm:$0xf]  ;;  %v4738_v27 = vld [vmem:[#allocation5 + $0x158] sm:$0xf0] }
  0xcb   :  { %1824 = vmatpush.bf16.msrb.mxu2 %v4821_v28  ;;  %1767 = vmatmul.bf16.vlgmr.msra.gmra.mxu1 %v7617_v15  ;;  %v6726_v28 = vld [vmem:[#allocation5 + $0x24c] sm:$0xf]  ;;  %v4741_v34 = vor.u32 %v6694_v26, %v4738_v27  ;;  %v5314_v26 = vld [vmem:[#allocation5 + $0x5d8] sm:$0xf0] }
  0xcc   :  { %1780 = vmatmul.bf16.vlgmr.msra.gmra.mxu2 %v7627_v36  ;;  %1793 = vmatmul.bf16.vlgmr.msra.gmra.mxu3 %v7629_v37  ;;  %v4869_v40 = vor.u32 %v6726_v28, %v4866_v29  ;;  %v6870_v27 = vld [vmem:[#allocation5 + $0x6cc] sm:$0xf]  ;;  %v5442_v28 = vld [vmem:[#allocation5 + $0x6d8] sm:$0xf0] }
  0xcd   :  { %1837 = vmatpush.bf16.msrb.mxu3 %v4949_v32  ;;  %v4613_v32 = vor.u32 %v6662_v22, %v4610_v24  ;;  %v7651_v44 = vpop.f32.mrf.mxu2  ;;  %v1549_v51 = vpop.f32.mrf.mxu0  ;;  %v6838_v24 = vld [vmem:[#allocation5 + $0x5cc] sm:$0xf] }
  0xce   :  { %1799 = vmatpush.bf16.msrb.mxu0 %v5441_v41  ;;  %1812 = vmatpush.bf16.msrb.mxu1 %v4677_v42  ;;  %v4594_v41 = vld [vmem:[#allocation5 + $0x38] sm:$0xf0]  ;;  %v6690_v42 = vld [vmem:[#allocation5 + $0x12c] sm:$0xf] }
  0xcf   :  { %1825 = vmatpush.bf16.msrb.mxu2 %v4805_v43  ;;  %v4722_v43 = vld [vmem:[#allocation5 + $0x138] sm:$0xf0]  ;;  %v4597_v52 = vor.u32 %v6658_v39, %v4594_v41  ;;  %v5445_v39 = vor.u32 %v6870_v27, %v5442_v28  ;;  %v6834_v41 = vld [vmem:[#allocation5 + $0x5ac] sm:$0xf] }
  0xd0   :  { %v5026_v51 = vld [vmem:[#allocation5 + $0x398] sm:$0xf0] }
  0xd1   :  { %1838 = vmatpush.bf16.msrb.mxu3 %v4933_v47 }
  0xd2   :  { %1800 = vmatpush.bf16.msrb.mxu0 %v5425_v53  ;;  %1813 = vmatpush.bf16.msrb.mxu1 %v4661_v54  ;;  %v7649_v31 = vpop.f32.mrf.mxu1  ;;  %v4725_v53 = vor.u32 %v6690_v42, %v4722_v43  ;;  %v6654_v54 = vld [vmem:[#allocation5 + $0xc] sm:$0xf]  ;;  %v5298_v42 = vld [vmem:[#allocation5 + $0x5b8] sm:$0xf0] }
  0xd3   :  { %1826 = vmatpush.bf16.msrb.mxu2 %v4789_v55  ;;  %v4578_v55 = vld [vmem:[#allocation5 + $0x18] sm:$0xf0]  ;;  %v6866_v43 = vld [vmem:[#allocation5 + $0x6ac] sm:$0xf]  ;;  %v5301_v49 = vor.u32 %v6834_v41, %v5298_v42 }
  0xd4   :  { %v4581_v5 = vor.u32 %v6654_v54, %v4578_v55  ;;  %v5154_v54 = vld [vmem:[#allocation5 + $0x498] sm:$0xf0]  ;;  %v6830_v55 = vld [vmem:[#allocation5 + $0x58c] sm:$0xf] }
  0xd5   :  { %1839 = vmatpush.bf16.msrb.mxu3 %v4917_v59  ;;  %v6718_v59 = vld [vmem:[#allocation5 + $0x20c] sm:$0xf]  ;;  %v1575_v13 = vpop.f32.mrf.mxu2  ;;  %v5362_v42 = vld [vmem:[#allocation5 + $0x638] sm:$0xf0] }
  0xd6   :  { %1801 = vmatpush.bf16.msrb.mxu0 %v5409_v1  ;;  %1814 = vmatpush.bf16.msrb.mxu1 %v4645_v2  ;;  %v5202_v1 = vld [vmem:[#allocation5 + $0x4f8] sm:$0xf0]  ;;  %v6842_v2 = vld [vmem:[#allocation5 + $0x5ec] sm:$0xf]  ;;  %v4837_v11 = vor.u32 %v6718_v59, %v4834_v60 }
  0xd7   :  { %1827 = vmatpush.bf16.msrb.mxu2 %v4773_v3  ;;  %v7653_v47 = vpop.f32.mrf.mxu3  ;;  %v5330_v3 = vld [vmem:[#allocation5 + $0x5f8] sm:$0xf0]  ;;  %v5205_v14 = vor.u32 %v6810_v63, %v5202_v1  ;;  %v6794_v63 = vld [vmem:[#allocation5 + $0x46c] sm:$0xf] }
  0xd8   :  { %v5138_v1 = vld [vmem:[#allocation5 + $0x478] sm:$0xf0]  ;;  %v6790_v13 = vld [vmem:[#allocation5 + $0x44c] sm:$0xf] }
  0xd9   :  { %1840 = vmatpush.bf16.msrb.mxu3 %v4901_v7  ;;  %v6874_v7 = vld [vmem:[#allocation5 + $0x6ec] sm:$0xf] }
  0xda   :  { %1802 = vmatpush.bf16.msrb.mxu0 %v5393_v16  ;;  %1815 = vmatpush.bf16.msrb.mxu1 %v4629_v18  ;;  %v1562_v4 = vpop.f32.mrf.mxu1  ;;  %v5333_v16 = vor.u32 %v6842_v2, %v5330_v3  ;;  %v6774_v18 = vld [vmem:[#allocation5 + $0x3cc] sm:$0xf]  ;;  %v5461_v22 = vor.u32 %v6874_v7, %v5458_v10  ;;  %v5266_v3 = vld [vmem:[#allocation5 + $0x578] sm:$0xf0]  ;;  %v5141_v7 = vor.u32 %v6794_v63, %v5138_v1 }
  0xdb   :  { %1828 = vmatpush.bf16.msrb.mxu2 %v4757_v19  ;;  %v5058_v19 = vld [vmem:[#allocation5 + $0x3d8] sm:$0xf0]  ;;  %v6826_v2 = vld [vmem:[#allocation5 + $0x56c] sm:$0xf] }
  0xdc   :  { %v5061_v29 = vor.u32 %v6774_v18, %v5058_v19  ;;  %v6858_v4 = vld [vmem:[#allocation5 + $0x66c] sm:$0xf]  ;;  %v5269_v10 = vor.u32 %v6826_v2, %v5266_v3  ;;  %v5122_v18 = vld [vmem:[#allocation5 + $0x458] sm:$0xf0]  ;;  %v6883_v3 = vld [vmem:[#allocation7 + $0x30] sm:$0xff] }
  0xdd   :  { %1841 = vmatpush.bf16.msrb.mxu3 %v4885_v23  ;;  %v5186_v23 = vld [vmem:[#allocation5 + $0x4d8] sm:$0xf0]  ;;  %v6822_v19 = vld [vmem:[#allocation5 + $0x54c] sm:$0xf]  ;;  %v5125_v28 = vor.u32 %v6790_v13, %v5122_v18  ;;  %v6879_v18 = vld [vmem:[#allocation7 + $0x10] sm:$0xff] }
  0xde   :  { %1803 = vmatpush.bf16.msrb.mxu0 %v5377_v30  ;;  %1816 = vmatpush.bf16.msrb.mxu1 %v4613_v32  ;;  %v5189_v30 = vor.u32 %v6806_v20, %v5186_v23  ;;  %v5317_v32 = vor.u32 %v6838_v24, %v5314_v26  ;;  %v5250_v20 = vld [vmem:[#allocation5 + $0x558] sm:$0xf0]  ;;  %v6850_v41 = vld [vmem:[#allocation5 + $0x62c] sm:$0xf] }
  0xdf   :  { %1829 = vmatpush.bf16.msrb.mxu2 %v4741_v34  ;;  %v1588_v21 = vpop.f32.mrf.mxu3  ;;  %v6770_v34 = vld [vmem:[#allocation5 + $0x3ac] sm:$0xf]  ;;  %v6892_v2 = vld [vmem:[#allocation7 + $0x78] sm:$0xff] }
  0xe0   :  { %v5045_v46 = vor.u32 %v6770_v34, %v5042_v35  ;;  %v6854_v21 = vld [vmem:[#allocation5 + $0x64c] sm:$0xf] }
  0xe1   :  { %1842 = vmatpush.bf16.msrb.mxu3 %v4869_v40  ;;  %v5170_v40 = vld [vmem:[#allocation5 + $0x4b8] sm:$0xf0]  ;;  %v6786_v34 = vld [vmem:[#allocation5 + $0x42c] sm:$0xf] }
  0xe2   :  { %1804 = vmatpush.bf16.msrb.mxu0 %v5361_v48  ;;  %1817 = vmatpush.bf16.msrb.mxu1 %v4597_v52  ;;  %v5173_v48 = vor.u32 %v6802_v38, %v5170_v40  ;;  %v6798_v52 = vld [vmem:[#allocation5 + $0x48c] sm:$0xf]  ;;  %v5106_v38 = vld [vmem:[#allocation5 + $0x438] sm:$0xf0] }
  0xe3   :  { %1830 = vmatpush.bf16.msrb.mxu2 %v4725_v53  ;;  %v5429_v53 = vor.u32 %v6866_v43, %v5426_v45  ;;  %v5234_v40 = vld [vmem:[#allocation5 + $0x538] sm:$0xf0]  ;;  %v7670_v43 = vld [vmem:[%s7770_s3] sm:$0xf]  ;;  %s7498_s3 = smov 126  }
  0xe5   :  { %1843 = vmatpush.bf16.msrb.mxu3 %v4853_v57  ;;  %v5410_v57 = vld [vmem:[#allocation5 + $0x698] sm:$0xf0] }
  0xe6   :  { %1805 = vmatpush.bf16.msrb.mxu0 %v5345_v0  ;;  %1818 = vmatpush.bf16.msrb.mxu1 %v4581_v5  ;;  %v7659_v58 = vpop.f32.mrf.mxu0  ;;  %v5413_v0 = vor.u32 %v6862_v56, %v5410_v57  ;;  %v5394_v5 = vld [vmem:[#allocation5 + $0x678] sm:$0xf0]  ;;  %v410_v56 = vperm.slane %v7670_v43, 0  ;;  %v6846_v57 = vld [vmem:[#allocation5 + $0x60c] sm:$0xf] }
  0xe7   :  { %1831 = vmatpush.bf16.msrb.mxu2 %v4709_v6  ;;  %v5013_v6 = vor.u32 %v6762_v61, %v5010_v62 }
  0xe8   :  { %v7661_v59 = vpop.f32.mrf.mxu1  ;;  %v1548_v1 = vadd.f32 %v7647_v17, %v410_v56  ;;  %v6882_v17 = vld [vmem:[#allocation7 + $0x28] sm:$0xff]  ;;  %v6895_v56 = vld [vmem:[#allocation7 + $0x90] sm:$0xff] }
  0xe9   :  { %1844 = vmatpush.bf16.msrb.mxu3 %v4837_v11  ;;  %1806 = vmatmul.bf16.vlgmr.msrb.gmra.mxu0 %v7625_v33  ;;  %v6758_v11 = vld [vmem:[#allocation5 + $0x34c] sm:$0xf] }
  0xea   :  { %1850 = vmatpush.bf16.msra.mxu0 %v5077_v12  ;;  %1863 = vmatpush.bf16.msra.mxu1 %v5205_v14  ;;  %v4994_v12 = vld [vmem:[#allocation5 + $0x358] sm:$0xf0] }
  0xeb   :  { %1876 = vmatpush.bf16.msra.mxu2 %v5333_v16  ;;  %1819 = vmatmul.bf16.vlgmr.msrb.gmra.mxu1 %v7615_v9  ;;  %v5157_v9 = vor.u32 %v6798_v52, %v5154_v54  ;;  %v5397_v16 = vor.u32 %v6858_v4, %v5394_v5  ;;  %v4997_v24 = vor.u32 %v6758_v11, %v4994_v12  ;;  %v5090_v54 = vld [vmem:[#allocation5 + $0x418] sm:$0xf0]  ;;  %v6891_v5 = vld [vmem:[#allocation7 + $0x70] sm:$0xff]  ;;  %v6889_v12 = vld [vmem:[#allocation7 + $0x60] sm:$0xff] }
  0xec   :  { %1832 = vmatmul.bf16.vlgmr.msrb.gmra.mxu2 %v7622_v25  ;;  %1845 = vmatmul.bf16.vlgmr.msrb.gmra.mxu3 %v7613_v8  ;;  %v5282_v25 = vld [vmem:[#allocation5 + $0x598] sm:$0xf0]  ;;  %v5029_v8 = vor.u32 %v6766_v50, %v5026_v51  ;;  %v6782_v51 = vld [vmem:[#allocation5 + $0x40c] sm:$0xf]  ;;  %v1561_v4 = vadd.f32 %v7649_v31, %v1548_v1 }
  0xed   :  { %1889 = vmatpush.bf16.msra.mxu3 %v5461_v22  ;;  %v5285_v60 = vor.u32 %v6830_v55, %v5282_v25  ;;  %v5378_v22 = vld [vmem:[#allocation5 + $0x658] sm:$0xf0]  ;;  %v6814_v55 = vld [vmem:[#allocation5 + $0x50c] sm:$0xf]  ;;  %v5093_v61 = vor.u32 %v6782_v51, %v5090_v54  ;;  %v6897_v51 = vld [vmem:[#allocation7 + $0xa0] sm:$0xff] }
  0xee   :  { %1851 = vmatpush.bf16.msra.mxu0 %v5061_v29  ;;  %1864 = vmatpush.bf16.msra.mxu1 %v5189_v30  ;;  %v1601_v26 = vpop.f32.mrf.mxu0  ;;  %v5253_v29 = vor.u32 %v6822_v19, %v5250_v20  ;;  %v6754_v30 = vld [vmem:[#allocation5 + $0x32c] sm:$0xf]  ;;  %v5381_v35 = vor.u32 %v6854_v21, %v5378_v22  ;;  %v4962_v50 = vld [vmem:[#allocation5 + $0x318] sm:$0xf0] }
  0xef   :  { %1877 = vmatpush.bf16.msra.mxu2 %v5317_v32  ;;  %v7663_v14 = vpop.f32.mrf.mxu2  ;;  %v7665_v23 = vpop.f32.mrf.mxu3  ;;  %v4978_v32 = vld [vmem:[#allocation5 + $0x338] sm:$0xf0] }
  0xf0   :  { %v1614_v27 = vpop.f32.mrf.mxu1  ;;  %v4981_v45 = vor.u32 %v6754_v30, %v4978_v32  ;;  %v5218_v25 = vld [vmem:[#allocation5 + $0x518] sm:$0xf0]  ;;  %v6877_v32 = vld [vmem:[#allocation7] sm:$0xff] }
  0xf1   :  { %1890 = vmatpush.bf16.msra.mxu3 %v5445_v39  ;;  %v6818_v39 = vld [vmem:[#allocation5 + $0x52c] sm:$0xf]  ;;  %v5221_v62 = vor.u32 %v6814_v55, %v5218_v25  ;;  %v6900_v26 = vld [vmem:[#allocation7 + $0xb8] sm:$0xff] }
  0xf2   :  { %1852 = vmatpush.bf16.msra.mxu0 %v5045_v46  ;;  %1865 = vmatpush.bf16.msra.mxu1 %v5173_v48  ;;  %v5109_v46 = vor.u32 %v6786_v34, %v5106_v38  ;;  %v5237_v48 = vor.u32 %v6818_v39, %v5234_v40  ;;  %v6886_v27 = vld [vmem:[#allocation7 + $0x48] sm:$0xff]  ;;  %v6896_v55 = vld [vmem:[#allocation7 + $0x98] sm:$0xff] }
  0xf3   :  { %1878 = vmatpush.bf16.msra.mxu2 %v5301_v49  ;;  %v6750_v49 = vld [vmem:[#allocation5 + $0x30c] sm:$0xf]  ;;  %v6908_v1 = vld [vmem:[#allocation7 + $0xf8] sm:$0xff] }
  0xf5   :  { %1891 = vmatpush.bf16.msra.mxu3 %v5429_v53  ;;  %v5365_v53 = vor.u32 %v6850_v41, %v5362_v42 }
  0xf6   :  { %1853 = vmatpush.bf16.msra.mxu0 %v5029_v8  ;;  %1866 = vmatpush.bf16.msra.mxu1 %v5157_v9  ;;  %v5346_v8 = vld [vmem:[#allocation5 + $0x618] sm:$0xf0] }
  0xf7   :  { %1879 = vmatpush.bf16.msra.mxu2 %v5285_v60  ;;  %v1627_v52 = vpop.f32.mrf.mxu2  ;;  %v1640_v9 = vpop.f32.mrf.mxu3  ;;  %v4965_v60 = vor.u32 %v6750_v49, %v4962_v50  ;;  %v5349_v63 = vor.u32 %v6846_v57, %v5346_v8  ;;  %v6894_v8 = vld [vmem:[#allocation7 + $0x88] sm:$0xff] }
  0xf9   :  { %1892 = vmatpush.bf16.msra.mxu3 %v5413_v0  ;;  %v6884_v0 = vld [vmem:[#allocation7 + $0x38] sm:$0xff] }
  0xfa   :  { %1854 = vmatpush.bf16.msra.mxu0 %v5013_v6  ;;  %1867 = vmatpush.bf16.msra.mxu1 %v5141_v7  ;;  %v1574_v6 = vadd.f32 %v7651_v44, %v1561_v4  ;;  %v6890_v7 = vld [vmem:[#allocation7 + $0x68] sm:$0xff]  ;;  %v411_v44 = vperm.slane %v7670_v43, 1 }
  0xfb   :  { %1880 = vmatpush.bf16.msra.mxu2 %v5269_v10  ;;  %v6881_v10 = vld [vmem:[#allocation7 + $0x20] sm:$0xff] }
  0xfc   :  { %v1587_v31 = vadd.f32 %v7653_v47, %v1574_v6  ;;  %v6887_v47 = vld [vmem:[#allocation7 + $0x50] sm:$0xff]  ;;  %v1639_v22 = vadd.f32 %v7665_v23, %v411_v44 }
  0xfd   :  { %1893 = vmatpush.bf16.msra.mxu3 %v5397_v16 }
  0xfe   :  { %1855 = vmatpush.bf16.msra.mxu0 %v4997_v24  ;;  %1868 = vmatpush.bf16.msra.mxu1 %v5125_v28  ;;  %v6878_v24 = vld [vmem:[#allocation7 + $0x8] sm:$0xff] }
  0xff   :  { %1881 = vmatpush.bf16.msra.mxu2 %v5253_v29 }
 0x101   :  { %1894 = vmatpush.bf16.msra.mxu3 %v5381_v35 }
 0x102   :  { %1856 = vmatpush.bf16.msra.mxu0 %v4981_v45  ;;  %1869 = vmatpush.bf16.msra.mxu1 %v5109_v46 }
 0x103   :  { %1882 = vmatpush.bf16.msra.mxu2 %v5237_v48  ;;  %v6898_v48 = vld [vmem:[#allocation7 + $0xa8] sm:$0xff] }
 0x105   :  { %1895 = vmatpush.bf16.msra.mxu3 %v5365_v53 }
 0x106   :  { %1857 = vmatpush.bf16.msra.mxu0 %v4965_v60  ;;  %1870 = vmatpush.bf16.msra.mxu1 %v5093_v61  ;;  %v1651_v11 = vpop.f32.mrf.mxu0  ;;  %v6893_v61 = vld [vmem:[#allocation7 + $0x80] sm:$0xff] }
 0x107   :  { %1883 = vmatpush.bf16.msra.mxu2 %v5221_v62  ;;  %v1652_v30 = vadd.f32 %v1651_v11, %v1639_v22  ;;  %v412_v62 = vperm.slane %v7670_v43, 2 }
 0x109   :  { %1896 = vmatpush.bf16.msra.mxu3 %v5349_v63  ;;  %1858 = vmatmul.bf16.vlgmr.msra.gmra.mxu0 %v7617_v15  ;;  %v1664_v15 = vpop.f32.mrf.mxu1 }
 0x10a   :  { %2170 = vmatpush.bf16.msrb.mxu0 %v6884_v0  ;;  %2183 = vmatpush.bf16.msrb.mxu1 %v6892_v2  ;;  %v1665_v35 = vadd.f32 %v1664_v15, %v1652_v30 }
 0x10b   :  { %1871 = vmatmul.bf16.vlgmr.msra.gmra.mxu1 %v7627_v36  ;;  %1884 = vmatmul.bf16.vlgmr.msra.gmra.mxu2 %v7629_v37  ;;  %v6880_v36 = vld [vmem:[#allocation7 + $0x18] sm:$0xff]  ;;  %v1600_v37 = vadd.f32 %v7659_v58, %v1587_v31  ;;  %v6905_v31 = vld [vmem:[#allocation7 + $0xe0] sm:$0xff] }
 0x10c   :  { %1897 = vmatmul.bf16.vlgmr.msra.gmra.mxu3 %v7625_v33  ;;  %v6888_v33 = vld [vmem:[#allocation7 + $0x58] sm:$0xff]  ;;  %2196 = vmatpush.bf16.msrb.mxu2 %v6900_v26 }
 0x10d   :  { %v1613_v20 = vadd.f32 %v7661_v59, %v1600_v37  ;;  %v6885_v59 = vld [vmem:[#allocation7 + $0x40] sm:$0xff]  ;;  %2209 = vmatpush.bf16.msrb.mxu3 %v6908_v1 }
 0x10e   :  { %2171 = vmatpush.bf16.msrb.mxu0 %v6883_v3  ;;  %2184 = vmatpush.bf16.msrb.mxu1 %v6891_v5  ;;  %v1653_v19 = vpop.f32.mrf.mxu0  ;;  %v6907_v5 = vld [vmem:[#allocation7 + $0xf0] sm:$0xff] }
 0x10f   :  { %v1677_v13 = vpop.f32.mrf.mxu2  ;;  %v1690_v16 = vpop.f32.mrf.mxu3  ;;  %v1626_v58 = vadd.f32 %v7663_v14, %v1613_v20  ;;  %v6899_v14 = vld [vmem:[#allocation7 + $0xb0] sm:$0xff]  ;;  %v6902_v20 = vld [vmem:[#allocation7 + $0xc8] sm:$0xff] }
 0x110   :  { %v1678_v23 = vadd.f32 %v1677_v13, %v1665_v35  ;;  %2197 = vmatpush.bf16.msrb.mxu2 %v6899_v14 }
 0x111   :  { %v1666_v21 = vpop.f32.mrf.mxu1  ;;  %v1902_v34 = vmax.f32 %v1626_v58, 0.0  ;;  %2210 = vmatpush.bf16.msrb.mxu3 %v6907_v5 }
 0x112   :  { %2172 = vmatpush.bf16.msrb.mxu0 %v6882_v17  ;;  %2185 = vmatpush.bf16.msrb.mxu1 %v6890_v7  ;;  %v1691_v39 = vadd.f32 %v1690_v16, %v1678_v23  ;;  %v6906_v7 = vld [vmem:[#allocation7 + $0xe8] sm:$0xff] }
 0x113   :  { %v1906_v38 = vpack.c.bf16 %v1902_v34, %v1902_v34 }
 0x114   :  { %2198 = vmatpush.bf16.msrb.mxu2 %v6898_v48 }
 0x115   :  { %2211 = vmatpush.bf16.msrb.mxu3 %v6906_v7 }
 0x116   :  { %2173 = vmatpush.bf16.msrb.mxu0 %v6881_v10  ;;  %2186 = vmatpush.bf16.msrb.mxu1 %v6889_v12 }
 0x117   :  { %v1679_v28 = vpop.f32.mrf.mxu2  ;;  %v1692_v29 = vpop.f32.mrf.mxu3 }
 0x118   :  { %2199 = vmatpush.bf16.msrb.mxu2 %v6897_v51  ;;  %v413_v28 = vperm.slane %v7670_v43, 3  ;;  %v7195_v51 = vld [vmem:[#allocation8] ss:$0 sm:$0xff] }
 0x119   :  { %2212 = vmatpush.bf16.msrb.mxu3 %v6905_v31 }
 0x11a   :  { %2174 = vmatpush.bf16.msrb.mxu0 %v6880_v36  ;;  %2187 = vmatpush.bf16.msrb.mxu1 %v6888_v33  ;;  %v6904_v36 = vld [vmem:[#allocation7 + $0xd8] sm:$0xff]  ;;  %v6903_v33 = vld [vmem:[#allocation7 + $0xd0] sm:$0xff] }
 0x11c   :  { %2200 = vmatpush.bf16.msrb.mxu2 %v6896_v55 }
 0x11d   :  { %2213 = vmatpush.bf16.msrb.mxu3 %v6904_v36  ;;  %v7499_v36 = vmov 1  }
 0x11e   :  { %2175 = vmatpush.bf16.msrb.mxu0 %v6879_v18  ;;  %2188 = vmatpush.bf16.msrb.mxu1 %v6887_v47 }
 0x11f   :  { %7193 = vset.pattern.permute.xlu1 %v7499_v36 }
 0x120   :  { %2201 = vmatpush.bf16.msrb.mxu2 %v6895_v56  ;;  %v6915_v56 = vld [vmem:[#allocation10 + $0x30] sm:$0xff] }
 0x121   :  { %2214 = vmatpush.bf16.msrb.mxu3 %v6903_v33  ;;  %v6947_v33 = vld [vmem:[#allocation13 + $0xec] sm:$0xf0] }
 0x122   :  { %2176 = vmatpush.bf16.msrb.mxu0 %v6878_v24  ;;  %2189 = vmatpush.bf16.msrb.mxu1 %v6886_v27  ;;  %v6901_v24 = vld [vmem:[#allocation7 + $0xc0] sm:$0xff] }
 0x124   :  { %2202 = vmatpush.bf16.msrb.mxu2 %v6894_v8  ;;  %v6913_v8 = vld [vmem:[#allocation10 + $0x20] sm:$0xff] }
 0x125   :  { %2215 = vmatpush.bf16.msrb.mxu3 %v6902_v20  ;;  %v6948_v20 = vld [vmem:[#allocation13 + $0xf4] sm:$0xf0] }
 0x126   :  { %2177 = vmatpush.bf16.msrb.mxu0 %v6877_v32  ;;  %2190 = vmatpush.bf16.msrb.mxu1 %v6885_v59  ;;  %v1703_v40 = vpop.f32.mrf.mxu0 }
 0x127   :  { %v1704_v41 = vadd.f32 %v1703_v40, %v1691_v39 }
 0x128   :  { %v1716_v42 = vpop.f32.mrf.mxu1  ;;  %2203 = vmatpush.bf16.msrb.mxu2 %v6893_v61 }
 0x129   :  { %2178 = vmatmul.bf16.vlgmr.msrb.gmra.mxu0 %v1906_v38  ;;  %v1717_v45 = vadd.f32 %v1716_v42, %v1704_v41  ;;  %2216 = vmatpush.bf16.msrb.mxu3 %v6901_v24  ;;  %v5746_v24 = vld [vmem:[#allocation13 + $0xf8] sm:$0xf0] }
 0x12b   :  { %v1903_v46 = vmax.f32 %v1717_v45, 0.0 }
 0x12d   :  { %v1907_v49 = vpack.c.bf16 %v1903_v46, %v1903_v46 }
 0x12e   :  { %v1705_v53 = vpop.f32.mrf.mxu0 }
 0x12f   :  { %v1729_v50 = vpop.f32.mrf.mxu2  ;;  %v1742_v52 = vpop.f32.mrf.mxu3  ;;  %2191 = vmatmul.bf16.vlgmr.msrb.gmra.mxu1 %v1907_v49 }
 0x130   :  { %v1718_v54 = vpop.f32.mrf.mxu1  ;;  %v1730_v2 = vadd.f32 %v1729_v50, %v412_v62  ;;  %v6910_v62 = vld [vmem:[#allocation10 + $0x8] sm:$0xff] }
 0x132   :  { %v1743_v17 = vadd.f32 %v1742_v52, %v1730_v2 }
 0x137   :  { %v1731_v25 = vpop.f32.mrf.mxu2  ;;  %v1744_v57 = vpop.f32.mrf.mxu3 }
 0x138   :  { %v6916_v25 = vld [vmem:[#allocation10 + $0x38] sm:$0xff]  ;;  %v6914_v57 = vld [vmem:[#allocation10 + $0x28] sm:$0xff] }
 0x139   :  { %2292 = vmatpush.bf16.msra.mxu0 %v6916_v25  ;;  %v5690_v25 = vld [vmem:[#allocation13 + $0x90] sm:$0xf0] }
 0x13d   :  { %2293 = vmatpush.bf16.msra.mxu0 %v6915_v56  ;;  %v5696_v56 = vld [vmem:[#allocation13 + $0x88] sm:$0xf] }
 0x141   :  { %2294 = vmatpush.bf16.msra.mxu0 %v6914_v57  ;;  %v6936_v57 = vld [vmem:[#allocation13 + $0x94] sm:$0xf0] }
 0x145   :  { %2295 = vmatpush.bf16.msra.mxu0 %v6913_v8  ;;  %v6934_v8 = vld [vmem:[#allocation13 + $0x8c] sm:$0xf] }
 0x146   :  { %v1755_v9 = vpop.f32.mrf.mxu0 }
 0x147   :  { %v1756_v11 = vadd.f32 %v1755_v9, %v1743_v17  ;;  %v6912_v9 = vld [vmem:[#allocation10 + $0x18] sm:$0xff] }
 0x148   :  { %v1768_v60 = vpop.f32.mrf.mxu1 }
 0x149   :  { %v1769_v15 = vadd.f32 %v1768_v60, %v1756_v11  ;;  %2296 = vmatpush.bf16.msra.mxu0 %v6912_v9  ;;  %v6911_v60 = vld [vmem:[#allocation10 + $0x10] sm:$0xff]  ;;  %v5698_v9 = vld [vmem:[#allocation13 + $0x98] sm:$0xf0] }
 0x14d   :  { %2297 = vmatpush.bf16.msra.mxu0 %v6911_v60 }
 0x14e   :  { %v1757_v3 = vpop.f32.mrf.mxu0 }
 0x14f   :  { %v1781_v63 = vpop.f32.mrf.mxu2  ;;  %v1794_v0 = vpop.f32.mrf.mxu3 }
 0x150   :  { %v1770_v4 = vpop.f32.mrf.mxu1  ;;  %v1782_v12 = vadd.f32 %v1781_v63, %v1769_v15 }
 0x151   :  { %2298 = vmatpush.bf16.msra.mxu0 %v6910_v62  ;;  %v5697_v62 = vor.u32 %v6936_v57, %v5696_v56  ;;  %v7169_v56 = vld [vmem:[#allocation14 + $0x6e0] sm:$0xf0]  ;;  %v5920_v57 = vld [vmem:[#allocation14 + $0x150] sm:$0xf] }
 0x152   :  { %v1795_v37 = vadd.f32 %v1794_v0, %v1782_v12  ;;  %v6909_v0 = vld [vmem:[#allocation10] sm:$0xff] }
 0x155   :  { %2299 = vmatpush.bf16.msra.mxu0 %v6909_v0  ;;  %v6931_v0 = vld [vmem:[#allocation13 + $0x6c] sm:$0xf0] }
 0x157   :  { %v1783_v6 = vpop.f32.mrf.mxu2  ;;  %v1796_v10 = vpop.f32.mrf.mxu3 }
 0x158   :  { %v7196_v6 = vld [vmem:[#allocation11] ss:$0 sm:$0xff] }
 0x166   :  { %v1807_v13 = vpop.f32.mrf.mxu0 }
 0x167   :  { %v1808_v16 = vadd.f32 %v1807_v13, %v1795_v37  ;;  %v7500_v37 = vmov 0   ;;  %v5736_v13 = vld [vmem:[#allocation13 + $0xe0] sm:$0xf] }
 0x168   :  { %v1820_v44 = vpop.f32.mrf.mxu1  ;;  %7192 = vset.pattern.permute.xlu0 %v7500_v37  ;;  %v6925_v37 = vld [vmem:[#allocation13 + $0x44] sm:$0xf] }
 0x169   :  { %v1904_v18 = vmax.f32 %v1808_v16, 0.0  ;;  %v1821_v29 = vadd.f32 %v1820_v44, %v413_v28  ;;  %v6945_v16 = vld [vmem:[#allocation13 + $0xe4] sm:$0xf]  ;;  %v5737_v44 = vor.u32 %v6947_v33, %v5736_v13  ;;  %v5658_v33 = vld [vmem:[#allocation13 + $0x50] sm:$0xf0] }
 0x16a   :  { %v6941_v28 = vld [vmem:[#allocation13 + $0xc4] sm:$0xf] }
 0x16b   :  { %v1908_v19 = vpack.c.bf16 %v1904_v18, %v1904_v18  ;;  %v5738_v18 = vld [vmem:[#allocation13 + $0xf0] sm:$0xf0]  ;;  %2541 = vmatpush.bf16.msra.mxu1 %v5737_v44  ;;  %v6928_v44 = vld [vmem:[#allocation13 + $0x54] sm:$0xf0] }
 0x16d   :  { %2204 = vmatmul.bf16.vlgmr.msrb.gmra.mxu2 %v1908_v19  ;;  %v5744_v19 = vld [vmem:[#allocation13 + $0xe8] sm:$0xf] }
 0x16e   :  { %v1809_v22 = vpop.f32.mrf.mxu0 }
 0x16f   :  { %v1833_v21 = vpop.f32.mrf.mxu2  ;;  %v1846_v47 = vpop.f32.mrf.mxu3  ;;  %v6946_v22 = vld [vmem:[#allocation13 + $0xec] sm:$0xf] }
 0x170   :  { %v1822_v26 = vpop.f32.mrf.mxu1  ;;  %v1834_v30 = vadd.f32 %v1833_v21, %v1821_v29  ;;  %v5741_v21 = vor.u32 %v6945_v16, %v5738_v18  ;;  %v5722_v29 = vld [vmem:[#allocation13 + $0xd0] sm:$0xf0]  ;;  %v5664_v16 = vld [vmem:[#allocation13 + $0x48] sm:$0xf]  ;;  %v6926_v18 = vld [vmem:[#allocation13 + $0x4c] sm:$0xf] }
 0x171   :  { %v5720_v26 = vld [vmem:[#allocation13 + $0xc0] sm:$0xf] }
 0x172   :  { %v1847_v32 = vadd.f32 %v1846_v47, %v1834_v30  ;;  %v5745_v47 = vor.u32 %v6948_v20, %v5744_v19  ;;  %2554 = vmatpush.bf16.msra.mxu2 %v5741_v21  ;;  %v5666_v19 = vld [vmem:[#allocation13 + $0x58] sm:$0xf0]  ;;  %v5661_v21 = vor.u32 %v6925_v37, %v5658_v33  ;;  %v6368_v37 = vld [vmem:[#allocation14 + $0x4d0] sm:$0xf] }
 0x174   :  { %2567 = vmatpush.bf16.msra.mxu3 %v5745_v47  ;;  %v5665_v47 = vor.u32 %v6928_v44, %v5664_v16  ;;  %v5864_v44 = vld [vmem:[#allocation14 + $0xe0] sm:$0xf] }
 0x177   :  { %v1835_v58 = vpop.f32.mrf.mxu2  ;;  %v1848_v27 = vpop.f32.mrf.mxu3 }
 0x178   :  { %v5749_v58 = vor.u32 %v6946_v22, %v5746_v24  ;;  %v6943_v27 = vld [vmem:[#allocation13 + $0xcc] sm:$0xf0]  ;;  %v5669_v22 = vor.u32 %v6926_v18, %v5666_v19  ;;  %v2309_v24 = vld [vmem:[%s7768_s1] sm:$0xff]  ;;  %v6980_v18 = vld [vmem:[#allocation14 + $0xf8] sm:$0xf0] }
 0x179   :  { %v5721_v30 = vor.u32 %v6943_v27, %v5720_v26 }
 0x17a   :  { %2580 = vmatpush.bf16.msrb.mxu0 %v5749_v58 }
 0x17b   :  { %2542 = vmatpush.bf16.msra.mxu1 %v5721_v30  ;;  %v6921_v30 = vld [vmem:[#allocation13 + $0x24] sm:$0xf] }
 0x186   :  { %v1859_v34 = vpop.f32.mrf.mxu0 }
 0x187   :  { %v1860_v35 = vadd.f32 %v1859_v34, %v1847_v32  ;;  %v5725_v32 = vor.u32 %v6941_v28, %v5722_v29  ;;  %v5728_v34 = vld [vmem:[#allocation13 + $0xc8] sm:$0xf]  ;;  %v5640_v28 = vld [vmem:[#allocation13 + $0x20] sm:$0xf]  ;;  %v6923_v29 = vld [vmem:[#allocation13 + $0x2c] sm:$0xf0] }
 0x188   :  { %v1872_v59 = vpop.f32.mrf.mxu1 }
 0x189   :  { %v1873_v38 = vadd.f32 %v1872_v59, %v1860_v35  ;;  %v6944_v59 = vld [vmem:[#allocation13 + $0xd4] sm:$0xf0]  ;;  %v6942_v35 = vld [vmem:[#allocation13 + $0xcc] sm:$0xf]  ;;  %2555 = vmatpush.bf16.msra.mxu2 %v5725_v32  ;;  %v5641_v32 = vor.u32 %v6923_v29, %v5640_v28  ;;  %v6088_v28 = vld [vmem:[#allocation14 + $0x2a0] sm:$0xf]  ;;  %v5865_v29 = vor.u32 %v6980_v18, %v5864_v44 }
 0x18a   :  { %v6424_v44 = vld [vmem:[#allocation14 + $0x540] sm:$0xf]  ;;  %v7120_v18 = vld [vmem:[#allocation14 + $0x558] sm:$0xf0] }
 0x18e   :  { %v1885_v23 = vpop.f32.mrf.mxu2  ;;  %v1861_v14 = vpop.f32.mrf.mxu0 }
 0x18f   :  { %v1886_v39 = vadd.f32 %v1885_v23, %v1873_v38  ;;  %v1898_v40 = vpop.f32.mrf.mxu3  ;;  %v5729_v38 = vor.u32 %v6944_v59, %v5728_v34  ;;  %v5730_v23 = vld [vmem:[#allocation13 + $0xd8] sm:$0xf0]  ;;  %v5642_v34 = vld [vmem:[#allocation13 + $0x30] sm:$0xf0]  ;;  %v5648_v59 = vld [vmem:[#allocation13 + $0x28] sm:$0xf] }
 0x190   :  { %v1874_v41 = vpop.f32.mrf.mxu1  ;;  %v5733_v14 = vor.u32 %v6942_v35, %v5730_v23  ;;  %v6924_v35 = vld [vmem:[#allocation13 + $0x34] sm:$0xf0] }
 0x191   :  { %v1899_v42 = vadd.f32 %v1898_v40, %v1886_v39  ;;  %v5704_v39 = vld [vmem:[#allocation13 + $0xa0] sm:$0xf]  ;;  %v6939_v40 = vld [vmem:[#allocation13 + $0xac] sm:$0xf0]  ;;  %v6937_v41 = vld [vmem:[#allocation13 + $0xa4] sm:$0xf]  ;;  %2568 = vmatpush.bf16.msra.mxu3 %v5729_v38  ;;  %v5645_v38 = vor.u32 %v6921_v30, %v5642_v34  ;;  %v5649_v23 = vor.u32 %v6924_v35, %v5648_v59 }
 0x192   :  { %2581 = vmatpush.bf16.msrb.mxu0 %v5733_v14  ;;  %v7036_v30 = vld [vmem:[#allocation14 + $0x2b8] sm:$0xf0]  ;;  %v5836_v35 = vld [vmem:[#allocation14 + $0xa8] sm:$0xf] }
 0x193   :  { %v1905_v45 = vmax.f32 %v1899_v42, 0.0  ;;  %v5706_v42 = vld [vmem:[#allocation13 + $0xb0] sm:$0xf0]  ;;  %v7092_v34 = vld [vmem:[#allocation14 + $0x478] sm:$0xf0] }
 0x195   :  { %v1909_v46 = vpack.c.bf16 %v1905_v45, %v1905_v45  ;;  %v5712_v45 = vld [vmem:[#allocation13 + $0xa8] sm:$0xf] }
 0x196   :  { %v1887_v48 = vpop.f32.mrf.mxu2 }
 0x197   :  { %v1900_v49 = vpop.f32.mrf.mxu3  ;;  %2217 = vmatmul.bf16.vlgmr.msrb.gmra.mxu3 %v1909_v46  ;;  %v5705_v46 = vor.u32 %v6939_v40, %v5704_v39  ;;  %v6940_v48 = vld [vmem:[#allocation13 + $0xb4] sm:$0xf0]  ;;  %v6922_v39 = vld [vmem:[#allocation13 + $0x2c] sm:$0xf]  ;;  %v5650_v40 = vld [vmem:[#allocation13 + $0x38] sm:$0xf0] }
 0x198   :  { %v6938_v49 = vld [vmem:[#allocation13 + $0xac] sm:$0xf]  ;;  %v5653_v14 = vor.u32 %v6922_v39, %v5650_v40  ;;  %v7141_v39 = vld [vmem:[#allocation14 + $0x600] sm:$0xf0]  ;;  %v6089_v40 = vor.u32 %v7036_v30, %v6088_v28  ;;  %v6200_v28 = vld [vmem:[#allocation14 + $0x380] sm:$0xf] }
 0x199   :  { %2543 = vmatpush.bf16.msra.mxu1 %v5705_v46  ;;  %v5632_v46 = vld [vmem:[#allocation13 + $0x8] sm:$0xf]  ;;  %v7054_v30 = vld [vmem:[#allocation14 + $0x34c] sm:$0xf] }
 0x1a6   :  { %v2179_v50 = vpop.f32.mrf.mxu0 }
 0x1a7   :  { %v2180_v52 = vadd.f32 %v7195_v51, %v2179_v50  ;;  %v5714_v50 = vld [vmem:[#allocation13 + $0xb8] sm:$0xf0]  ;;  %v5713_v51 = vor.u32 %v6940_v48, %v5712_v45  ;;  %v5626_v45 = vld [vmem:[#allocation13 + $0x10] sm:$0xf0]  ;;  %v6920_v48 = vld [vmem:[#allocation13 + $0x14] sm:$0xf0] }
 0x1a9   :  { %2569 = vmatpush.bf16.msra.mxu3 %v5713_v51  ;;  %v5634_v51 = vld [vmem:[#allocation13 + $0x18] sm:$0xf0] }
 0x1ac   :  { %v2192_v53 = vpop.f32.mrf.mxu1 }
 0x1ad   :  { %v2193_v54 = vadd.f32 %v2192_v53, %v2180_v52  ;;  %v5688_v52 = vld [vmem:[#allocation13 + $0x80] sm:$0xf]  ;;  %v6935_v53 = vld [vmem:[#allocation13 + $0x8c] sm:$0xf0]  ;;  %2570 = vmatpush.bf16.msra.mxu3 %v5697_v62  ;;  %v6172_v62 = vld [vmem:[#allocation14 + $0x348] sm:$0xf] }
 0x1ae   :  { %v2181_v43 = vpop.f32.mrf.mxu0  ;;  %v5689_v60 = vor.u32 %v6935_v53, %v5688_v52  ;;  %v5948_v53 = vld [vmem:[#allocation14 + $0x188] sm:$0xf] }
 0x1af   :  { %v5709_v43 = vor.u32 %v6937_v41, %v5706_v42  ;;  %v6919_v41 = vld [vmem:[#allocation13 + $0xc] sm:$0xf0]  ;;  %v6917_v42 = vld [vmem:[#allocation13 + $0x4] sm:$0xf] }
 0x1b0   :  { %2544 = vmatpush.bf16.msra.mxu1 %v5689_v60  ;;  %v6592_v60 = vld [vmem:[#allocation14 + $0x690] sm:$0xf] }
 0x1b1   :  { %2556 = vmatpush.bf16.msra.mxu2 %v5709_v43  ;;  %v6918_v43 = vld [vmem:[#allocation13 + $0xc] sm:$0xf] }
 0x1b2   :  { %v5637_v52 = vor.u32 %v6918_v43, %v5634_v51  ;;  %v7198_v43 = vld [vmem:[%s7775_s8] ss:$0 sm:$0xff]  ;;  %v6480_v51 = vld [vmem:[#allocation14 + $0x5b0] sm:$0xf] }
 0x1b4   :  { %v2194_v55 = vpop.f32.mrf.mxu1 }
 0x1b5   :  { %v5717_v55 = vor.u32 %v6938_v49, %v5714_v50  ;;  %v5629_v49 = vor.u32 %v6917_v42, %v5626_v45  ;;  %v5633_v50 = vor.u32 %v6920_v48, %v5632_v46  ;;  %v7029_v42 = vld [vmem:[#allocation14 + $0x280] sm:$0xf0] }
 0x1b6   :  { %v7085_v45 = vld [vmem:[#allocation14 + $0x440] sm:$0xf0] }
 0x1b7   :  { %2582 = vmatpush.bf16.msrb.mxu0 %v5717_v55  ;;  %v6620_v55 = vld [vmem:[#allocation14 + $0x6c8] sm:$0xf]  ;;  %v7197_v46 = vld [vmem:[%s7775_s8 + $0x1] ss:$0 sm:$0xff] }
 0x1f0   :  { %v2205_v61 = vpop.f32.mrf.mxu2 }
 0x1f1   :  { %v2206_v1 = vadd.f32 %v2205_v61, %v2193_v54  ;;  %v6933_v54 = vld [vmem:[#allocation13 + $0x84] sm:$0xf] }
 0x1f2   :  { %v5693_v61 = vor.u32 %v6933_v54, %v5690_v25  ;;  %v7001_v54 = vld [vmem:[#allocation14 + $0x1a0] sm:$0xf0] }
 0x1f3   :  { %v5949_v25 = vor.u32 %v7001_v54, %v5948_v53 }
 0x1f4   :  { %2557 = vmatpush.bf16.msra.mxu2 %v5693_v61  ;;  %v7162_v61 = vld [vmem:[#allocation14 + $0x6a8] sm:$0xf0] }
 0x1f8   :  { %v2207_v63 = vpop.f32.mrf.mxu2 }
 0x1f9   :  { %v5672_v63 = vld [vmem:[#allocation13 + $0x60] sm:$0xf] }
 0x21a   :  { %v2218_v2 = vpop.f32.mrf.mxu3 }
 0x21b   :  { %v2219_v3 = vadd.f32 %v2218_v2, %v2206_v1  ;;  %v6929_v1 = vld [vmem:[#allocation13 + $0x64] sm:$0xf]  ;;  %v5701_v2 = vor.u32 %v6934_v8, %v5698_v9  ;;  %v6994_v8 = vld [vmem:[#allocation14 + $0x168] sm:$0xf0]  ;;  %v6621_v9 = vor.u32 %v7169_v56, %v6620_v55  ;;  %v6032_v55 = vld [vmem:[#allocation14 + $0x230] sm:$0xf] }
 0x21c   :  { %v7022_v56 = vld [vmem:[#allocation14 + $0x248] sm:$0xf0] }
 0x21d   :  { %v2222_v4 = vmax.f32 %v2219_v3, 0.0  ;;  %v5674_v3 = vld [vmem:[#allocation13 + $0x70] sm:$0xf0]  ;;  %2583 = vmatpush.bf16.msrb.mxu0 %v5701_v2  ;;  %v7113_v2 = vld [vmem:[#allocation14 + $0x520] sm:$0xf0] }
 0x21f   :  { %v2223_v5 = vpack.c.bf16 %v2222_v4, %v2222_v4  ;;  %v5680_v4 = vld [vmem:[#allocation13 + $0x68] sm:$0xf] }
 0x221   :  { %2300 = vmatmul.bf16.vlgmr.msra.gmra.mxu0 %v2223_v5  ;;  %v6932_v5 = vld [vmem:[#allocation13 + $0x74] sm:$0xf0] }
 0x222   :  { %v2220_v17 = vpop.f32.mrf.mxu3 }
 0x223   :  { %v6930_v17 = vld [vmem:[#allocation13 + $0x6c] sm:$0xf] }
 0x29e   :  { %v2301_v7 = vpop.f32.mrf.mxu0 }
 0x29f   :  { %v7688_v10 = vadd.f32 %v7196_v6, %v2301_v7  ;;  %v5682_v6 = vld [vmem:[#allocation13 + $0x78] sm:$0xf0]  ;;  %v5673_v7 = vor.u32 %v6931_v0, %v5672_v63  ;;  %v5921_v63 = vor.u32 %v6994_v8, %v5920_v57  ;;  %v7057_v0 = vld [vmem:[#allocation14 + $0x360] sm:$0xf0]  ;;  %v6256_v57 = vld [vmem:[#allocation14 + $0x3f0] sm:$0xf] }
 0x2a0   :  { %v5685_v13 = vor.u32 %v6930_v17, %v5682_v6  ;;  %v5892_v17 = vld [vmem:[#allocation14 + $0x118] sm:$0xf]  ;;  %v6987_v6 = vld [vmem:[#allocation14 + $0x130] sm:$0xf0]  ;;  %v7078_v8 = vld [vmem:[#allocation14 + $0x408] sm:$0xf0] }
 0x2a1   :  { %v2306_v11 = vmul.f32 0.5, %v7688_v10  ;;  %2305 = vst [vmem:[#allocation17] sm:$0xff] %v7688_v10  ;;  %2545 = vmatpush.bf16.msra.mxu1 %v5673_v7  ;;  %v6564_v7 = vld [vmem:[#allocation14 + $0x658] sm:$0xf]  ;;  %v5893_v33 = vor.u32 %v6987_v6, %v5892_v17  ;;  %v6257_v17 = vor.u32 %v7078_v8, %v6256_v57 }
 0x2a2   :  { %2584 = vmatpush.bf16.msrb.mxu0 %v5685_v13  ;;  %v7106_v13 = vld [vmem:[#allocation14 + $0x4e8] sm:$0xf0]  ;;  %v6004_v6 = vld [vmem:[#allocation14 + $0x1f8] sm:$0xf] }
 0x2a3   :  { %v2307_v31 = vmul.f32 1.442695, %v2306_v11  ;;  %v5677_v11 = vor.u32 %v6929_v1, %v5674_v3  ;;  %v6396_v1 = vld [vmem:[#allocation14 + $0x508] sm:$0xf]  ;;  %v6593_v3 = vor.u32 %v7162_v61, %v6592_v60  ;;  %v6369_v16 = vor.u32 %v7106_v13, %v6368_v37  ;;  %v5752_v13 = vld [vmem:[#allocation14] sm:$0xf] }
 0x2a5   :  { %7200 = vpow2.f32 %v2307_v31  ;;  %v5681_v31 = vor.u32 %v6932_v5, %v5680_v4  ;;  %2558 = vmatpush.bf16.msra.mxu2 %v5677_v11  ;;  %v6173_v4 = vor.u32 %v7057_v0, %v6172_v62  ;;  %v6397_v5 = vor.u32 %v7113_v2, %v6396_v1  ;;  %v7155_v11 = vld [vmem:[#allocation14 + $0x670] sm:$0xf0]  ;;  %v5780_v62 = vld [vmem:[#allocation14 + $0x38] sm:$0xf]  ;;  %v7199_v1 = vld [vmem:[%s7776_s9] ss:$0 sm:$0xff] }
 0x2a6   :  { %v2303_v15 = vpop.f32.mrf.mxu0  ;;  %2585 = vmatpush.bf16.msrb.mxu0 %v5669_v22  ;;  %v6565_v19 = vor.u32 %v7155_v11, %v6564_v7  ;;  %v6536_v22 = vld [vmem:[#allocation14 + $0x620] sm:$0xf] }
 0x2a7   :  { %v5656_v15 = vld [vmem:[#allocation13 + $0x40] sm:$0xf]  ;;  %2571 = vmatpush.bf16.msra.mxu3 %v5681_v31  ;;  %v6144_v31 = vld [vmem:[#allocation14 + $0x310] sm:$0xf] }
 0x2a9   :  { %2559 = vmatpush.bf16.msra.mxu2 %v5661_v21  ;;  %v7043_v21 = vld [vmem:[#allocation14 + $0x2f0] sm:$0xf0] }
 0x2aa   :  { %2586 = vmatpush.bf16.msrb.mxu0 %v5653_v14 }
 0x2ab   :  { %v7201_v12 = vpop.eup %7200  ;;  %2572 = vmatpush.bf16.msra.mxu3 %v5665_v47  ;;  %v6340_v47 = vld [vmem:[#allocation14 + $0x498] sm:$0xf] }
 0x2ac   :  { %2311 = vrot.lane.b32.xlu0 %v7201_v12, %s7498_s3  ;;  %v6927_v12 = vld [vmem:[#allocation13 + $0x4c] sm:$0xf0] }
 0x2ad   :  { %v5657_v20 = vor.u32 %v6927_v12, %v5656_v15  ;;  %2560 = vmatpush.bf16.msra.mxu2 %v5645_v38  ;;  %v7050_v15 = vld [vmem:[#allocation14 + $0x328] sm:$0xf0]  ;;  %v6973_v38 = vld [vmem:[#allocation14 + $0xc0] sm:$0xf0] }
 0x2ae   :  { %2587 = vmatpush.bf16.msrb.mxu0 %v5637_v52  ;;  %v6145_v12 = vor.u32 %v7050_v15, %v6144_v31  ;;  %v7134_v52 = vld [vmem:[#allocation14 + $0x5c8] sm:$0xf0]  ;;  %v7015_v31 = vld [vmem:[#allocation14 + $0x210] sm:$0xf0]  ;;  %v6228_v15 = vld [vmem:[#allocation14 + $0x3b8] sm:$0xf] }
 0x2af   :  { %2546 = vmatpush.bf16.msra.mxu1 %v5657_v20  ;;  %2573 = vmatpush.bf16.msra.mxu3 %v5649_v23  ;;  %v6116_v20 = vld [vmem:[#allocation14 + $0x2d8] sm:$0xf]  ;;  %v6508_v23 = vld [vmem:[#allocation14 + $0x5e8] sm:$0xf]  ;;  %v6481_v61 = vor.u32 %v7134_v52, %v6480_v51  ;;  %v6370_v51 = vld [vmem:[#allocation14 + $0x4ec] sm:$0xf0] }
 0x2b0   :  { %v6509_v48 = vor.u32 %v7141_v39, %v6508_v23  ;;  %v6398_v23 = vld [vmem:[#allocation14 + $0x524] sm:$0xf0] }
 0x2b1   :  { %2561 = vmatpush.bf16.msra.mxu2 %v5629_v49  ;;  %v5808_v49 = vld [vmem:[#allocation14 + $0x70] sm:$0xf] }
 0x2b2   :  { %4064 = vmatpush.bf16.msra.mxu0 %v6621_v9 }
 0x2b3   :  { %2547 = vmatpush.bf16.msra.mxu1 %v5641_v32  ;;  %2574 = vmatpush.bf16.msra.mxu3 %v5633_v50  ;;  %v6312_v32 = vld [vmem:[#allocation14 + $0x460] sm:$0xf]  ;;  %v6966_v50 = vld [vmem:[#allocation14 + $0x88] sm:$0xf0] }
 0x2b4   :  { %v6313_v14 = vor.u32 %v7092_v34, %v6312_v32 }
 0x2b5   :  { %4038 = vmatpush.bf16.msrb.mxu2 %v6173_v4  ;;  %v7127_v4 = vld [vmem:[#allocation14 + $0x590] sm:$0xf0] }
 0x2b6   :  { %4065 = vmatpush.bf16.msra.mxu0 %v6593_v3  ;;  %v6452_v3 = vld [vmem:[#allocation14 + $0x578] sm:$0xf] }
 0x2b7   :  { %4051 = vmatpush.bf16.msrb.mxu3 %v6397_v5  ;;  %v6033_v5 = vor.u32 %v7022_v56, %v6032_v55  ;;  %v6453_v37 = vor.u32 %v7127_v4, %v6452_v3  ;;  %v5894_v55 = vld [vmem:[#allocation14 + $0x134] sm:$0xf0]  ;;  %v7145_v3 = vld [vmem:[#allocation14 + $0x624] sm:$0xf]  ;;  %v6538_v4 = vld [vmem:[#allocation14 + $0x63c] sm:$0xf0] }
 0x2b8   :  { %v6566_v56 = vld [vmem:[#allocation14 + $0x674] sm:$0xf0] }
 0x2b9   :  { %4039 = vmatpush.bf16.msrb.mxu2 %v6145_v12  ;;  %v7071_v12 = vld [vmem:[#allocation14 + $0x3d0] sm:$0xf0] }
 0x2ba   :  { %4066 = vmatpush.bf16.msra.mxu0 %v6565_v19  ;;  %v6998_v19 = vld [vmem:[#allocation14 + $0x18c] sm:$0xf] }
 0x2bb   :  { %4052 = vmatpush.bf16.msrb.mxu3 %v6369_v16 }
 0x31e   :  { %v2312_v26 = vpop.permute.xlu0 %2311 }
 0x31f   :  { %v2314_v58 = vmul.f32 %v2312_v26, %v2309_v24  ;;  %v7148_v24 = vld [vmem:[#allocation14 + $0x638] sm:$0xf0]  ;;  %v7099_v26 = vld [vmem:[#allocation14 + $0x4b0] sm:$0xf0] }
 0x320   :  { %v6537_v59 = vor.u32 %v7148_v24, %v6536_v22  ;;  %v6005_v22 = vor.u32 %v7015_v31, %v6004_v6  ;;  %v6229_v24 = vor.u32 %v7071_v12, %v6228_v15  ;;  %v7033_v6 = vld [vmem:[#allocation14 + $0x2a4] sm:$0xf]  ;;  %v6314_v31 = vld [vmem:[#allocation14 + $0x47c] sm:$0xf0]  ;;  %v6541_v12 = vor.u32 %v7145_v3, %v6538_v4 }
 0x321   :  { %v2315_v27 = vadd.f32 %v2314_v58, %v7688_v10  ;;  %v5624_v10 = vld [vmem:[#allocation13] sm:$0xf]  ;;  %v6117_v58 = vor.u32 %v7043_v21, %v6116_v20  ;;  %v5950_v20 = vld [vmem:[#allocation14 + $0x1a4] sm:$0xf0]  ;;  %v7166_v21 = vld [vmem:[#allocation14 + $0x6cc] sm:$0xf] }
 0x322   :  { %4067 = vmatpush.bf16.msra.mxu0 %v6537_v59  ;;  %v6425_v59 = vor.u32 %v7120_v18, %v6424_v44  ;;  %v5953_v39 = vor.u32 %v6998_v19, %v5950_v20 }
 0x323   :  { %2326 = vperm.xlu1 %7193, %v2315_v27   ;;  %2319 = vperm.xlu0 %7192, %v2315_v27   ;;  %v6341_v27 = vor.u32 %v7099_v26, %v6340_v47  ;;  %v6622_v47 = vld [vmem:[#allocation14 + $0x6e4] sm:$0xf0] }
 0x324   :  { %4040 = vmatpush.bf16.msrb.mxu2 %v6117_v58  ;;  %v5976_v58 = vld [vmem:[#allocation14 + $0x1c0] sm:$0xf] }
 0x325   :  { %4053 = vmatpush.bf16.msrb.mxu3 %v6341_v27  ;;  %v7008_v27 = vld [vmem:[#allocation14 + $0x1d8] sm:$0xf0] }
 0x326   :  { %4068 = vmatpush.bf16.msra.mxu0 %v6509_v48 }
 0x328   :  { %4041 = vmatpush.bf16.msrb.mxu2 %v6089_v40  ;;  %v6625_v40 = vor.u32 %v7166_v21, %v6622_v47  ;;  %v6963_v21 = vld [vmem:[#allocation14 + $0x74] sm:$0xf]  ;;  %v5810_v47 = vld [vmem:[#allocation14 + $0x8c] sm:$0xf0] }
 0x329   :  { %4054 = vmatpush.bf16.msrb.mxu3 %v6313_v14  ;;  %v6991_v14 = vld [vmem:[#allocation14 + $0x154] sm:$0xf] }
 0x32a   :  { %4069 = vmatpush.bf16.msra.mxu0 %v6481_v61  ;;  %v7096_v61 = vld [vmem:[#allocation14 + $0x49c] sm:$0xf] }
 0x32b   :  { %7194 = vset.pattern.permute.xlu0 %v7499_v36  ;;  %v5625_v36 = vor.u32 %v6919_v41, %v5624_v10  ;;  %v6060_v10 = vld [vmem:[#allocation14 + $0x268] sm:$0xf]  ;;  %v5837_v41 = vor.u32 %v6973_v38, %v5836_v35  ;;  %v7110_v38 = vld [vmem:[#allocation14 + $0x50c] sm:$0xf] }
 0x32c   :  { %v6061_v53 = vor.u32 %v7029_v42, %v6060_v10  ;;  %v6174_v35 = vld [vmem:[#allocation14 + $0x364] sm:$0xf0]  ;;  %v5922_v10 = vld [vmem:[#allocation14 + $0x16c] sm:$0xf0]  ;;  %v6401_v48 = vor.u32 %v7110_v38, %v6398_v23  ;;  %v7124_v23 = vld [vmem:[#allocation14 + $0x57c] sm:$0xf] }
 0x32d   :  { %2548 = vmatpush.bf16.msra.mxu1 %v5625_v36  ;;  %v6284_v36 = vld [vmem:[#allocation14 + $0x428] sm:$0xf]  ;;  %v6594_v42 = vld [vmem:[#allocation14 + $0x6ac] sm:$0xf0]  ;;  %v5925_v52 = vor.u32 %v6991_v14, %v5922_v10  ;;  %v7019_v14 = vld [vmem:[#allocation14 + $0x234] sm:$0xf] }
 0x32e   :  { %v6285_v54 = vor.u32 %v7085_v45, %v6284_v36  ;;  %4042 = vmatpush.bf16.msrb.mxu2 %v6061_v53  ;;  %4070 = vmatpush.bf16.msra.mxu0 %v6453_v37  ;;  %v5977_v36 = vor.u32 %v7008_v27, %v5976_v58  ;;  %v6970_v37 = vld [vmem:[#allocation14 + $0xac] sm:$0xf]  ;;  %v6034_v10 = vld [vmem:[#allocation14 + $0x24c] sm:$0xf0] }
 0x32f   :  { %v7026_v27 = vld [vmem:[#allocation14 + $0x26c] sm:$0xf] }
 0x330   :  { %4055 = vmatpush.bf16.msrb.mxu3 %v6285_v54  ;;  %v6984_v54 = vld [vmem:[#allocation14 + $0x11c] sm:$0xf] }
 0x331   :  { %4025 = vmatpush.bf16.msrb.mxu1 %v5949_v25  ;;  %v5809_v25 = vor.u32 %v6966_v50, %v5808_v49  ;;  %v7047_v49 = vld [vmem:[#allocation14 + $0x314] sm:$0xf]  ;;  %v6146_v50 = vld [vmem:[#allocation14 + $0x32c] sm:$0xf0] }
 0x332   :  { %4043 = vmatpush.bf16.msrb.mxu2 %v6033_v5  ;;  %4071 = vmatpush.bf16.msra.mxu0 %v6425_v59  ;;  %v6149_v57 = vor.u32 %v7047_v49, %v6146_v50  ;;  %v6956_v59 = vld [vmem:[#allocation14 + $0x3c] sm:$0xf]  ;;  %v7117_v49 = vld [vmem:[#allocation14 + $0x544] sm:$0xf] }
 0x334   :  { %4056 = vmatpush.bf16.msrb.mxu3 %v6257_v17 }
 0x335   :  { %4026 = vmatpush.bf16.msrb.mxu1 %v5921_v63  ;;  %v6959_v63 = vld [vmem:[#allocation14 + $0x50] sm:$0xf0] }
 0x336   :  { %v5781_v11 = vor.u32 %v6959_v63, %v5780_v62  ;;  %4044 = vmatpush.bf16.msrb.mxu2 %v6005_v22  ;;  %v6342_v62 = vld [vmem:[#allocation14 + $0x4b4] sm:$0xf0]  ;;  %v5897_v63 = vor.u32 %v6984_v54, %v5894_v55  ;;  %v7131_v22 = vld [vmem:[#allocation14 + $0x5b4] sm:$0xf]  ;;  %v7068_v54 = vld [vmem:[#allocation14 + $0x3bc] sm:$0xf] }
 0x337   :  { %v6345_v17 = vor.u32 %v7096_v61, %v6342_v62  ;;  %v6202_v61 = vld [vmem:[#allocation14 + $0x39c] sm:$0xf0] }
 0x338   :  { %4057 = vmatpush.bf16.msrb.mxu3 %v6229_v24  ;;  %v6482_v24 = vld [vmem:[#allocation14 + $0x5cc] sm:$0xf0] }
 0x339   :  { %4027 = vmatpush.bf16.msrb.mxu1 %v5893_v33  ;;  %v6952_v33 = vld [vmem:[#allocation14 + $0x18] sm:$0xf0]  ;;  %v6485_v58 = vor.u32 %v7131_v22, %v6482_v24 }
 0x33a   :  { %v5753_v34 = vor.u32 %v6952_v33, %v5752_v13  ;;  %4045 = vmatpush.bf16.msrb.mxu2 %v5977_v36  ;;  %v5838_v13 = vld [vmem:[#allocation14 + $0xc4] sm:$0xf0]  ;;  %v7138_v33 = vld [vmem:[#allocation14 + $0x5ec] sm:$0xf]  ;;  %v6258_v36 = vld [vmem:[#allocation14 + $0x40c] sm:$0xf0] }
 0x33b   :  { %v5841_v19 = vor.u32 %v6970_v37, %v5838_v13 }
 0x33d   :  { %4028 = vmatpush.bf16.msrb.mxu1 %v5865_v29  ;;  %v7064_v29 = vld [vmem:[#allocation14 + $0x398] sm:$0xf0] }
 0x33e   :  { %v6201_v45 = vor.u32 %v7064_v29, %v6200_v28  ;;  %v6062_v28 = vld [vmem:[#allocation14 + $0x284] sm:$0xf0]  ;;  %v7082_v29 = vld [vmem:[#allocation14 + $0x42c] sm:$0xf] }
 0x340   :  { %4058 = vmatpush.bf16.msrb.mxu3 %v6201_v45 }
 0x341   :  { %4029 = vmatpush.bf16.msrb.mxu1 %v5837_v41  ;;  %v7159_v41 = vld [vmem:[#allocation14 + $0x694] sm:$0xf] }
 0x342   :  { %v6597_v53 = vor.u32 %v7159_v41, %v6594_v42  ;;  %v7075_v41 = vld [vmem:[#allocation14 + $0x3f4] sm:$0xf]  ;;  %v6037_v42 = vor.u32 %v7019_v14, %v6034_v10  ;;  %v6572_v14 = vld [vmem:[#allocation14 + $0x660] sm:$0xf]  ;;  %v7156_v10 = vld [vmem:[#allocation14 + $0x678] sm:$0xf0] }
 0x343   :  { %v6261_v45 = vor.u32 %v7075_v41, %v6258_v36  ;;  %v6152_v36 = vld [vmem:[#allocation14 + $0x318] sm:$0xf] }
 0x345   :  { %4030 = vmatpush.bf16.msrb.mxu1 %v5809_v25  ;;  %v7152_v25 = vld [vmem:[#allocation14 + $0x65c] sm:$0xf] }
 0x349   :  { %4031 = vmatpush.bf16.msrb.mxu1 %v5781_v11  ;;  %v7089_v11 = vld [vmem:[#allocation14 + $0x464] sm:$0xf] }
 0x34a   :  { %v6317_v18 = vor.u32 %v7089_v11, %v6314_v31  ;;  %v7170_v11 = vld [vmem:[#allocation14 + $0x6e8] sm:$0xf0] }
 0x34d   :  { %4032 = vmatpush.bf16.msrb.mxu1 %v5753_v34 }
 0x395   :  { %v2327_v9 = vpop.permute.xlu1 %2326  ;;  %v2320_v60 = vpop.permute.xlu0 %2319 }
 0x396   :  { %v2330_v0 = vmul.f32 %v7197_v46, %v2327_v9  ;;  %v2323_v2 = vmul.f32 %v7198_v43, %v2320_v60  ;;  %v6177_v46 = vor.u32 %v7054_v30, %v6174_v35  ;;  %v7103_v43 = vld [vmem:[#allocation14 + $0x4d4] sm:$0xf]  ;;  %v7040_v9 = vld [vmem:[#allocation14 + $0x2dc] sm:$0xf]  ;;  %v6118_v60 = vld [vmem:[#allocation14 + $0x2f4] sm:$0xf0]  ;;  %v6065_v30 = vor.u32 %v7026_v27, %v6062_v28 }
 0x397   :  { %v6373_v8 = vor.u32 %v7103_v43, %v6370_v51  ;;  %v6121_v5 = vor.u32 %v7040_v9, %v6118_v60  ;;  %v5782_v35 = vld [vmem:[#allocation14 + $0x54] sm:$0xf0]  ;;  %v6426_v43 = vld [vmem:[#allocation14 + $0x55c] sm:$0xf0]  ;;  %v7061_v60 = vld [vmem:[#allocation14 + $0x384] sm:$0xf] }
 0x398   :  { %v2331_v7 = vadd.f32 %v2330_v0, %v2323_v2  ;;  %v6569_v0 = vor.u32 %v7152_v25, %v6566_v56  ;;  %v5866_v2 = vld [vmem:[#allocation14 + $0xfc] sm:$0xf0]  ;;  %v5785_v38 = vor.u32 %v6956_v59, %v5782_v35  ;;  %v6429_v51 = vor.u32 %v7117_v49, %v6426_v43  ;;  %v6230_v25 = vld [vmem:[#allocation14 + $0x3d4] sm:$0xf0] }
 0x399   :  { %v6233_v56 = vor.u32 %v7068_v54, %v6230_v25  ;;  %v6205_v62 = vor.u32 %v7061_v60, %v6202_v61  ;;  %v6376_v49 = vld [vmem:[#allocation14 + $0x4d8] sm:$0xf]  ;;  %v6573_v43 = vor.u32 %v7156_v10, %v6572_v14  ;;  %v7149_v25 = vld [vmem:[#allocation14 + $0x640] sm:$0xf0]  ;;  %v6348_v61 = vld [vmem:[#allocation14 + $0x4a0] sm:$0xf] }
 0x39a   :  { %v2336_v16 = vadd.f32 %v7199_v1, %v2331_v7  ;;  %v6977_v1 = vld [vmem:[#allocation14 + $0xe4] sm:$0xf]  ;;  %v6090_v7 = vld [vmem:[#allocation14 + $0x2bc] sm:$0xf0]  ;;  %v6432_v10 = vld [vmem:[#allocation14 + $0x548] sm:$0xf] }
 0x39b   :  { %v5869_v15 = vor.u32 %v6977_v1, %v5866_v2  ;;  %v6093_v44 = vor.u32 %v7033_v6, %v6090_v7  ;;  %v6628_v7 = vld [vmem:[#allocation14 + $0x6d0] sm:$0xf]  ;;  %v6953_v14 = vld [vmem:[#allocation14 + $0x20] sm:$0xf0] }
 0x39c   :  { %v2337_v26 = vmax.f32 %v2336_v16, 0.0  ;;  %v6510_v16 = vld [vmem:[#allocation14 + $0x604] sm:$0xf0] }
 0x39d   :  { %v6513_v20 = vor.u32 %v7138_v33, %v6510_v16  ;;  %v6629_v16 = vor.u32 %v7170_v11, %v6628_v7  ;;  %v6320_v11 = vld [vmem:[#allocation14 + $0x468] sm:$0xf] }
 0x39e   :  { %v2338_v32 = vpack.c.bf16 %v2337_v26, %v2337_v26  ;;  %v5813_v26 = vor.u32 %v6963_v21, %v5810_v47  ;;  %v6600_v21 = vld [vmem:[#allocation14 + $0x698] sm:$0xf]  ;;  %v7163_v47 = vld [vmem:[#allocation14 + $0x6b0] sm:$0xf0] }
 0x39f   :  { %v6601_v35 = vor.u32 %v7163_v47, %v6600_v21  ;;  %v7030_v21 = vld [vmem:[#allocation14 + $0x288] sm:$0xf0] }
 0x3a0   :  { %2549 = vmatmul.bf16.vlgmr.msra.gmra.mxu1 %v2338_v32  ;;  %2562 = vmatmul.bf16.vlgmr.msra.gmra.mxu2 %v2338_v32 }
 0x3a1   :  { %2575 = vmatmul.bf16.vlgmr.msra.gmra.mxu3 %v2338_v32  ;;  %2588 = vmatmul.bf16.vlgmr.msrb.gmra.mxu0 %v2338_v32  ;;  %v6286_v32 = vld [vmem:[#allocation14 + $0x444] sm:$0xf0] }
 0x3a2   :  { %4077 = vmatpush.bf16.msra.mxu1 %v5953_v39  ;;  %4116 = vmatpush.bf16.msrb.mxu0 %v6625_v40  ;;  %v6289_v34 = vor.u32 %v7082_v29, %v6286_v32  ;;  %v6454_v39 = vld [vmem:[#allocation14 + $0x594] sm:$0xf0]  ;;  %v7114_v32 = vld [vmem:[#allocation14 + $0x528] sm:$0xf0] }
 0x3a3   :  { %4090 = vmatpush.bf16.msra.mxu2 %v6177_v46  ;;  %4103 = vmatpush.bf16.msra.mxu3 %v6401_v48  ;;  %v6457_v40 = vor.u32 %v7124_v23, %v6454_v39  ;;  %v6949_v46 = vld [vmem:[#allocation14 + $0x4] sm:$0xf]  ;;  %v5754_v48 = vld [vmem:[#allocation14 + $0x1c] sm:$0xf0]  ;;  %v6988_v23 = vld [vmem:[#allocation14 + $0x138] sm:$0xf0] }
 0x3a4   :  { %v5757_v50 = vor.u32 %v6949_v46, %v5754_v48 }
 0x3a6   :  { %4078 = vmatpush.bf16.msra.mxu1 %v5925_v52  ;;  %4117 = vmatpush.bf16.msrb.mxu0 %v6597_v53  ;;  %v7012_v52 = vld [vmem:[#allocation14 + $0x1fc] sm:$0xf]  ;;  %v6006_v53 = vld [vmem:[#allocation14 + $0x214] sm:$0xf0] }
 0x3a7   :  { %4091 = vmatpush.bf16.msra.mxu2 %v6149_v57  ;;  %4104 = vmatpush.bf16.msra.mxu3 %v6373_v8  ;;  %v6009_v55 = vor.u32 %v7012_v52, %v6006_v53  ;;  %v7005_v57 = vld [vmem:[#allocation14 + $0x1c4] sm:$0xf]  ;;  %v5978_v8 = vld [vmem:[#allocation14 + $0x1dc] sm:$0xf0] }
 0x3a8   :  { %v5981_v9 = vor.u32 %v7005_v57, %v5978_v8  ;;  %v6981_v52 = vld [vmem:[#allocation14 + $0x100] sm:$0xf0]  ;;  %v6124_v8 = vld [vmem:[#allocation14 + $0x2e0] sm:$0xf] }
 0x3aa   :  { %4079 = vmatpush.bf16.msra.mxu1 %v5897_v63  ;;  %4118 = vmatpush.bf16.msrb.mxu0 %v6569_v0  ;;  %v2371_v63 = vld [vmem:[%s7778_s11] sm:$0xf] }
 0x3ab   :  { %4092 = vmatpush.bf16.msra.mxu2 %v6121_v5  ;;  %4105 = vmatpush.bf16.msra.mxu3 %v6345_v17  ;;  %v2373_v0 = vperm.slane %v2371_v63, 0  ;;  %v2376_v1 = vperm.slane %v2371_v63, 3  ;;  %v5956_v5 = vld [vmem:[#allocation14 + $0x190] sm:$0xf]  ;;  %v7002_v17 = vld [vmem:[#allocation14 + $0x1a8] sm:$0xf0] }
 0x3ac   :  { %v2375_v37 = vperm.slane %v2371_v63, 2  ;;  %v5957_v13 = vor.u32 %v7002_v17, %v5956_v5  ;;  %v6096_v17 = vld [vmem:[#allocation14 + $0x2a8] sm:$0xf] }
 0x3ae   :  { %4080 = vmatpush.bf16.msra.mxu1 %v5869_v15  ;;  %4119 = vmatpush.bf16.msrb.mxu0 %v6541_v12  ;;  %v2374_v15 = vperm.slane %v2371_v63, 1 }
 0x3af   :  { %4093 = vmatpush.bf16.msra.mxu2 %v6093_v44  ;;  %4106 = vmatpush.bf16.msra.mxu3 %v6317_v18  ;;  %v5928_v44 = vld [vmem:[#allocation14 + $0x158] sm:$0xf]  ;;  %v6995_v18 = vld [vmem:[#allocation14 + $0x170] sm:$0xf0] }
 0x3b0   :  { %v5929_v29 = vor.u32 %v6995_v18, %v5928_v44  ;;  %v7135_v44 = vld [vmem:[#allocation14 + $0x5d0] sm:$0xf0] }
 0x3b2   :  { %4081 = vmatpush.bf16.msra.mxu1 %v5841_v19  ;;  %4120 = vmatpush.bf16.msrb.mxu0 %v6513_v20 }
 0x3b3   :  { %4094 = vmatpush.bf16.msra.mxu2 %v6065_v30  ;;  %4107 = vmatpush.bf16.msra.mxu3 %v6289_v34  ;;  %v6404_v30 = vld [vmem:[#allocation14 + $0x510] sm:$0xf] }
 0x3b6   :  { %4082 = vmatpush.bf16.msra.mxu1 %v5813_v26  ;;  %4121 = vmatpush.bf16.msrb.mxu0 %v6485_v58  ;;  %v6180_v26 = vld [vmem:[#allocation14 + $0x350] sm:$0xf]  ;;  %v7058_v58 = vld [vmem:[#allocation14 + $0x368] sm:$0xf0] }
 0x3b7   :  { %4095 = vmatpush.bf16.msra.mxu2 %v6037_v42  ;;  %4108 = vmatpush.bf16.msra.mxu3 %v6261_v45  ;;  %v6405_v42 = vor.u32 %v7114_v32, %v6404_v30  ;;  %v7051_v45 = vld [vmem:[#allocation14 + $0x330] sm:$0xf0]  ;;  %v7128_v30 = vld [vmem:[#allocation14 + $0x598] sm:$0xf0] }
 0x3b8   :  { %v6153_v54 = vor.u32 %v7051_v45, %v6152_v36  ;;  %v6999_v45 = vld [vmem:[#allocation14 + $0x194] sm:$0xf] }
 0x3ba   :  { %4083 = vmatpush.bf16.msra.mxu1 %v5785_v38  ;;  %4122 = vmatpush.bf16.msrb.mxu0 %v6457_v40  ;;  %v5900_v38 = vld [vmem:[#allocation14 + $0x120] sm:$0xf]  ;;  %v6181_v40 = vor.u32 %v7058_v58, %v6180_v26 }
 0x3bb   :  { %4096 = vmatpush.bf16.msra.mxu2 %v6009_v55  ;;  %4109 = vmatpush.bf16.msra.mxu3 %v6233_v56  ;;  %v5901_v48 = vor.u32 %v6988_v23, %v5900_v38  ;;  %v6544_v55 = vld [vmem:[#allocation14 + $0x628] sm:$0xf]  ;;  %v5788_v58 = vld [vmem:[#allocation14 + $0x40] sm:$0xf]  ;;  %v6264_v38 = vld [vmem:[#allocation14 + $0x3f8] sm:$0xf] }
 0x3bc   :  { %v6545_v63 = vor.u32 %v7149_v25, %v6544_v55  ;;  %v7079_v23 = vld [vmem:[#allocation14 + $0x410] sm:$0xf0]  ;;  %v7072_v55 = vld [vmem:[#allocation14 + $0x3d8] sm:$0xf0] }
 0x3be   :  { %4084 = vmatpush.bf16.msra.mxu1 %v5757_v50  ;;  %4123 = vmatpush.bf16.msrb.mxu0 %v6429_v51  ;;  %v7107_v50 = vld [vmem:[#allocation14 + $0x4f0] sm:$0xf0]  ;;  %v5872_v51 = vld [vmem:[#allocation14 + $0xe8] sm:$0xf] }
 0x3bf   :  { %4097 = vmatpush.bf16.msra.mxu2 %v5981_v9  ;;  %4110 = vmatpush.bf16.msra.mxu3 %v6205_v62  ;;  %v6377_v57 = vor.u32 %v7107_v50, %v6376_v49  ;;  %v7044_v9 = vld [vmem:[#allocation14 + $0x2f8] sm:$0xf0]  ;;  %v5873_v60 = vor.u32 %v6981_v52, %v5872_v51  ;;  %v7167_v49 = vld [vmem:[#allocation14 + $0x6d4] sm:$0xf]  ;;  %v6265_v50 = vor.u32 %v7079_v23, %v6264_v38  ;;  %v6012_v51 = vld [vmem:[#allocation14 + $0x200] sm:$0xf] }
 0x3c0   :  { %v7100_v62 = vld [vmem:[#allocation14 + $0x4b8] sm:$0xf0]  ;;  %v7097_v38 = vld [vmem:[#allocation14 + $0x4a4] sm:$0xf]  ;;  %v6350_v23 = vld [vmem:[#allocation14 + $0x4bc] sm:$0xf0] }
 0x3c1   :  { %v6349_v5 = vor.u32 %v7100_v62, %v6348_v61  ;;  %v7016_v52 = vld [vmem:[#allocation14 + $0x218] sm:$0xf0]  ;;  %v6602_v62 = vld [vmem:[#allocation14 + $0x6b4] sm:$0xf0] }
 0x3c2   :  { %v7160_v61 = vld [vmem:[#allocation14 + $0x69c] sm:$0xf] }
 0x41d   :  { %v2550_v2 = vpop.f32.mrf.mxu1 }
 0x41e   :  { %v2551_v3 = vadd.f32 %v2550_v2, %v2373_v0  ;;  %v2589_v4 = vpop.f32.mrf.mxu0  ;;  %v5844_v0 = vld [vmem:[#allocation14 + $0xb0] sm:$0xf]  ;;  %v6125_v2 = vor.u32 %v7044_v9, %v6124_v8  ;;  %v6013_v9 = vor.u32 %v7016_v52, %v6012_v51  ;;  %v6322_v51 = vld [vmem:[#allocation14 + $0x484] sm:$0xf0] }
 0x41f   :  { %v2590_v6 = vadd.f32 %v2589_v4, %v2376_v1  ;;  %v6974_v1 = vld [vmem:[#allocation14 + $0xc8] sm:$0xf0] }
 0x420   :  { %v2593_v31 = vmax.f32 %v2551_v3, 0.0  ;;  %v6516_v3 = vld [vmem:[#allocation14 + $0x5f0] sm:$0xf]  ;;  %v7142_v4 = vld [vmem:[#allocation14 + $0x608] sm:$0xf0]  ;;  %v5845_v7 = vor.u32 %v6974_v1, %v5844_v0 }
 0x421   :  { %v2596_v12 = vmax.f32 %v2590_v6, 0.0  ;;  %v7037_v6 = vld [vmem:[#allocation14 + $0x2c0] sm:$0xf0]  ;;  %v5984_v0 = vld [vmem:[#allocation14 + $0x1c8] sm:$0xf] }
 0x422   :  { %v7710_v33 = vpack.c.bf16 %v2593_v31, %v2593_v31  ;;  %v7093_v31 = vld [vmem:[#allocation14 + $0x480] sm:$0xf0] }
 0x423   :  { %v7712_v19 = vpack.c.bf16 %v2596_v12, %v2596_v12  ;;  %v2563_v20 = vpop.f32.mrf.mxu2  ;;  %v5816_v12 = vld [vmem:[#allocation14 + $0x78] sm:$0xf]  ;;  %v6321_v18 = vor.u32 %v7093_v31, %v6320_v11  ;;  %v7009_v1 = vld [vmem:[#allocation14 + $0x1e0] sm:$0xf0]  ;;  %v6605_v11 = vor.u32 %v7160_v61, %v6602_v62  ;;  %v7083_v61 = vld [vmem:[#allocation14 + $0x434] sm:$0xf] }
 0x424   :  { %v2564_v22 = vadd.f32 %v2563_v20, %v2374_v15  ;;  %v2576_v24 = vpop.f32.mrf.mxu3  ;;  %4033 = vmatmul.bf16.vlgmr.msrb.gmra.mxu1 %v7710_v33  ;;  %v6517_v15 = vor.u32 %v7142_v4, %v6516_v3  ;;  %v6068_v20 = vld [vmem:[#allocation14 + $0x270] sm:$0xf]  ;;  %v7065_v3 = vld [vmem:[#allocation14 + $0x3a0] sm:$0xf0]  ;;  %v7055_v4 = vld [vmem:[#allocation14 + $0x354] sm:$0xf]  ;;  %v5985_v31 = vor.u32 %v7009_v1, %v5984_v0 }
 0x425   :  { %v2577_v27 = vadd.f32 %v2576_v24, %v2375_v37  ;;  %4072 = vmatmul.bf16.vlgmr.msra.gmra.mxu0 %v7712_v19  ;;  %4129 = vmatpush.bf16.msrb.mxu1 %v5957_v13  ;;  %v2552_v28 = vpop.f32.mrf.mxu1  ;;  %v6967_v37 = vld [vmem:[#allocation14 + $0x90] sm:$0xf0]  ;;  %v6097_v13 = vor.u32 %v7037_v6, %v6096_v17  ;;  %v7086_v24 = vld [vmem:[#allocation14 + $0x448] sm:$0xf0]  ;;  %v6294_v62 = vld [vmem:[#allocation14 + $0x44c] sm:$0xf0] }
 0x426   :  { %v2594_v34 = vmax.f32 %v2564_v22, 0.0  ;;  %4168 = vmatpush.bf16.msra.mxu0 %v6629_v16  ;;  %v2591_v59 = vpop.f32.mrf.mxu0  ;;  %v6488_v16 = vld [vmem:[#allocation14 + $0x5b8] sm:$0xf]  ;;  %v5817_v47 = vor.u32 %v6967_v37, %v5816_v12  ;;  %v6292_v22 = vld [vmem:[#allocation14 + $0x430] sm:$0xf]  ;;  %v6069_v28 = vor.u32 %v7030_v21, %v6068_v20 }
 0x427   :  { %v2595_v39 = vmax.f32 %v2577_v27, 0.0  ;;  %v6489_v26 = vor.u32 %v7135_v44, %v6488_v16  ;;  %v6960_v27 = vld [vmem:[#allocation14 + $0x58] sm:$0xf0]  ;;  %v6293_v32 = vor.u32 %v7086_v24, %v6292_v22  ;;  %v7023_v59 = vld [vmem:[#allocation14 + $0x250] sm:$0xf0] }
 0x428   :  { %v7716_v41 = vpack.c.bf16 %v2594_v34, %v2594_v34  ;;  %v6040_v34 = vld [vmem:[#allocation14 + $0x238] sm:$0xf]  ;;  %v7111_v6 = vld [vmem:[#allocation14 + $0x514] sm:$0xf]  ;;  %v5902_v12 = vld [vmem:[#allocation14 + $0x13c] sm:$0xf0] }
 0x429   :  { %v7718_v46 = vpack.c.bf16 %v2595_v39, %v2595_v39  ;;  %4130 = vmatpush.bf16.msrb.mxu1 %v5929_v29  ;;  %v6460_v29 = vld [vmem:[#allocation14 + $0x580] sm:$0xf]  ;;  %v5760_v39 = vld [vmem:[#allocation14 + $0x8] sm:$0xf]  ;;  %v6041_v36 = vor.u32 %v7023_v59, %v6040_v34  ;;  %v7153_v16 = vld [vmem:[#allocation14 + $0x664] sm:$0xf] }
 0x42a   :  { %4169 = vmatpush.bf16.msra.mxu0 %v6601_v35  ;;  %4046 = vmatmul.bf16.vlgmr.msrb.gmra.mxu2 %v7716_v41  ;;  %v5789_v35 = vor.u32 %v6960_v27, %v5788_v58  ;;  %v6574_v44 = vld [vmem:[#allocation14 + $0x67c] sm:$0xf0]  ;;  %v7048_v20 = vld [vmem:[#allocation14 + $0x31c] sm:$0xf]  ;;  %v6154_v21 = vld [vmem:[#allocation14 + $0x334] sm:$0xf0] }
 0x42b   :  { %4059 = vmatmul.bf16.vlgmr.msrb.gmra.mxu3 %v7718_v46  ;;  %4142 = vmatpush.bf16.msrb.mxu2 %v6181_v40  ;;  %v2565_v53 = vpop.f32.mrf.mxu2  ;;  %v6461_v40 = vor.u32 %v7128_v30, %v6460_v29  ;;  %v7104_v22 = vld [vmem:[#allocation14 + $0x4dc] sm:$0xf]  ;;  %v6378_v24 = vld [vmem:[#allocation14 + $0x4f4] sm:$0xf0]  ;;  %v6978_v58 = vld [vmem:[#allocation14 + $0xec] sm:$0xf] }
 0x42c   :  { %4155 = vmatpush.bf16.msrb.mxu3 %v6405_v42  ;;  %v2578_v56 = vpop.f32.mrf.mxu3  ;;  %v7121_v42 = vld [vmem:[#allocation14 + $0x560] sm:$0xf0]  ;;  %v5761_v53 = vor.u32 %v6953_v14, %v5760_v39  ;;  %v5874_v27 = vld [vmem:[#allocation14 + $0x104] sm:$0xf0]  ;;  %v7146_v29 = vld [vmem:[#allocation14 + $0x62c] sm:$0xf] }
 0x42d   :  { %4131 = vmatpush.bf16.msrb.mxu1 %v5901_v48  ;;  %v5958_v48 = vld [vmem:[#allocation14 + $0x1ac] sm:$0xf0]  ;;  %v6433_v25 = vor.u32 %v7121_v42, %v6432_v10  ;;  %v6546_v30 = vld [vmem:[#allocation14 + $0x644] sm:$0xf0]  ;;  %v7041_v34 = vld [vmem:[#allocation14 + $0x2e4] sm:$0xf] }
 0x42e   :  { %4170 = vmatpush.bf16.msra.mxu0 %v6573_v43  ;;  %v6630_v43 = vld [vmem:[#allocation14 + $0x6ec] sm:$0xf0]  ;;  %v5961_v56 = vor.u32 %v6999_v45, %v5958_v48  ;;  %v6126_v59 = vld [vmem:[#allocation14 + $0x2fc] sm:$0xf0]  ;;  %v6549_v39 = vor.u32 %v7146_v29, %v6546_v30  ;;  %v7139_v42 = vld [vmem:[#allocation14 + $0x5f4] sm:$0xf]  ;;  %v6353_v45 = vor.u32 %v7097_v38, %v6350_v23 }
 0x42f   :  { %4143 = vmatpush.bf16.msrb.mxu2 %v6153_v54  ;;  %v6236_v54 = vld [vmem:[#allocation14 + $0x3c0] sm:$0xf]  ;;  %v6633_v8 = vor.u32 %v7167_v49, %v6630_v43  ;;  %v5846_v14 = vld [vmem:[#allocation14 + $0xcc] sm:$0xf0]  ;;  %v6129_v10 = vor.u32 %v7041_v34, %v6126_v59  ;;  %v7034_v48 = vld [vmem:[#allocation14 + $0x2ac] sm:$0xf] }
 0x430   :  { %4156 = vmatpush.bf16.msrb.mxu3 %v6377_v57  ;;  %v6992_v57 = vld [vmem:[#allocation14 + $0x15c] sm:$0xf]  ;;  %v6098_v49 = vld [vmem:[#allocation14 + $0x2c4] sm:$0xf0]  ;;  %v7090_v43 = vld [vmem:[#allocation14 + $0x46c] sm:$0xf] }
 0x431   :  { %4132 = vmatpush.bf16.msrb.mxu1 %v5873_v60  ;;  %v5930_v60 = vld [vmem:[#allocation14 + $0x174] sm:$0xf0]  ;;  %v6957_v0 = vld [vmem:[#allocation14 + $0x44] sm:$0xf]  ;;  %v5790_v1 = vld [vmem:[#allocation14 + $0x5c] sm:$0xf0] }
 0x432   :  { %4171 = vmatpush.bf16.msra.mxu0 %v6545_v63  ;;  %v6237_v63 = vor.u32 %v7072_v55, %v6236_v54  ;;  %v5933_v17 = vor.u32 %v6992_v57, %v5930_v60  ;;  %v5818_v54 = vld [vmem:[#allocation14 + $0x94] sm:$0xf0]  ;;  %v6101_v55 = vor.u32 %v7034_v48, %v6098_v49  ;;  %v6325_v57 = vor.u32 %v7090_v43, %v6322_v51  ;;  %v6608_v38 = vld [vmem:[#allocation14 + $0x6a0] sm:$0xf]  ;;  %v7164_v23 = vld [vmem:[#allocation14 + $0x6b8] sm:$0xf0] }
 0x433   :  { %4144 = vmatpush.bf16.msrb.mxu2 %v6125_v2  ;;  %v6208_v2 = vld [vmem:[#allocation14 + $0x388] sm:$0xf]  ;;  %v6412_v49 = vld [vmem:[#allocation14 + $0x518] sm:$0xf]  ;;  %v6609_v43 = vor.u32 %v7164_v23, %v6608_v38  ;;  %v7087_v23 = vld [vmem:[#allocation14 + $0x450] sm:$0xf0] }
 0x434   :  { %4157 = vmatpush.bf16.msrb.mxu3 %v6349_v5  ;;  %4085 = vmatmul.bf16.vlgmr.msra.gmra.mxu1 %v7710_v33  ;;  %v6182_v5 = vld [vmem:[#allocation14 + $0x36c] sm:$0xf0]  ;;  %v6209_v37 = vor.u32 %v7065_v3, %v6208_v2  ;;  %v7125_v3 = vld [vmem:[#allocation14 + $0x584] sm:$0xf]  ;;  %v6300_v38 = vld [vmem:[#allocation14 + $0x438] sm:$0xf] }
 0x435   :  { %4124 = vmatmul.bf16.vlgmr.msrb.gmra.mxu0 %v7712_v19  ;;  %4133 = vmatpush.bf16.msrb.mxu1 %v5845_v7  ;;  %v6406_v7 = vld [vmem:[#allocation14 + $0x52c] sm:$0xf0] }
 0x436   :  { %4172 = vmatpush.bf16.msra.mxu0 %v6517_v15  ;;  %v6985_v15 = vld [vmem:[#allocation14 + $0x124] sm:$0xf] }
 0x437   :  { %4145 = vmatpush.bf16.msrb.mxu2 %v6097_v13  ;;  %v6185_v13 = vor.u32 %v7055_v4, %v6182_v5  ;;  %v6462_v4 = vld [vmem:[#allocation14 + $0x59c] sm:$0xf0]  ;;  %v6297_v5 = vor.u32 %v7083_v61, %v6294_v62  ;;  %v7108_v62 = vld [vmem:[#allocation14 + $0x4f8] sm:$0xf0] }
 0x438   :  { %4158 = vmatpush.bf16.msrb.mxu3 %v6321_v18  ;;  %v6409_v18 = vor.u32 %v7111_v6, %v6406_v7  ;;  %v6042_v6 = vld [vmem:[#allocation14 + $0x254] sm:$0xf0]  ;;  %v5793_v7 = vor.u32 %v6957_v0, %v5790_v1  ;;  %v6384_v61 = vld [vmem:[#allocation14 + $0x4e0] sm:$0xf]  ;;  %v5880_v0 = vld [vmem:[#allocation14 + $0xf0] sm:$0xf] }
 0x439   :  { %4134 = vmatpush.bf16.msrb.mxu1 %v5817_v47  ;;  %v5905_v47 = vor.u32 %v6985_v15, %v5902_v12  ;;  %v6950_v15 = vld [vmem:[#allocation14 + $0xc] sm:$0xf]  ;;  %v6465_v12 = vor.u32 %v7125_v3, %v6462_v4  ;;  %v6552_v3 = vld [vmem:[#allocation14 + $0x630] sm:$0xf] }
 0x43a   :  { %4173 = vmatpush.bf16.msra.mxu0 %v6489_v26  ;;  %4098 = vmatmul.bf16.vlgmr.msra.gmra.mxu2 %v7716_v41  ;;  %v6577_v26 = vor.u32 %v7153_v16, %v6574_v44  ;;  %v6434_v16 = vld [vmem:[#allocation14 + $0x564] sm:$0xf0]  ;;  %v6982_v1 = vld [vmem:[#allocation14 + $0x108] sm:$0xf0] }
 0x43b   :  { %4111 = vmatmul.bf16.vlgmr.msra.gmra.mxu3 %v7718_v46  ;;  %4146 = vmatpush.bf16.msrb.mxu2 %v6069_v28  ;;  %v6157_v28 = vor.u32 %v7048_v20, %v6154_v21  ;;  %v7003_v20 = vld [vmem:[#allocation14 + $0x1b0] sm:$0xf0]  ;;  %v6636_v21 = vld [vmem:[#allocation14 + $0x6d8] sm:$0xf]  ;;  %v7150_v4 = vld [vmem:[#allocation14 + $0x648] sm:$0xf0] }
 0x43c   :  { %4159 = vmatpush.bf16.msrb.mxu3 %v6293_v32  ;;  %v6381_v32 = vor.u32 %v7104_v22, %v6378_v24  ;;  %v7171_v22 = vld [vmem:[#allocation14 + $0x6f0] sm:$0xf0]  ;;  %v7013_v24 = vld [vmem:[#allocation14 + $0x204] sm:$0xf] }
 0x43d   :  { %4135 = vmatpush.bf16.msrb.mxu1 %v5789_v35  ;;  %v5877_v35 = vor.u32 %v6978_v58, %v5874_v27  ;;  %v7069_v27 = vld [vmem:[#allocation14 + $0x3c4] sm:$0xf]  ;;  %v6637_v34 = vor.u32 %v7171_v22, %v6636_v21  ;;  %v7038_v21 = vld [vmem:[#allocation14 + $0x2c8] sm:$0xf0]  ;;  %v6328_v22 = vld [vmem:[#allocation14 + $0x470] sm:$0xf] }
 0x43e   :  { %4174 = vmatpush.bf16.msra.mxu0 %v6461_v40  ;;  %v6971_v40 = vld [vmem:[#allocation14 + $0xb4] sm:$0xf] }
 0x43f   :  { %4147 = vmatpush.bf16.msrb.mxu2 %v6041_v36  ;;  %v6518_v36 = vld [vmem:[#allocation14 + $0x60c] sm:$0xf0] }
 0x440   :  { %4160 = vmatpush.bf16.msrb.mxu3 %v6265_v50  ;;  %v5849_v50 = vor.u32 %v6971_v40, %v5846_v14  ;;  %v6521_v52 = vor.u32 %v7139_v42, %v6518_v36  ;;  %v7006_v40 = vld [vmem:[#allocation14 + $0x1cc] sm:$0xf]  ;;  %v5986_v14 = vld [vmem:[#allocation14 + $0x1e4] sm:$0xf0]  ;;  %v6188_v36 = vld [vmem:[#allocation14 + $0x358] sm:$0xf] }
 0x441   :  { %4136 = vmatpush.bf16.msrb.mxu1 %v5761_v53  ;;  %v6964_v53 = vld [vmem:[#allocation14 + $0x7c] sm:$0xf]  ;;  %v6210_v42 = vld [vmem:[#allocation14 + $0x3a4] sm:$0xf0]  ;;  %v5989_v51 = vor.u32 %v7006_v40, %v5986_v14  ;;  %v6961_v14 = vld [vmem:[#allocation14 + $0x60] sm:$0xf0] }
 0x442   :  { %4175 = vmatpush.bf16.msra.mxu0 %v6433_v25  ;;  %v7132_v25 = vld [vmem:[#allocation14 + $0x5bc] sm:$0xf]  ;;  %v5821_v60 = vor.u32 %v6964_v53, %v5818_v54  ;;  %v6989_v53 = vld [vmem:[#allocation14 + $0x140] sm:$0xf0]  ;;  %v5796_v40 = vld [vmem:[#allocation14 + $0x48] sm:$0xf] }
 0x443   :  { %4148 = vmatpush.bf16.msrb.mxu2 %v6013_v9  ;;  %v6070_v9 = vld [vmem:[#allocation14 + $0x28c] sm:$0xf0] }
 0x444   :  { %4161 = vmatpush.bf16.msrb.mxu3 %v6237_v63  ;;  %4137 = vmatmul.bf16.vlgmr.msrb.gmra.mxu1 %v7710_v33 }
 0x445   :  { %4181 = vmatpush.bf16.msra.mxu1 %v5961_v56  ;;  %4176 = vmatmul.bf16.vlgmr.msra.gmra.mxu0 %v7712_v19  ;;  %v6490_v56 = vld [vmem:[#allocation14 + $0x5d4] sm:$0xf0] }
 0x446   :  { %4220 = vmatpush.bf16.msrb.mxu0 %v6633_v8  ;;  %v7027_v8 = vld [vmem:[#allocation14 + $0x274] sm:$0xf]  ;;  %v6493_v63 = vor.u32 %v7132_v25, %v6490_v56  ;;  %v6580_v25 = vld [vmem:[#allocation14 + $0x668] sm:$0xf]  ;;  %v7157_v56 = vld [vmem:[#allocation14 + $0x680] sm:$0xf0] }
 0x447   :  { %4149 = vmatpush.bf16.msrb.mxu2 %v5985_v31  ;;  %v6073_v2 = vor.u32 %v7027_v8, %v6070_v9  ;;  %v6266_v31 = vld [vmem:[#allocation14 + $0x414] sm:$0xf0]  ;;  %v6160_v8 = vld [vmem:[#allocation14 + $0x320] sm:$0xf]  ;;  %v7052_v9 = vld [vmem:[#allocation14 + $0x338] sm:$0xf0] }
 0x448   :  { %4162 = vmatpush.bf16.msrb.mxu3 %v6209_v37  ;;  %v5762_v37 = vld [vmem:[#allocation14 + $0x24] sm:$0xf0] }
 0x449   :  { %4182 = vmatpush.bf16.msra.mxu1 %v5933_v17  ;;  %v7020_v17 = vld [vmem:[#allocation14 + $0x23c] sm:$0xf]  ;;  %v5765_v58 = vor.u32 %v6950_v15, %v5762_v37  ;;  %v6553_v15 = vor.u32 %v7150_v4, %v6552_v3  ;;  %v6975_v37 = vld [vmem:[#allocation14 + $0xd0] sm:$0xf0] }
 0x44a   :  { %4221 = vmatpush.bf16.msrb.mxu0 %v6605_v11  ;;  %4150 = vmatmul.bf16.vlgmr.msrb.gmra.mxu2 %v7716_v41  ;;  %v7076_v11 = vld [vmem:[#allocation14 + $0x3fc] sm:$0xf]  ;;  %v6045_v44 = vor.u32 %v7020_v17, %v6042_v6  ;;  %v6132_v17 = vld [vmem:[#allocation14 + $0x2e8] sm:$0xf]  ;;  %v7045_v6 = vld [vmem:[#allocation14 + $0x300] sm:$0xf0] }
 0x44b   :  { %4194 = vmatpush.bf16.msra.mxu2 %v6185_v13  ;;  %4163 = vmatmul.bf16.vlgmr.msrb.gmra.mxu3 %v7718_v46  ;;  %v7118_v13 = vld [vmem:[#allocation14 + $0x54c] sm:$0xf] }
 0x44c   :  { %4207 = vmatpush.bf16.msra.mxu3 %v6409_v18  ;;  %v5964_v18 = vld [vmem:[#allocation14 + $0x198] sm:$0xf]  ;;  %v6437_v29 = vor.u32 %v7118_v13, %v6434_v16  ;;  %v6133_v13 = vor.u32 %v7045_v6, %v6132_v17 }
 0x44d   :  { %4183 = vmatpush.bf16.msra.mxu1 %v5905_v47  ;;  %v6269_v47 = vor.u32 %v7076_v11, %v6266_v31  ;;  %v5965_v30 = vor.u32 %v7003_v20, %v5964_v18  ;;  %v6356_v11 = vld [vmem:[#allocation14 + $0x4a8] sm:$0xf]  ;;  %v7101_v31 = vld [vmem:[#allocation14 + $0x4c0] sm:$0xf0]  ;;  %v6524_v16 = vld [vmem:[#allocation14 + $0x5f8] sm:$0xf] }
 0x44e   :  { %4222 = vmatpush.bf16.msrb.mxu0 %v6577_v26  ;;  %v6014_v26 = vld [vmem:[#allocation14 + $0x21c] sm:$0xf0]  ;;  %v6357_v18 = vor.u32 %v7101_v31, %v6356_v11  ;;  %v6104_v20 = vld [vmem:[#allocation14 + $0x2b0] sm:$0xf]  ;;  %v7161_v11 = vld [vmem:[#allocation14 + $0x6a4] sm:$0xf] }
 0x44f   :  { %4195 = vmatpush.bf16.msra.mxu2 %v6157_v28  ;;  %v6238_v28 = vld [vmem:[#allocation14 + $0x3dc] sm:$0xf0]  ;;  %v6017_v59 = vor.u32 %v7013_v24, %v6014_v26  ;;  %v7094_v24 = vld [vmem:[#allocation14 + $0x488] sm:$0xf0] }
 0x450   :  { %4208 = vmatpush.bf16.msra.mxu3 %v6381_v32  ;;  %v5936_v32 = vld [vmem:[#allocation14 + $0x160] sm:$0xf] }
 0x451   :  { %4184 = vmatpush.bf16.msra.mxu1 %v5877_v35  ;;  %v6996_v35 = vld [vmem:[#allocation14 + $0x178] sm:$0xf0]  ;;  %v6610_v31 = vld [vmem:[#allocation14 + $0x6bc] sm:$0xf0] }
 0x452   :  { %4223 = vmatpush.bf16.msrb.mxu0 %v6549_v39  ;;  %v6241_v39 = vor.u32 %v7069_v27, %v6238_v28  ;;  %v5937_v48 = vor.u32 %v6996_v35, %v5936_v32  ;;  %v6968_v27 = vld [vmem:[#allocation14 + $0x98] sm:$0xf0]  ;;  %v6105_v28 = vor.u32 %v7038_v21, %v6104_v20  ;;  %v6329_v32 = vor.u32 %v7094_v24, %v6328_v22 }
 0x453   :  { %4196 = vmatpush.bf16.msra.mxu2 %v6129_v10  ;;  %v7062_v10 = vld [vmem:[#allocation14 + $0x38c] sm:$0xf]  ;;  %v7112_v21 = vld [vmem:[#allocation14 + $0x51c] sm:$0xf]  ;;  %v6613_v22 = vor.u32 %v7161_v11, %v6610_v31  ;;  %v6302_v31 = vld [vmem:[#allocation14 + $0x454] sm:$0xf0] }
 0x454   :  { %4209 = vmatpush.bf16.msra.mxu3 %v6353_v45  ;;  %v7059_v45 = vld [vmem:[#allocation14 + $0x370] sm:$0xf0]  ;;  %v6213_v54 = vor.u32 %v7062_v10, %v6210_v42  ;;  %v6468_v42 = vld [vmem:[#allocation14 + $0x588] sm:$0xf]  ;;  %v7084_v11 = vld [vmem:[#allocation14 + $0x43c] sm:$0xf] }
 0x455   :  { %4185 = vmatpush.bf16.msra.mxu1 %v5849_v50  ;;  %v7115_v50 = vld [vmem:[#allocation14 + $0x530] sm:$0xf0] }
 0x456   :  { %4224 = vmatpush.bf16.msrb.mxu0 %v6521_v52  ;;  %v5908_v52 = vld [vmem:[#allocation14 + $0x128] sm:$0xf] }
 0x457   :  { %4197 = vmatpush.bf16.msra.mxu2 %v6101_v55  ;;  %v6189_v55 = vor.u32 %v7059_v45, %v6188_v36  ;;  %v7129_v36 = vld [vmem:[#allocation14 + $0x5a0] sm:$0xf0]  ;;  %v6301_v45 = vor.u32 %v7087_v23, %v6300_v38  ;;  %v6386_v23 = vld [vmem:[#allocation14 + $0x4fc] sm:$0xf0] }
 0x458   :  { %4210 = vmatpush.bf16.msra.mxu3 %v6325_v57  ;;  %v6413_v57 = vor.u32 %v7115_v50, %v6412_v49  ;;  %v7024_v49 = vld [vmem:[#allocation14 + $0x258] sm:$0xf0]  ;;  %v5797_v50 = vor.u32 %v6961_v14, %v5796_v40  ;;  %v7105_v38 = vld [vmem:[#allocation14 + $0x4e4] sm:$0xf]  ;;  %v6979_v40 = vld [vmem:[#allocation14 + $0xf4] sm:$0xf] }
 0x459   :  { %4186 = vmatpush.bf16.msra.mxu1 %v5821_v60  ;;  %v5909_v60 = vor.u32 %v6989_v53, %v5908_v52  ;;  %v5768_v52 = vld [vmem:[#allocation14 + $0x10] sm:$0xf]  ;;  %v6469_v53 = vor.u32 %v7129_v36, %v6468_v42  ;;  %v7147_v42 = vld [vmem:[#allocation14 + $0x634] sm:$0xf] }
 0x45a   :  { %4225 = vmatpush.bf16.msrb.mxu0 %v6493_v63  ;;  %v6581_v63 = vor.u32 %v7157_v56, %v6580_v25  ;;  %v7122_v25 = vld [vmem:[#allocation14 + $0x568] sm:$0xf0]  ;;  %v5882_v14 = vld [vmem:[#allocation14 + $0x10c] sm:$0xf0] }
 0x45b   :  { %4198 = vmatpush.bf16.msra.mxu2 %v6073_v2  ;;  %v6161_v2 = vor.u32 %v7052_v9, %v6160_v8  ;;  %v5966_v8 = vld [vmem:[#allocation14 + $0x1b4] sm:$0xf0]  ;;  %v7168_v9 = vld [vmem:[#allocation14 + $0x6dc] sm:$0xf]  ;;  %v6554_v36 = vld [vmem:[#allocation14 + $0x64c] sm:$0xf0] }
 0x45c   :  { %4211 = vmatpush.bf16.msra.mxu3 %v6297_v5  ;;  %v6385_v5 = vor.u32 %v7108_v62, %v6384_v61  ;;  %v6638_v61 = vld [vmem:[#allocation14 + $0x6f4] sm:$0xf0]  ;;  %v6020_v62 = vld [vmem:[#allocation14 + $0x208] sm:$0xf] }
 0x45d   :  { %4187 = vmatpush.bf16.msra.mxu1 %v5793_v7  ;;  %v5881_v7 = vor.u32 %v6982_v1, %v5880_v0  ;;  %v6244_v1 = vld [vmem:[#allocation14 + $0x3c8] sm:$0xf]  ;;  %v6641_v17 = vor.u32 %v7168_v9, %v6638_v61  ;;  %v6106_v9 = vld [vmem:[#allocation14 + $0x2cc] sm:$0xf0]  ;;  %v7091_v61 = vld [vmem:[#allocation14 + $0x474] sm:$0xf] }
 0x45e   :  { %4226 = vmatpush.bf16.msrb.mxu0 %v6465_v12  ;;  %v5852_v12 = vld [vmem:[#allocation14 + $0xb8] sm:$0xf] }
 0x45f   :  { %4199 = vmatpush.bf16.msra.mxu2 %v6045_v44  ;;  %v7143_v44 = vld [vmem:[#allocation14 + $0x610] sm:$0xf0] }
 0x460   :  { %4212 = vmatpush.bf16.msra.mxu3 %v6269_v47  ;;  %v5853_v47 = vor.u32 %v6975_v37, %v5852_v12  ;;  %v6525_v26 = vor.u32 %v7143_v44, %v6524_v16  ;;  %v5992_v12 = vld [vmem:[#allocation14 + $0x1d0] sm:$0xf]  ;;  %v7010_v37 = vld [vmem:[#allocation14 + $0x1e8] sm:$0xf0]  ;;  %v7056_v44 = vld [vmem:[#allocation14 + $0x35c] sm:$0xf] }
 0x461   :  { %4188 = vmatpush.bf16.msra.mxu1 %v5765_v58  ;;  %v5824_v58 = vld [vmem:[#allocation14 + $0x80] sm:$0xf]  ;;  %v7066_v16 = vld [vmem:[#allocation14 + $0x3a8] sm:$0xf0]  ;;  %v5993_v24 = vor.u32 %v7010_v37, %v5992_v12  ;;  %v5798_v37 = vld [vmem:[#allocation14 + $0x64] sm:$0xf0] }
 0x462   :  { %4227 = vmatpush.bf16.msrb.mxu0 %v6437_v29  ;;  %v6496_v29 = vld [vmem:[#allocation14 + $0x5c0] sm:$0xf]  ;;  %v5825_v35 = vor.u32 %v6968_v27, %v5824_v58  ;;  %v5910_v58 = vld [vmem:[#allocation14 + $0x144] sm:$0xf0]  ;;  %v6958_v12 = vld [vmem:[#allocation14 + $0x4c] sm:$0xf] }
 0x463   :  { %4200 = vmatpush.bf16.msra.mxu2 %v6017_v59  ;;  %v7031_v59 = vld [vmem:[#allocation14 + $0x290] sm:$0xf0] }
 0x464   :  { %4213 = vmatpush.bf16.msra.mxu3 %v6241_v39  ;;  %4189 = vmatmul.bf16.vlgmr.msra.gmra.mxu1 %v7710_v33 }
 0x465   :  { %4233 = vmatpush.bf16.msrb.mxu1 %v5965_v30  ;;  %4228 = vmatmul.bf16.vlgmr.msrb.gmra.mxu0 %v7712_v19  ;;  %v7136_v30 = vld [vmem:[#allocation14 + $0x5d8] sm:$0xf0] }
 0x466   :  { %4272 = vmatpush.bf16.msra.mxu0 %v6637_v34  ;;  %v6076_v34 = vld [vmem:[#allocation14 + $0x278] sm:$0xf]  ;;  %v6497_v39 = vor.u32 %v7136_v30, %v6496_v29  ;;  %v7154_v29 = vld [vmem:[#allocation14 + $0x66c] sm:$0xf]  ;;  %v6582_v30 = vld [vmem:[#allocation14 + $0x684] sm:$0xf0] }
 0x467   :  { %4201 = vmatpush.bf16.msra.mxu2 %v5989_v51  ;;  %v6077_v10 = vor.u32 %v7031_v59, %v6076_v34  ;;  %v7080_v51 = vld [vmem:[#allocation14 + $0x418] sm:$0xf0]  ;;  %v7049_v34 = vld [vmem:[#allocation14 + $0x324] sm:$0xf]  ;;  %v6162_v59 = vld [vmem:[#allocation14 + $0x33c] sm:$0xf0] }
 0x468   :  { %4214 = vmatpush.bf16.msra.mxu3 %v6213_v54  ;;  %v6954_v54 = vld [vmem:[#allocation14 + $0x28] sm:$0xf0] }
 0x469   :  { %4234 = vmatpush.bf16.msrb.mxu1 %v5937_v48  ;;  %v6048_v48 = vld [vmem:[#allocation14 + $0x240] sm:$0xf]  ;;  %v5769_v0 = vor.u32 %v6954_v54, %v5768_v52  ;;  %v6557_v52 = vor.u32 %v7147_v42, %v6554_v36  ;;  %v5854_v54 = vld [vmem:[#allocation14 + $0xd4] sm:$0xf0] }
 0x46a   :  { %4273 = vmatpush.bf16.msra.mxu0 %v6609_v43  ;;  %4202 = vmatmul.bf16.vlgmr.msra.gmra.mxu2 %v7716_v41  ;;  %v6272_v43 = vld [vmem:[#allocation14 + $0x400] sm:$0xf]  ;;  %v6049_v56 = vor.u32 %v7024_v49, %v6048_v48  ;;  %v7042_v48 = vld [vmem:[#allocation14 + $0x2ec] sm:$0xf]  ;;  %v6134_v49 = vld [vmem:[#allocation14 + $0x304] sm:$0xf0] }
 0x46b   :  { %4246 = vmatpush.bf16.msrb.mxu2 %v6189_v55  ;;  %4215 = vmatmul.bf16.vlgmr.msra.gmra.mxu3 %v7718_v46  ;;  %v6440_v55 = vld [vmem:[#allocation14 + $0x550] sm:$0xf] }
 0x46c   :  { %4259 = vmatpush.bf16.msrb.mxu3 %v6413_v57  ;;  %v7000_v57 = vld [vmem:[#allocation14 + $0x19c] sm:$0xf]  ;;  %v6441_v3 = vor.u32 %v7122_v25, %v6440_v55  ;;  %v6137_v55 = vor.u32 %v7042_v48, %v6134_v49 }
 0x46d   :  { %4235 = vmatpush.bf16.msrb.mxu1 %v5909_v60  ;;  %v6273_v60 = vor.u32 %v7080_v51, %v6272_v43  ;;  %v5969_v4 = vor.u32 %v7000_v57, %v5966_v8  ;;  %v7098_v43 = vld [vmem:[#allocation14 + $0x4ac] sm:$0xf]  ;;  %v6358_v51 = vld [vmem:[#allocation14 + $0x4c4] sm:$0xf0]  ;;  %v7140_v25 = vld [vmem:[#allocation14 + $0x5fc] sm:$0xf] }
 0x46e   :  { %4274 = vmatpush.bf16.msra.mxu0 %v6581_v63  ;;  %v7017_v63 = vld [vmem:[#allocation14 + $0x220] sm:$0xf0]  ;;  %v6361_v57 = vor.u32 %v7098_v43, %v6358_v51  ;;  %v7035_v8 = vld [vmem:[#allocation14 + $0x2b4] sm:$0xf]  ;;  %v6616_v43 = vld [vmem:[#allocation14 + $0x6a8] sm:$0xf] }
 0x46f   :  { %4247 = vmatpush.bf16.msrb.mxu2 %v6161_v2  ;;  %v7073_v2 = vld [vmem:[#allocation14 + $0x3e0] sm:$0xf0]  ;;  %v6021_v6 = vor.u32 %v7017_v63, %v6020_v62  ;;  %v6330_v62 = vld [vmem:[#allocation14 + $0x48c] sm:$0xf0] }
 0x470   :  { %4260 = vmatpush.bf16.msrb.mxu3 %v6385_v5  ;;  %v6993_v5 = vld [vmem:[#allocation14 + $0x164] sm:$0xf] }
 0x471   :  { %4236 = vmatpush.bf16.msrb.mxu1 %v5881_v7  ;;  %v5938_v7 = vld [vmem:[#allocation14 + $0x17c] sm:$0xf0]  ;;  %v7165_v51 = vld [vmem:[#allocation14 + $0x6c0] sm:$0xf0] }
 0x472   :  { %4275 = vmatpush.bf16.msra.mxu0 %v6553_v15  ;;  %v6245_v15 = vor.u32 %v7073_v2, %v6244_v1  ;;  %v5941_v20 = vor.u32 %v6993_v5, %v5938_v7  ;;  %v5826_v1 = vld [vmem:[#allocation14 + $0x9c] sm:$0xf0]  ;;  %v6109_v2 = vor.u32 %v7035_v8, %v6106_v9  ;;  %v6333_v5 = vor.u32 %v7091_v61, %v6330_v62 }
 0x473   :  { %4248 = vmatpush.bf16.msrb.mxu2 %v6133_v13  ;;  %v6216_v13 = vld [vmem:[#allocation14 + $0x390] sm:$0xf]  ;;  %v6420_v9 = vld [vmem:[#allocation14 + $0x520] sm:$0xf]  ;;  %v6617_v61 = vor.u32 %v7165_v51, %v6616_v43 }
 0x474   :  { %4261 = vmatpush.bf16.msrb.mxu3 %v6357_v18  ;;  %v6190_v18 = vld [vmem:[#allocation14 + $0x374] sm:$0xf0]  ;;  %v6217_v27 = vor.u32 %v7066_v16, %v6216_v13  ;;  %v7126_v16 = vld [vmem:[#allocation14 + $0x58c] sm:$0xf]  ;;  %v6084_v51 = vld [vmem:[#allocation14 + $0x280] sm:$0xf] }
 0x475   :  { %4237 = vmatpush.bf16.msrb.mxu1 %v5853_v47  ;;  %v6414_v47 = vld [vmem:[#allocation14 + $0x534] sm:$0xf0] }
 0x476   :  { %4276 = vmatpush.bf16.msra.mxu0 %v6525_v26  ;;  %v6986_v26 = vld [vmem:[#allocation14 + $0x12c] sm:$0xf] }
 0x477   :  { %4249 = vmatpush.bf16.msrb.mxu2 %v6105_v28  ;;  %v6193_v28 = vor.u32 %v7056_v44, %v6190_v18  ;;  %v6470_v44 = vld [vmem:[#allocation14 + $0x5a4] sm:$0xf0]  ;;  %v6305_v18 = vor.u32 %v7084_v11, %v6302_v31  ;;  %v7109_v31 = vld [vmem:[#allocation14 + $0x500] sm:$0xf0] }
 0x478   :  { %4262 = vmatpush.bf16.msrb.mxu3 %v6329_v32  ;;  %v6417_v32 = vor.u32 %v7112_v21, %v6414_v47  ;;  %v6050_v21 = vld [vmem:[#allocation14 + $0x25c] sm:$0xf0]  ;;  %v5801_v47 = vor.u32 %v6958_v12, %v5798_v37  ;;  %v6392_v11 = vld [vmem:[#allocation14 + $0x4e8] sm:$0xf]  ;;  %v5888_v12 = vld [vmem:[#allocation14 + $0xf8] sm:$0xf] }
 0x479   :  { %4238 = vmatpush.bf16.msrb.mxu1 %v5825_v35  ;;  %v5913_v35 = vor.u32 %v6986_v26, %v5910_v58  ;;  %v6951_v26 = vld [vmem:[#allocation14 + $0x14] sm:$0xf]  ;;  %v6473_v58 = vor.u32 %v7126_v16, %v6470_v44  ;;  %v6560_v16 = vld [vmem:[#allocation14 + $0x638] sm:$0xf] }
 0x47a   :  { %4277 = vmatpush.bf16.msra.mxu0 %v6497_v39  ;;  %v6585_v39 = vor.u32 %v7154_v29, %v6582_v30  ;;  %v6442_v29 = vld [vmem:[#allocation14 + $0x56c] sm:$0xf0]  ;;  %v6983_v37 = vld [vmem:[#allocation14 + $0x110] sm:$0xf0] }
 0x47b   :  { %4250 = vmatpush.bf16.msrb.mxu2 %v6077_v10  ;;  %v6165_v10 = vor.u32 %v7049_v34, %v6162_v59  ;;  %v7004_v34 = vld [vmem:[#allocation14 + $0x1b8] sm:$0xf0]  ;;  %v6644_v59 = vld [vmem:[#allocation14 + $0x6e0] sm:$0xf]  ;;  %v7151_v44 = vld [vmem:[#allocation14 + $0x650] sm:$0xf0] }
 0x47c   :  { %4263 = vmatpush.bf16.msrb.mxu3 %v6301_v45  ;;  %v6389_v45 = vor.u32 %v7105_v38, %v6386_v23  ;;  %v7172_v38 = vld [vmem:[#allocation14 + $0x6f8] sm:$0xf0]  ;;  %v7014_v23 = vld [vmem:[#allocation14 + $0x20c] sm:$0xf] }
 0x47d   :  { %4239 = vmatpush.bf16.msrb.mxu1 %v5797_v50  ;;  %v5885_v50 = vor.u32 %v6979_v40, %v5882_v14  ;;  %v7070_v14 = vld [vmem:[#allocation14 + $0x3cc] sm:$0xf]  ;;  %v6645_v48 = vor.u32 %v7172_v38, %v6644_v59  ;;  %v7039_v38 = vld [vmem:[#allocation14 + $0x2d0] sm:$0xf0] }
 0x47e   :  { %4278 = vmatpush.bf16.msra.mxu0 %v6469_v53  ;;  %v6972_v53 = vld [vmem:[#allocation14 + $0xbc] sm:$0xf] }
 0x47f   :  { %4251 = vmatpush.bf16.msrb.mxu2 %v6049_v56  ;;  %v6526_v56 = vld [vmem:[#allocation14 + $0x614] sm:$0xf0] }
 0x480   :  { %4264 = vmatpush.bf16.msrb.mxu3 %v6273_v60  ;;  %v5857_v60 = vor.u32 %v6972_v53, %v5854_v54  ;;  %v6529_v63 = vor.u32 %v7140_v25, %v6526_v56  ;;  %v7007_v53 = vld [vmem:[#allocation14 + $0x1d4] sm:$0xf]  ;;  %v5994_v54 = vld [vmem:[#allocation14 + $0x1ec] sm:$0xf0]  ;;  %v6196_v56 = vld [vmem:[#allocation14 + $0x360] sm:$0xf] }
 0x481   :  { %4240 = vmatpush.bf16.msrb.mxu1 %v5769_v0  ;;  %v6965_v0 = vld [vmem:[#allocation14 + $0x84] sm:$0xf]  ;;  %v6218_v25 = vld [vmem:[#allocation14 + $0x3ac] sm:$0xf0]  ;;  %v5997_v62 = vor.u32 %v7007_v53, %v5994_v54 }
 0x482   :  { %4279 = vmatpush.bf16.msra.mxu0 %v6441_v3  ;;  %v7133_v3 = vld [vmem:[#allocation14 + $0x5c4] sm:$0xf]  ;;  %v5829_v7 = vor.u32 %v6965_v0, %v5826_v1  ;;  %v6990_v0 = vld [vmem:[#allocation14 + $0x148] sm:$0xf0] }
 0x483   :  { %4252 = vmatpush.bf16.msrb.mxu2 %v6021_v6  ;;  %v6078_v6 = vld [vmem:[#allocation14 + $0x294] sm:$0xf0] }
 0x484   :  { %4265 = vmatpush.bf16.msrb.mxu3 %v6245_v15  ;;  %4241 = vmatmul.bf16.vlgmr.msrb.gmra.mxu1 %v7710_v33 }
 0x485   :  { %4285 = vmatpush.bf16.msra.mxu1 %v5969_v4  ;;  %4280 = vmatmul.bf16.vlgmr.msra.gmra.mxu0 %v7712_v19  ;;  %v6498_v4 = vld [vmem:[#allocation14 + $0x5dc] sm:$0xf0] }
 0x486   :  { %4324 = vmatpush.bf16.msrb.mxu0 %v6641_v17  ;;  %v7028_v17 = vld [vmem:[#allocation14 + $0x27c] sm:$0xf]  ;;  %v6501_v15 = vor.u32 %v7133_v3, %v6498_v4  ;;  %v6588_v3 = vld [vmem:[#allocation14 + $0x670] sm:$0xf]  ;;  %v7158_v4 = vld [vmem:[#allocation14 + $0x688] sm:$0xf0] }
 0x487   :  { %4253 = vmatpush.bf16.msrb.mxu2 %v5993_v24  ;;  %v6081_v13 = vor.u32 %v7028_v17, %v6078_v6  ;;  %v6274_v24 = vld [vmem:[#allocation14 + $0x41c] sm:$0xf0]  ;;  %v6168_v17 = vld [vmem:[#allocation14 + $0x328] sm:$0xf]  ;;  %v7053_v6 = vld [vmem:[#allocation14 + $0x340] sm:$0xf0] }
 0x488   :  { %4266 = vmatpush.bf16.msrb.mxu3 %v6217_v27  ;;  %v5770_v27 = vld [vmem:[#allocation14 + $0x2c] sm:$0xf0] }
 0x489   :  { %4286 = vmatpush.bf16.msra.mxu1 %v5941_v20  ;;  %v7021_v20 = vld [vmem:[#allocation14 + $0x244] sm:$0xf]  ;;  %v5773_v40 = vor.u32 %v6951_v26, %v5770_v27  ;;  %v7102_v26 = vld [vmem:[#allocation14 + $0x4c8] sm:$0xf0]  ;;  %v6561_v27 = vor.u32 %v7151_v44, %v6560_v16 }
 0x48a   :  { %4325 = vmatpush.bf16.msrb.mxu0 %v6613_v22  ;;  %4254 = vmatmul.bf16.vlgmr.msrb.gmra.mxu2 %v7716_v41  ;;  %v7077_v22 = vld [vmem:[#allocation14 + $0x404] sm:$0xf]  ;;  %v6053_v30 = vor.u32 %v7021_v20, %v6050_v21  ;;  %v6140_v20 = vld [vmem:[#allocation14 + $0x2f0] sm:$0xf]  ;;  %v7046_v21 = vld [vmem:[#allocation14 + $0x308] sm:$0xf0] }
 0x48b   :  { %4298 = vmatpush.bf16.msra.mxu2 %v6193_v28  ;;  %4267 = vmatmul.bf16.vlgmr.msrb.gmra.mxu3 %v7718_v46  ;;  %v7119_v28 = vld [vmem:[#allocation14 + $0x554] sm:$0xf] }
 0x48c   :  { %4311 = vmatpush.bf16.msra.mxu3 %v6417_v32  ;;  %v5972_v32 = vld [vmem:[#allocation14 + $0x1a0] sm:$0xf]  ;;  %v6445_v42 = vor.u32 %v7119_v28, %v6442_v29  ;;  %v6976_v29 = vld [vmem:[#allocation14 + $0xd8] sm:$0xf0] }
 0x48d   :  { %4287 = vmatpush.bf16.msra.mxu1 %v5913_v35  ;;  %v6277_v35 = vor.u32 %v7077_v22, %v6274_v24  ;;  %v5973_v36 = vor.u32 %v7004_v34, %v5972_v32  ;;  %v5889_v22 = vor.u32 %v6983_v37, %v5888_v12  ;;  %v6364_v24 = vld [vmem:[#allocation14 + $0x4b0] sm:$0xf]  ;;  %v5860_v28 = vld [vmem:[#allocation14 + $0xc0] sm:$0xf]  ;;  %v7144_v34 = vld [vmem:[#allocation14 + $0x618] sm:$0xf0] }
 0x48e   :  { %4326 = vmatpush.bf16.msrb.mxu0 %v6585_v39  ;;  %v6022_v39 = vld [vmem:[#allocation14 + $0x224] sm:$0xf0]  ;;  %v6532_v32 = vld [vmem:[#allocation14 + $0x600] sm:$0xf]  ;;  %v6365_v59 = vor.u32 %v7102_v26, %v6364_v24  ;;  %v6448_v37 = vld [vmem:[#allocation14 + $0x558] sm:$0xf] }
 0x48f   :  { %4299 = vmatpush.bf16.msra.mxu2 %v6165_v10  ;;  %v6246_v10 = vld [vmem:[#allocation14 + $0x3e4] sm:$0xf0]  ;;  %v6025_v49 = vor.u32 %v7014_v23, %v6022_v39  ;;  %v5861_v39 = vor.u32 %v6976_v29, %v5860_v28  ;;  %v7074_v24 = vld [vmem:[#allocation14 + $0x3e8] sm:$0xf0] }
 0x490   :  { %4312 = vmatpush.bf16.msra.mxu3 %v6389_v45  ;;  %v5944_v45 = vld [vmem:[#allocation14 + $0x168] sm:$0xf] }
 0x491   :  { %4288 = vmatpush.bf16.msra.mxu1 %v5885_v50  ;;  %v6997_v50 = vld [vmem:[#allocation14 + $0x180] sm:$0xf0] }
 0x492   :  { %4327 = vmatpush.bf16.msrb.mxu0 %v6557_v52  ;;  %v6249_v52 = vor.u32 %v7070_v14, %v6246_v10  ;;  %v5945_v8 = vor.u32 %v6997_v50, %v5944_v45  ;;  %v7747_v23 = vld [vmem:[%s7780_s13] sm:$0xff]  ;;  %v7095_v14 = vld [vmem:[#allocation14 + $0x490] sm:$0xf0]  ;;  %v6533_v10 = vor.u32 %v7144_v34, %v6532_v32  ;;  %v6000_v34 = vld [vmem:[#allocation14 + $0x1d8] sm:$0xf]  ;;  %s7501_s13 = smov [#allocation17]  }
 0x493   :  { %4300 = vmatpush.bf16.msra.mxu2 %v6137_v55  ;;  %v7063_v55 = vld [vmem:[#allocation14 + $0x394] sm:$0xf]  ;;  %v2859_v50 = vperm.slane %v7747_v23, 0  ;;  %s4545_s18 = sshll.u32 %s7501_s13, 4  ;;  %s4546_s18 = int_to_ptr.vmem [resolvable:$true] %s4545_s18 }
 0x494   :  { %4313 = vmatpush.bf16.msra.mxu3 %v6361_v57  ;;  %v7060_v57 = vld [vmem:[#allocation14 + $0x378] sm:$0xf0]  ;;  %v6221_v1 = vor.u32 %v7063_v55, %v6218_v25  ;;  %v6308_v55 = vld [vmem:[#allocation14 + $0x440] sm:$0xf]  ;;  %4550 = dma.vmem_to_hbm [thread:$0]  %s4546_s18, 128, %s4548_s4, [#allocation18]  }
 0x495   :  { %4289 = vmatpush.bf16.msra.mxu1 %v5857_v60  ;;  %v7116_v60 = vld [vmem:[#allocation14 + $0x538] sm:$0xf0] }
 0x496   :  { %4328 = vmatpush.bf16.msrb.mxu0 %v6529_v63  ;;  %v5916_v63 = vld [vmem:[#allocation14 + $0x130] sm:$0xf]  ;;  %v7088_v25 = vld [vmem:[#allocation14 + $0x458] sm:$0xf0] }
 0x497   :  { %4301 = vmatpush.bf16.msra.mxu2 %v6109_v2  ;;  %v6197_v2 = vor.u32 %v7060_v57, %v6196_v56 }
 0x498   :  { %4314 = vmatpush.bf16.msra.mxu3 %v6333_v5  ;;  %v6421_v5 = vor.u32 %v7116_v60, %v6420_v9  ;;  %v6962_v9 = vld [vmem:[#allocation14 + $0x68] sm:$0xf0] }
 0x499   :  { %4290 = vmatpush.bf16.msra.mxu1 %v5829_v7  ;;  %v5917_v7 = vor.u32 %v6990_v0, %v5916_v63  ;;  %v6309_v0 = vor.u32 %v7088_v25, %v6308_v55 }
 0x49a   :  { %4329 = vmatpush.bf16.msrb.mxu0 %v6501_v15  ;;  %v6589_v15 = vor.u32 %v7158_v4, %v6588_v3 }
 0x49b   :  { %4302 = vmatpush.bf16.msra.mxu2 %v6081_v13  ;;  %v6169_v13 = vor.u32 %v7053_v6, %v6168_v17  ;;  %v7081_v17 = vld [vmem:[#allocation14 + $0x420] sm:$0xf0] }
 0x49c   :  { %4315 = vmatpush.bf16.msra.mxu3 %v6305_v18  ;;  %v6393_v18 = vor.u32 %v7109_v31, %v6392_v11  ;;  %v5776_v31 = vld [vmem:[#allocation14 + $0x18] sm:$0xf] }
 0x49d   :  { %4291 = vmatpush.bf16.msra.mxu1 %v5801_v47 }
 0x49e   :  { %4330 = vmatpush.bf16.msrb.mxu0 %v6473_v58 }
 0x49f   :  { %4303 = vmatpush.bf16.msra.mxu2 %v6053_v30  ;;  %v6141_v30 = vor.u32 %v7046_v21, %v6140_v20  ;;  %v7018_v20 = vld [vmem:[#allocation14 + $0x228] sm:$0xf0] }
 0x4a0   :  { %4316 = vmatpush.bf16.msra.mxu3 %v6277_v35  ;;  %v6112_v35 = vld [vmem:[#allocation14 + $0x2b8] sm:$0xf] }
 0x4a1   :  { %4292 = vmatpush.bf16.msra.mxu1 %v5773_v40  ;;  %v4034_v47 = vpop.f32.mrf.mxu1  ;;  %v6336_v40 = vld [vmem:[#allocation14 + $0x478] sm:$0xf]  ;;  %v6113_v45 = vor.u32 %v7039_v38, %v6112_v35 }
 0x4a2   :  { %4331 = vmatpush.bf16.msrb.mxu0 %v6445_v42  ;;  %v7742_v58 = vpop.f32.mrf.mxu0  ;;  %v5832_v42 = vld [vmem:[#allocation14 + $0x88] sm:$0xf]  ;;  %v6337_v43 = vor.u32 %v7095_v14, %v6336_v40  ;;  %v4035_v63 = vadd.f32 %v4034_v47, %v2859_v50  ;;  %v6224_v38 = vld [vmem:[#allocation14 + $0x398] sm:$0xf] }
 0x4a3   :  { %4304 = vmatpush.bf16.msra.mxu2 %v6025_v49  ;;  %v7137_v49 = vld [vmem:[#allocation14 + $0x5e0] sm:$0xf0] }
 0x4a4   :  { %4317 = vmatpush.bf16.msra.mxu3 %v6249_v52  ;;  %4293 = vmatmul.bf16.vlgmr.msra.gmra.mxu1 %v7710_v33  ;;  %v7032_v52 = vld [vmem:[#allocation14 + $0x298] sm:$0xf0] }
 0x4a5   :  { %4337 = vmatpush.bf16.msrb.mxu1 %v5973_v36  ;;  %4332 = vmatmul.bf16.vlgmr.msrb.gmra.mxu0 %v7712_v19  ;;  %v6969_v36 = vld [vmem:[#allocation14 + $0xa0] sm:$0xf0]  ;;  %v6085_v60 = vor.u32 %v7032_v52, %v6084_v51 }
 0x4a6   :  { %4376 = vmatpush.bf16.msra.mxu0 %v6645_v48  ;;  %v6504_v48 = vld [vmem:[#allocation14 + $0x5c8] sm:$0xf]  ;;  %v5833_v54 = vor.u32 %v6969_v36, %v5832_v42 }
 0x4a7   :  { %4305 = vmatpush.bf16.msra.mxu2 %v5997_v62  ;;  %v6505_v57 = vor.u32 %v7137_v49, %v6504_v48  ;;  %v7130_v62 = vld [vmem:[#allocation14 + $0x5a8] sm:$0xf0] }
 0x4a8   :  { %4318 = vmatpush.bf16.msra.mxu3 %v6221_v1  ;;  %v6056_v1 = vld [vmem:[#allocation14 + $0x248] sm:$0xf] }
 0x4a9   :  { %4338 = vmatpush.bf16.msrb.mxu1 %v5945_v8  ;;  %v4036_v53 = vpop.f32.mrf.mxu1  ;;  %v5804_v8 = vld [vmem:[#allocation14 + $0x50] sm:$0xf] }
 0x4aa   :  { %4377 = vmatpush.bf16.msra.mxu0 %v6617_v61  ;;  %4306 = vmatmul.bf16.vlgmr.msra.gmra.mxu2 %v7716_v41  ;;  %v4075_v56 = vpop.f32.mrf.mxu0  ;;  %v6476_v61 = vld [vmem:[#allocation14 + $0x590] sm:$0xf]  ;;  %v5805_v4 = vor.u32 %v6962_v9, %v5804_v8  ;;  %v2861_v9 = vperm.slane %v7747_v23, 2 }
 0x4ab   :  { %4350 = vmatpush.bf16.msrb.mxu2 %v6197_v2  ;;  %4319 = vmatmul.bf16.vlgmr.msra.gmra.mxu3 %v7718_v46  ;;  %v7025_v2 = vld [vmem:[#allocation14 + $0x260] sm:$0xf0]  ;;  %v6477_v11 = vor.u32 %v7130_v62, %v6476_v61 }
 0x4ac   :  { %4363 = vmatpush.bf16.msrb.mxu3 %v6421_v5  ;;  %v6280_v5 = vld [vmem:[#allocation14 + $0x408] sm:$0xf]  ;;  %v6057_v12 = vor.u32 %v7025_v2, %v6056_v1 }
 0x4ad   :  { %4339 = vmatpush.bf16.msrb.mxu1 %v5917_v7  ;;  %v4047_v3 = vpop.f32.mrf.mxu2  ;;  %v6281_v44 = vor.u32 %v7081_v17, %v6280_v5 }
 0x4ae   :  { %4378 = vmatpush.bf16.msra.mxu0 %v6589_v15  ;;  %v4048_v6 = vadd.f32 %v4047_v3, %v4035_v63  ;;  %v4060_v7 = vpop.f32.mrf.mxu3  ;;  %v6955_v15 = vld [vmem:[#allocation14 + $0x30] sm:$0xf0] }
 0x4af   :  { %4351 = vmatpush.bf16.msrb.mxu2 %v6169_v13  ;;  %v7123_v13 = vld [vmem:[#allocation14 + $0x570] sm:$0xf0]  ;;  %v5777_v47 = vor.u32 %v6955_v15, %v5776_v31 }
 0x4b0   :  { %4364 = vmatpush.bf16.msrb.mxu3 %v6393_v18  ;;  %v4061_v16 = vadd.f32 %v4060_v7, %v4048_v6  ;;  %v6028_v18 = vld [vmem:[#allocation14 + $0x210] sm:$0xf]  ;;  %v6449_v28 = vor.u32 %v7123_v13, %v6448_v37 }
 0x4b1   :  { %4340 = vmatpush.bf16.msrb.mxu1 %v5889_v22  ;;  %v4086_v21 = vpop.f32.mrf.mxu1  ;;  %v6252_v22 = vld [vmem:[#allocation14 + $0x3d0] sm:$0xf]  ;;  %v6029_v29 = vor.u32 %v7018_v20, %v6028_v18 }
 0x4b2   :  { %4379 = vmatpush.bf16.msra.mxu0 %v6561_v27  ;;  %v4074_v26 = vadd.f32 %v7742_v58, %v4061_v16  ;;  %v4125_v27 = vpop.f32.mrf.mxu0  ;;  %v6253_v32 = vor.u32 %v7074_v24, %v6252_v22  ;;  %v2860_v58 = vperm.slane %v7747_v23, 1 }
 0x4b3   :  { %4352 = vmatpush.bf16.msrb.mxu2 %v6141_v30 }
 0x4b4   :  { %4365 = vmatpush.bf16.msrb.mxu3 %v6365_v59  ;;  %v6646_v30 = vmul.f32 -1.442695, %v4074_v26  ;;  %v7011_v59 = vld [vmem:[#allocation14 + $0x1f0] sm:$0xf0]  ;;  %v4087_v48 = vadd.f32 %v4086_v21, %v2860_v58 }
 0x4b5   :  { %4341 = vmatpush.bf16.msrb.mxu1 %v5861_v39  ;;  %v4049_v35 = vpop.f32.mrf.mxu2  ;;  %v7067_v39 = vld [vmem:[#allocation14 + $0x3b0] sm:$0xf0]  ;;  %v6001_v14 = vor.u32 %v7011_v59, %v6000_v34  ;;  %v2862_v34 = vperm.slane %v7747_v23, 3 }
 0x4b6   :  { %4380 = vmatpush.bf16.msra.mxu0 %v6533_v10  ;;  %7202 = vpow2.f32 %v6646_v30  ;;  %v4062_v40 = vpop.f32.mrf.mxu3  ;;  %v6225_v10 = vor.u32 %v7067_v39, %v6224_v38 }
 0x4b7   :  { %4353 = vmatpush.bf16.msrb.mxu2 %v6113_v45 }
 0x4b8   :  { %4366 = vmatpush.bf16.msrb.mxu3 %v6337_v43 }
 0x4b9   :  { %4342 = vmatpush.bf16.msrb.mxu1 %v5833_v54  ;;  %v4088_v42 = vpop.f32.mrf.mxu1 }
 0x4ba   :  { %4381 = vmatpush.bf16.msra.mxu0 %v6505_v57  ;;  %v4127_v36 = vpop.f32.mrf.mxu0 }
 0x4bb   :  { %4354 = vmatpush.bf16.msrb.mxu2 %v6085_v60 }
 0x4bc   :  { %4367 = vmatpush.bf16.msrb.mxu3 %v6309_v0  ;;  %v7203_v45 = vpop.eup %7202 }
 0x4bd   :  { %4343 = vmatpush.bf16.msrb.mxu1 %v5805_v4  ;;  %v4410_v49 = vadd.f32 1.0, %v7203_v45  ;;  %v4099_v50 = vpop.f32.mrf.mxu2 }
 0x4be   :  { %4382 = vmatpush.bf16.msra.mxu0 %v6477_v11  ;;  %v4100_v43 = vadd.f32 %v4099_v50, %v4087_v48  ;;  %v4112_v51 = vpop.f32.mrf.mxu3 }
 0x4bf   :  { %4355 = vmatpush.bf16.msrb.mxu2 %v6057_v12  ;;  %7204 = vrcp.f32 %v4410_v49  ;;  %v4428_v60 = vand.u32 2147483648, %v4410_v49  ;;  %vm4422_vm1 = vweird.f32 %v4410_v49 }
 0x4c0   :  { %4368 = vmatpush.bf16.msrb.mxu3 %v6281_v44  ;;  %v4113_v52 = vadd.f32 %v4112_v51, %v4100_v43 }
 0x4c1   :  { %4344 = vmatpush.bf16.msrb.mxu1 %v5777_v47  ;;  %v4429_v2 = vor.u32 1.1754944e-38, %v4428_v60 }
 0x4c2   :  { %4383 = vmatpush.bf16.msra.mxu0 %v6449_v28  ;;  %v4126_v53 = vadd.f32 %v4125_v27, %v4113_v52  ;;  %v4177_v54 = vpop.f32.mrf.mxu0 }
 0x4c3   :  { %4356 = vmatpush.bf16.msrb.mxu2 %v6029_v29 }
 0x4c4   :  { %4369 = vmatpush.bf16.msrb.mxu3 %v6253_v32  ;;  %4345 = vmatmul.bf16.vlgmr.msrb.gmra.mxu1 %v7710_v33  ;;  %v4138_v33 = vpop.f32.mrf.mxu1 }
 0x4c5   :  { %4384 = vmatmul.bf16.vlgmr.msra.gmra.mxu0 %v7712_v19  ;;  %v6647_v19 = vmul.f32 -1.442695, %v4126_v53  ;;  %v7205_v55 = vpop.eup %7204  ;;  %v4101_v25 = vpop.f32.mrf.mxu2  ;;  %v4139_v1 = vadd.f32 %v4138_v33, %v2861_v9 }
 0x4c6   :  { %v4418_v56 = vmul.f32 %v7205_v55, %v4410_v49  ;;  %v4114_v57 = vpop.f32.mrf.mxu3  ;;  %vm4423_vm0 = vweird.f32 %v7205_v55 }
 0x4c7   :  { %4357 = vmatpush.bf16.msrb.mxu2 %v6001_v14  ;;  %7206 = vpow2.f32 %v6647_v19  ;;  %vm4424_vm2 = vmor %vm4422_vm1, %vm4423_vm0 }
 0x4c8   :  { %4370 = vmatpush.bf16.msrb.mxu3 %v6225_v10  ;;  %v4419_v8 = vsub.f32 1.0, %v4418_v56 }
 0x4ca   :  { %4358 = vmatmul.bf16.vlgmr.msrb.gmra.mxu2 %v7716_v41  ;;  %v4420_v62 = vmul.f32 %v7205_v55, %v4419_v8  ;;  %v4426_v41 = vand.u32 2147483647, %v4410_v49  ;;  %v4179_v63 = vpop.f32.mrf.mxu0  ;;  %v2863_v8 = vperm.slane %v7747_v23, 4 }
 0x4cb   :  { %4371 = vmatmul.bf16.vlgmr.msrb.gmra.mxu3 %v7718_v46 }
 0x4cc   :  { %v4140_v61 = vpop.f32.mrf.mxu1  ;;  %v4421_v0 = vadd.f32 %v7205_v55, %v4420_v62  ;;  %vm4427_vm3 = vcmp.eq.f32.partialorder %v4426_v41, 8.507059e+37 }
 0x4cd   :  { %v7207_v46 = vpop.eup %7206  ;;  %v4151_v4 = vpop.f32.mrf.mxu2 }
 0x4ce   :  { %v4411_v3 = vadd.f32 1.0, %v7207_v46  ;;  %v4425_v5 = vsel %vm4424_vm2, %v7205_v55, %v4421_v0  ;;  %v4152_v17 = vadd.f32 %v4151_v4, %v4139_v1  ;;  %v4164_v6 = vpop.f32.mrf.mxu3 }
 0x4cf   :  { %v4430_v7 = vsel %vm4427_vm3, %v4429_v2, %v4425_v5 }
 0x4d0   :  { %7208 = vrcp.f32 %v4411_v3  ;;  %4522 = vst [vmem:[#allocation16] sm:$0xff] %v4430_v7  ;;  %v4165_v11 = vadd.f32 %v4164_v6, %v4152_v17  ;;  %v4443_v18 = vand.u32 2147483648, %v4411_v3  ;;  %v4441_v21 = vand.u32 2147483647, %v4411_v3 }
 0x4d1   :  { %vm4437_vm5 = vweird.f32 %v4411_v3 }
 0x4d2   :  { %v4178_v31 = vadd.f32 %v4177_v54, %v4165_v11  ;;  %v4444_v24 = vor.u32 1.1754944e-38, %v4443_v18  ;;  %vm4442_vm7 = vcmp.eq.f32.partialorder %v4441_v21, 8.507059e+37 }
 0x4d4   :  { %v6648_v15 = vmul.f32 -1.442695, %v4178_v31 }
 0x4d5   :  { %v4153_v37 = vpop.f32.mrf.mxu2 }
 0x4d6   :  { %v7209_v12 = vpop.eup %7208  ;;  %7210 = vpow2.f32 %v6648_v15  ;;  %v4166_v16 = vpop.f32.mrf.mxu3 }
 0x4d7   :  { %v4433_v13 = vmul.f32 %v7209_v12, %v4411_v3  ;;  %vm4438_vm4 = vweird.f32 %v7209_v12 }
 0x4d8   :  { %vm4439_vm6 = vmor %vm4437_vm5, %vm4438_vm4 }
 0x4d9   :  { %v4434_v44 = vsub.f32 1.0, %v4433_v13 }
 0x4db   :  { %v4435_v20 = vmul.f32 %v7209_v12, %v4434_v44 }
 0x4dc   :  { %v7211_v47 = vpop.eup %7210 }
 0x4dd   :  { %v4436_v22 = vadd.f32 %v7209_v12, %v4435_v20  ;;  %v4412_v26 = vadd.f32 1.0, %v7211_v47  ;;  %v2864_v20 = vperm.slane %v7747_v23, 5 }
 0x4df   :  { %v4440_v27 = vsel %vm4439_vm6, %v7209_v12, %v4436_v22  ;;  %7212 = vrcp.f32 %v4412_v26  ;;  %v4458_v40 = vand.u32 2147483648, %v4412_v26  ;;  %v4456_v10 = vand.u32 2147483647, %v4412_v26 }
 0x4e0   :  { %v4445_v29 = vsel %vm4442_vm7, %v4444_v24, %v4440_v27  ;;  %vm4452_vm9 = vweird.f32 %v4412_v26 }
 0x4e1   :  { %v4190_v28 = vpop.f32.mrf.mxu1  ;;  %4523 = vst [vmem:[#allocation16 + $0x8] sm:$0xff] %v4445_v29  ;;  %v4459_v49 = vor.u32 1.1754944e-38, %v4458_v40  ;;  %vm4457_vm11 = vcmp.eq.f32.partialorder %v4456_v10, 8.507059e+37 }
 0x4e2   :  { %v4229_v30 = vpop.f32.mrf.mxu0  ;;  %v4191_v14 = vadd.f32 %v4190_v28, %v2862_v34 }
 0x4e5   :  { %v7213_v32 = vpop.eup %7212 }
 0x4e6   :  { %v4448_v59 = vmul.f32 %v7213_v32, %v4412_v26  ;;  %vm4453_vm8 = vweird.f32 %v7213_v32 }
 0x4e7   :  { %vm4454_vm10 = vmor %vm4452_vm9, %vm4453_vm8 }
 0x4e8   :  { %v4449_v39 = vsub.f32 1.0, %v4448_v59 }
 0x4e9   :  { %v4192_v35 = vpop.f32.mrf.mxu1 }
 0x4ea   :  { %v4231_v38 = vpop.f32.mrf.mxu0  ;;  %v4450_v58 = vmul.f32 %v7213_v32, %v4449_v39 }
 0x4ec   :  { %v4451_v48 = vadd.f32 %v7213_v32, %v4450_v58 }
 0x4ed   :  { %v4203_v42 = vpop.f32.mrf.mxu2 }
 0x4ee   :  { %v4204_v36 = vadd.f32 %v4203_v42, %v4191_v14  ;;  %v4216_v45 = vpop.f32.mrf.mxu3  ;;  %v4455_v43 = vsel %vm4454_vm10, %v7213_v32, %v4451_v48 }
 0x4ef   :  { %v4460_v51 = vsel %vm4457_vm11, %v4459_v49, %v4455_v43  ;;  %v2865_v43 = vperm.slane %v7747_v23, 6 }
 0x4f0   :  { %v4217_v50 = vadd.f32 %v4216_v45, %v4204_v36  ;;  %4524 = vst [vmem:[#allocation16 + $0x10] sm:$0xff] %v4460_v51 }
 0x4f2   :  { %v4230_v52 = vadd.f32 %v4229_v30, %v4217_v50 }
 0x4f4   :  { %v6649_v33 = vmul.f32 -1.442695, %v4230_v52 }
 0x4f5   :  { %v4205_v53 = vpop.f32.mrf.mxu2 }
 0x4f6   :  { %7214 = vpow2.f32 %v6649_v33  ;;  %v4218_v54 = vpop.f32.mrf.mxu3 }
 0x4fc   :  { %v7215_v19 = vpop.eup %7214 }
 0x4fd   :  { %v4413_v55 = vadd.f32 1.0, %v7215_v19 }
 0x4ff   :  { %7216 = vrcp.f32 %v4413_v55  ;;  %v4473_v41 = vand.u32 2147483648, %v4413_v55  ;;  %v4471_v0 = vand.u32 2147483647, %v4413_v55  ;;  %vm4467_vm13 = vweird.f32 %v4413_v55 }
 0x501   :  { %v4242_v25 = vpop.f32.mrf.mxu1  ;;  %v4474_v5 = vor.u32 1.1754944e-38, %v4473_v41  ;;  %vm4472_vm15 = vcmp.eq.f32.partialorder %v4471_v0, 8.507059e+37 }
 0x502   :  { %v4281_v56 = vpop.f32.mrf.mxu0  ;;  %v4243_v63 = vadd.f32 %v4242_v25, %v2863_v8 }
 0x505   :  { %v7217_v57 = vpop.eup %7216 }
 0x506   :  { %v4463_v9 = vmul.f32 %v7217_v57, %v4413_v55  ;;  %vm4468_vm12 = vweird.f32 %v7217_v57 }
 0x507   :  { %vm4469_vm14 = vmor %vm4467_vm13, %vm4468_vm12 }
 0x508   :  { %v4464_v62 = vsub.f32 1.0, %v4463_v9 }
 0x509   :  { %v4244_v60 = vpop.f32.mrf.mxu1 }
 0x50a   :  { %v4283_v61 = vpop.f32.mrf.mxu0  ;;  %v4465_v46 = vmul.f32 %v7217_v57, %v4464_v62 }
 0x50c   :  { %v4466_v4 = vadd.f32 %v7217_v57, %v4465_v46 }
 0x50d   :  { %v4255_v1 = vpop.f32.mrf.mxu2 }
 0x50e   :  { %v4256_v2 = vadd.f32 %v4255_v1, %v4243_v63  ;;  %v4268_v3 = vpop.f32.mrf.mxu3  ;;  %v4470_v6 = vsel %vm4469_vm14, %v7217_v57, %v4466_v4 }
 0x50f   :  { %v4475_v7 = vsel %vm4472_vm15, %v4474_v5, %v4470_v6 }
 0x510   :  { %v4269_v17 = vadd.f32 %v4268_v3, %v4256_v2  ;;  %4525 = vst [vmem:[#allocation16 + $0x18] sm:$0xff] %v4475_v7 }
 0x512   :  { %v4282_v11 = vadd.f32 %v4281_v56, %v4269_v17 }
 0x514   :  { %v6650_v31 = vmul.f32 -1.442695, %v4282_v11 }
 0x515   :  { %v4257_v15 = vpop.f32.mrf.mxu2 }
 0x516   :  { %7218 = vpow2.f32 %v6650_v31  ;;  %v4270_v12 = vpop.f32.mrf.mxu3 }
 0x51c   :  { %v7219_v37 = vpop.eup %7218 }
 0x51d   :  { %v4414_v13 = vadd.f32 1.0, %v7219_v37 }
 0x51f   :  { %7220 = vrcp.f32 %v4414_v13  ;;  %v4488_v26 = vand.u32 2147483648, %v4414_v13  ;;  %v4486_v29 = vand.u32 2147483647, %v4414_v13  ;;  %vm4482_vm1 = vweird.f32 %v4414_v13 }
 0x521   :  { %v4294_v16 = vpop.f32.mrf.mxu1  ;;  %v4489_v35 = vor.u32 1.1754944e-38, %v4488_v26  ;;  %vm4487_vm3 = vcmp.eq.f32.partialorder %v4486_v29, 8.507059e+37 }
 0x522   :  { %v4333_v44 = vpop.f32.mrf.mxu0  ;;  %v4295_v27 = vadd.f32 %v4294_v16, %v2864_v20 }
 0x525   :  { %v7221_v18 = vpop.eup %7220 }
 0x526   :  { %v4478_v21 = vmul.f32 %v7221_v18, %v4414_v13  ;;  %vm4483_vm0 = vweird.f32 %v7221_v18 }
 0x527   :  { %vm4484_vm2 = vmor %vm4482_vm1, %vm4483_vm0 }
 0x528   :  { %v4479_v24 = vsub.f32 1.0, %v4478_v21 }
 0x529   :  { %v4296_v47 = vpop.f32.mrf.mxu1 }
 0x52a   :  { %v4335_v22 = vpop.f32.mrf.mxu0  ;;  %v4480_v28 = vmul.f32 %v7221_v18, %v4479_v24 }
 0x52c   :  { %v4481_v59 = vadd.f32 %v7221_v18, %v4480_v28 }
 0x52d   :  { %v4307_v30 = vpop.f32.mrf.mxu2 }
 0x52e   :  { %v4308_v32 = vadd.f32 %v4307_v30, %v4295_v27  ;;  %v4320_v34 = vpop.f32.mrf.mxu3  ;;  %v4485_v39 = vsel %vm4484_vm2, %v7221_v18, %v4481_v59 }
 0x52f   :  { %v4490_v40 = vsel %vm4487_vm3, %v4489_v35, %v4485_v39 }
 0x530   :  { %v4321_v38 = vadd.f32 %v4320_v34, %v4308_v32  ;;  %4526 = vst [vmem:[#allocation16 + $0x20] sm:$0xff] %v4490_v40 }
 0x532   :  { %v4334_v14 = vadd.f32 %v4333_v44, %v4321_v38 }
 0x534   :  { %v6651_v58 = vmul.f32 -1.442695, %v4334_v14 }
 0x535   :  { %v4309_v10 = vpop.f32.mrf.mxu2 }
 0x536   :  { %7222 = vpow2.f32 %v6651_v58  ;;  %v4322_v42 = vpop.f32.mrf.mxu3 }
 0x53c   :  { %v7223_v36 = vpop.eup %7222 }
 0x53d   :  { %v4415_v45 = vadd.f32 1.0, %v7223_v36 }
 0x53f   :  { %7224 = vrcp.f32 %v4415_v45  ;;  %v4503_v54 = vand.u32 2147483648, %v4415_v45  ;;  %v4501_v25 = vand.u32 2147483647, %v4415_v45  ;;  %vm4497_vm5 = vweird.f32 %v4415_v45 }
 0x541   :  { %v4346_v48 = vpop.f32.mrf.mxu1  ;;  %v4504_v60 = vor.u32 1.1754944e-38, %v4503_v54  ;;  %vm4502_vm7 = vcmp.eq.f32.partialorder %v4501_v25, 8.507059e+37 }
 0x542   :  { %v4385_v49 = vpop.f32.mrf.mxu0  ;;  %v4347_v19 = vadd.f32 %v4346_v48, %v2865_v43 }
 0x545   :  { %v7225_v50 = vpop.eup %7224 }
 0x546   :  { %v4493_v51 = vmul.f32 %v7225_v50, %v4415_v45  ;;  %vm4498_vm4 = vweird.f32 %v7225_v50 }
 0x547   :  { %vm4499_vm6 = vmor %vm4497_vm5, %vm4498_vm4 }
 0x548   :  { %v4494_v53 = vsub.f32 1.0, %v4493_v51 }
 0x549   :  { %v4348_v52 = vpop.f32.mrf.mxu1 }
 0x54a   :  { %v4387_v33 = vpop.f32.mrf.mxu0  ;;  %v4495_v55 = vmul.f32 %v7225_v50, %v4494_v53 }
 0x54c   :  { %v4496_v9 = vadd.f32 %v7225_v50, %v4495_v55 }
 0x54d   :  { %v4359_v56 = vpop.f32.mrf.mxu2 }
 0x54e   :  { %v4360_v57 = vadd.f32 %v4359_v56, %v4347_v19  ;;  %v4372_v8 = vpop.f32.mrf.mxu3  ;;  %v4500_v62 = vsel %vm4499_vm6, %v7225_v50, %v4496_v9 }
 0x54f   :  { %v4505_v23 = vsel %vm4502_vm7, %v4504_v60, %v4500_v62 }
 0x550   :  { %v4373_v61 = vadd.f32 %v4372_v8, %v4360_v57  ;;  %4527 = vst [vmem:[#allocation16 + $0x28] sm:$0xff] %v4505_v23 }
 0x552   :  { %v4386_v41 = vadd.f32 %v4385_v49, %v4373_v61 }
 0x554   :  { %v6652_v63 = vmul.f32 -1.442695, %v4386_v41 }
 0x555   :  { %v4361_v46 = vpop.f32.mrf.mxu2 }
 0x556   :  { %7226 = vpow2.f32 %v6652_v63  ;;  %v4374_v0 = vpop.f32.mrf.mxu3 }
 0x55c   :  { %v7227_v1 = vpop.eup %7226 }
 0x55d   :  { %v4416_v2 = vadd.f32 1.0, %v7227_v1 }
 0x55f   :  { %7228 = vrcp.f32 %v4416_v2  ;;  %v4518_v17 = vand.u32 2147483648, %v4416_v2  ;;  %v4516_v7 = vand.u32 2147483647, %v4416_v2  ;;  %vm4512_vm9 = vweird.f32 %v4416_v2 }
 0x561   :  { %v4519_v31 = vor.u32 1.1754944e-38, %v4518_v17  ;;  %vm4517_vm11 = vcmp.eq.f32.partialorder %v4516_v7, 8.507059e+37 }
 0x565   :  { %v7229_v3 = vpop.eup %7228 }
 0x566   :  { %v4508_v4 = vmul.f32 %v7229_v3, %v4416_v2  ;;  %vm4513_vm8 = vweird.f32 %v7229_v3 }
 0x567   :  { %vm4514_vm10 = vmor %vm4512_vm9, %vm4513_vm8 }
 0x568   :  { %v4509_v5 = vsub.f32 1.0, %v4508_v4 }
 0x56a   :  { %v4510_v6 = vmul.f32 %v7229_v3, %v4509_v5 }
 0x56c   :  { %v4511_v11 = vadd.f32 %v7229_v3, %v4510_v6 }
 0x56e   :  { %v4515_v15 = vsel %vm4514_vm10, %v7229_v3, %v4511_v11 }
 0x56f   :  { %v4520_v12 = vsel %vm4517_vm11, %v4519_v31, %v4515_v15 }
 0x570   :  { %4528 = vst [vmem:[#allocation16 + $0x30] sm:$0xff] %v4520_v12 }
 0x571   :  { %4539 = dma.vmem_to_hbm [thread:$0]  %s4535_s5, 896, %s4537_s23, [#allocation4]  }
 0x572   :  { %7480 = dma.done.wait [#allocation4], 896  }
 0x573   :  { %7481 = vsyncadd [#allocation4], 4294966400 }
 0x574   :  { %7482 = dma.done.wait [#allocation18], 128  }
 0x575   :  { %7483 = vsyncadd [#allocation18], 4294967168 }
 0x576   :  { %4559 = vsyncpa [#allocation3], 1 }
 0x577   :  { %4560 = vsyncpa [#allocation6], 1 }
 0x578   :  { %4561 = vsyncpa [#allocation9], 1 }
 0x579   :  { %4562 = vsyncpa [#allocation12], 1 }
 0x57a   :  { %4563 = vsyncpa [#allocation15], 1 }
 0x57b   :  { %4564 = vsyncpa [#allocation4], 1 }
 0x57c   :  { %4565 = vsyncpa [#allocation18], 1 }

</bundles_post_ra>
